<compile_context>
chip_gen: v7x
topology: tpu7x:2x2x1
jax: 0.10.0
libtpu: 0.0.40
codegen_flags: <defaults>
</compile_context>

<pallas_src>
import math
import functools

import jax
import jax.numpy as jnp
from jax.experimental import pallas as pl
from jax.experimental.pallas import tpu as pltpu

_EPS = 1e-5

# ----------------------------------------------------------------------------
# Small host-side helpers
# ----------------------------------------------------------------------------
_SINGLE_BUFFER_OK = False   # set by probe_single_buffering() (host, pre-jit)
_VMEM_CAP = None


def probe_single_buffering():
    """Check (once, eagerly, pre-jit) whether pipeline_mode=pl.Buffered(1) works."""
    global _SINGLE_BUFFER_OK
    try:
        def k(w_ref, x_ref, o_ref):
            o_ref[...] = x_ref[...] + w_ref[...]

        f = pl.pallas_call(
            k,
            out_shape=jax.ShapeDtypeStruct((16, 128), jnp.float32),
            grid=(2,),
            in_specs=[
                pl.BlockSpec((8, 128), lambda i: (0, 0),
                             pipeline_mode=pl.Buffered(1)),   # constant block
                pl.BlockSpec((8, 128), lambda i: (i, 0)),
            ],
            out_specs=pl.BlockSpec((8, 128), lambda i: (i, 0)),
        )
        jax.block_until_ready(
            f(jnp.zeros((8, 128), jnp.float32), jnp.zeros((16, 128), jnp.float32)))
        _SINGLE_BUFFER_OK = True
    except Exception:
        _SINGLE_BUFFER_OK = False
    return _SINGLE_BUFFER_OK


def _const_weight_spec(shape, index_map):
    """BlockSpec for grid-invariant (weight) blocks: single-buffer if supported."""
    if _SINGLE_BUFFER_OK:
        return pl.BlockSpec(shape, index_map, pipeline_mode=pl.Buffered(1))
    return pl.BlockSpec(shape, index_map)


def _vmem_cap():
    global _VMEM_CAP
    if _VMEM_CAP is None:
        try:
            _VMEM_CAP = int(pltpu.get_tpu_info().vmem_capacity_bytes * 3 // 4)
        except Exception:
            _VMEM_CAP = 64 << 20          # conservative (v7x physical is 64 MiB)
    return _VMEM_CAP


def _nbytes(a):
    return math.prod(a.shape) * jnp.dtype(a.dtype).itemsize


def _vmem_budget(*byte_counts):
    est = 2 * int(sum(byte_counts)) + (8 << 20)     # ~double-buffered + headroom
    return int(max(32 << 20, min(est, _vmem_cap())))


def _pick_vocab_tile(v):
    for tv in (512, 256, 128):
        if v % tv == 0:
            return tv
    return v   # small / odd vocab: single full-width tile


# ----------------------------------------------------------------------------
# In-kernel helpers
# ----------------------------------------------------------------------------
def _bf16(x):
    return x.astype(jnp.bfloat16)


def _ln(x, g, b, eps):
    mu = jnp.mean(x, axis=-1, keepdims=True)
    var = jnp.mean((x - mu) * (x - mu), axis=-1, keepdims=True)
    return (x - mu) * jax.lax.rsqrt(var + eps) * g + b


def _attention(q, k, v, masked, n_heads, scale):
    """q:(Tq,D) k,v:(Tk,D) f32; masked:(Tq,Tk) bool -> (Tq,D) f32 context."""
    Tq, D = q.shape
    Tk = k.shape[0]
    dh = D // n_heads
    # (T, D) -> (H, T, dh): heads become a batch dim for the MXU.
    qh = _bf16(jnp.transpose(q.reshape(Tq, n_heads, dh), (1, 0, 2)))
    kh = _bf16(jnp.transpose(k.reshape(Tk, n_heads, dh), (1, 0, 2)))
    vh = _bf16(jnp.transpose(v.reshape(Tk, n_heads, dh), (1, 0, 2)))

    s = jnp.einsum("hqd,hkd->hqk", qh, kh,
                   preferred_element_type=jnp.float32) * scale       # (H,Tq,Tk)
    s = jnp.where(masked[None, :, :], -1e9, s)
    s = s - jnp.max(s, axis=-1, keepdims=True)
    probs = jnp.exp(s)
    probs = probs / jnp.sum(probs, axis=-1, keepdims=True)            # exact softmax

    ctx = jnp.einsum("hqk,hkd->hqd", _bf16(probs), vh,
                     preferred_element_type=jnp.float32)              # (H,Tq,dh)
    # concatenate heads -> (Tq, D) so Wo is a single full-K matmul
    return jnp.transpose(ctx, (1, 0, 2)).reshape(Tq, D)


# ----------------------------------------------------------------------------
# Self-attention sub-layer kernel: out = x + Wo(attn(LN(x)Wq, LN(x)Wk, LN(x)Wv))
# ----------------------------------------------------------------------------
def _self_attn_kernel(len_ref, x_ref, g_ref, b_ref, wqkv_ref, bqkv_ref,
                      wo_ref, bo_ref, o_ref, *, n_heads, causal, eps):
    bidx = pl.program_id(0)
    x = x_ref[0]                                       # (T, D) f32 residual stream
    T, D = x.shape
    scale = 1.0 / math.sqrt(D // n_heads)

    xn = _ln(x, g_ref[...], b_ref[...], eps)
    qkv = jnp.dot(_bf16(xn), wqkv_ref[...],            # bf16 weight ref (pre-cast)
                  preferred_element_type=jnp.float32) + bqkv_ref[...]
    q, k, v = qkv[:, :D], qkv[:, D:2 * D], qkv[:, 2 * D:]

    # key-padding (+ causal) mask built from scalar-prefetched lengths (SMEM)
    klen = len_ref[bidx]
    kpos = jax.lax.broadcasted_iota(jnp.int32, (T, T), 1)
    masked = kpos >= klen
    if causal:
        qpos = jax.lax.broadcasted_iota(jnp.int32, (T, T), 0)
        masked = masked | (kpos > qpos)

    ctx = _attention(q, k, v, masked, n_heads, scale)
    out = jnp.dot(_bf16(ctx), wo_ref[...], preferred_element_type=jnp.float32)
    o_ref[0] = x + out + bo_ref[...]                    # fused residual add


def self_attn_sublayer(p, x, lengths, *, n_heads, causal):
    B, T, D = x.shape
    kernel = functools.partial(_self_attn_kernel, n_heads=n_heads,
                               causal=causal, eps=_EPS)
    grid_spec = pltpu.PrefetchScalarGridSpec(
        num_scalar_prefetch=1,                          # lengths -> SMEM
        grid=(B,),
        in_specs=[
            pl.BlockSpec((1, T, D), lambda i, lens: (i, 0, 0)),          # x
            _const_weight_spec((1, D), lambda i, lens: (0, 0)),          # ln gamma
            _const_weight_spec((1, D), lambda i, lens: (0, 0)),          # ln beta
            _const_weight_spec((D, 3 * D), lambda i, lens: (0, 0)),      # wqkv bf16
            _const_weight_spec((1, 3 * D), lambda i, lens: (0, 0)),      # bqkv
            _const_weight_spec((D, D), lambda i, lens: (0, 0)),          # wo bf16
            _const_weight_spec((1, D), lambda i, lens: (0, 0)),          # bo
        ],
        out_specs=pl.BlockSpec((1, T, D), lambda i, lens: (i, 0, 0)),
    )
    vmem = _vmem_budget(2 * T * D * 4, _nbytes(p["wqkv"]), _nbytes(p["wo"]))
    # TODO(synk): for production T >= 2048 add a Tq-tile grid axis (online-softmax
    # / flash form with a Tk axis) so v7x's two TensorCores stay busy at B=1.
    return pl.pallas_call(
        kernel,
        out_shape=jax.ShapeDtypeStruct((B, T, D), jnp.float32),
        grid_spec=grid_spec,
        compiler_params=pltpu.CompilerParams(
            dimension_semantics=("parallel",), vmem_limit_bytes=vmem),
    )(lengths, x, p["ln_g"], p["ln_b"], p["wqkv"], p["bqkv"], p["wo"], p["bo"])


# ----------------------------------------------------------------------------
# Cross-attention sub-layer kernel: out = x + Wo(attn(LN(x)Wq, mem Wk, mem Wv))
# (mem = encoder output, already final-LayerNorm'd — matches the reference)
# ----------------------------------------------------------------------------
def _cross_attn_kernel(len_ref, x_ref, kv_ref, g_ref, b_ref, wq_ref, bq_ref,
                       wkv_ref, bkv_ref, wo_ref, bo_ref, o_ref, *, n_heads, eps):
    bidx = pl.program_id(0)
    x = x_ref[0]                                        # (Tq, D)
    mem = kv_ref[0]                                     # (Tk, D)
    Tq, D = x.shape
    Tk = mem.shape[0]
    scale = 1.0 / math.sqrt(D // n_heads)

    xn = _ln(x, g_ref[...], b_ref[...], eps)
    q = jnp.dot(_bf16(xn), wq_ref[...],
                preferred_element_type=jnp.float32) + bq_ref[...]
    kvp = jnp.dot(_bf16(mem), wkv_ref[...],
                  preferred_element_type=jnp.float32) + bkv_ref[...]
    k, v = kvp[:, :D], kvp[:, D:]

    klen = len_ref[bidx]
    kpos = jax.lax.broadcasted_iota(jnp.int32, (Tq, Tk), 1)
    masked = kpos >= klen

    ctx = _attention(q, k, v, masked, n_heads, scale)
    out = jnp.dot(_bf16(ctx), wo_ref[...], preferred_element_type=jnp.float32)
    o_ref[0] = x + out + bo_ref[...]


def cross_attn_sublayer(p, x, mem, mem_lengths, *, n_heads):
    B, Tq, D = x.shape
    Tk = mem.shape[1]
    kernel = functools.partial(_cross_attn_kernel, n_heads=n_heads, eps=_EPS)
    grid_spec = pltpu.PrefetchScalarGridSpec(
        num_scalar_prefetch=1,
        grid=(B,),
        in_specs=[
            pl.BlockSpec((1, Tq, D), lambda i, lens: (i, 0, 0)),          # x
            pl.BlockSpec((1, Tk, D), lambda i, lens: (i, 0, 0)),          # enc memory
            _const_weight_spec((1, D), lambda i, lens: (0, 0)),           # ln gamma
            _const_weight_spec((1, D), lambda i, lens: (0, 0)),           # ln beta
            _const_weight_spec((D, D), lambda i, lens: (0, 0)),           # wq bf16
            _const_weight_spec((1, D), lambda i, lens: (0, 0)),           # bq
            _const_weight_spec((D, 2 * D), lambda i, lens: (0, 0)),       # wkv bf16
            _const_weight_spec((1, 2 * D), lambda i, lens: (0, 0)),       # bkv
            _const_weight_spec((D, D), lambda i, lens: (0, 0)),           # wo bf16
            _const_weight_spec((1, D), lambda i, lens: (0, 0)),           # bo
        ],
        out_specs=pl.BlockSpec((1, Tq, D), lambda i, lens: (i, 0, 0)),
    )
    vmem = _vmem_budget(2 * Tq * D * 4, Tk * D * 4,
                        _nbytes(p["wq"]), _nbytes(p["wkv"]), _nbytes(p["wo"]))
    return pl.pallas_call(
        kernel,
        out_shape=jax.ShapeDtypeStruct((B, Tq, D), jnp.float32),
        grid_spec=grid_spec,
        compiler_params=pltpu.CompilerParams(
            dimension_semantics=("parallel",), vmem_limit_bytes=vmem),
    )(mem_lengths, x, mem, p["ln_g"], p["ln_b"], p["wq"], p["bq"],
      p["wkv"], p["bkv"], p["wo"], p["bo"])


# ----------------------------------------------------------------------------
# FFN sub-layer kernel: out = x + W2(relu(W1 LN(x)))  [+ optional fused final LN]
# ----------------------------------------------------------------------------
def _ffn_kernel(x_ref, g_ref, b_ref, w1_ref, b1_ref, w2_ref, b2_ref, *rest,
                fuse_final_ln, eps):
    if fuse_final_ln:
        fg_ref, fb_ref, o_ref = rest
    else:
        (o_ref,) = rest
    x = x_ref[0]                                       # (T, D)
    h = _ln(x, g_ref[...], b_ref[...], eps)
    h = jnp.dot(_bf16(h), w1_ref[...],
                preferred_element_type=jnp.float32) + b1_ref[...]
    h = jnp.maximum(h, 0.0)
    y = jnp.dot(_bf16(h), w2_ref[...],
                preferred_element_type=jnp.float32) + b2_ref[...]
    y = x + y                                          # fused residual add
    if fuse_final_ln:                                  # encoder final LN epilogue
        y = _ln(y, fg_ref[...], fb_ref[...], eps)
    o_ref[0] = y


def ffn_sublayer(p, x, *, final_ln=None):
    B, T, D = x.shape
    Dff = p["w1"].shape[1]
    fuse = final_ln is not None
    kernel = functools.partial(_ffn_kernel, fuse_final_ln=fuse, eps=_EPS)
    in_specs = [
        pl.BlockSpec((1, T, D), lambda i: (i, 0, 0)),
        _const_weight_spec((1, D), lambda i: (0, 0)),
        _const_weight_spec((1, D), lambda i: (0, 0)),
        _const_weight_spec((D, Dff), lambda i: (0, 0)),        # w1 bf16
        _const_weight_spec((1, Dff), lambda i: (0, 0)),
        _const_weight_spec((Dff, D), lambda i: (0, 0)),        # w2 bf16
        _const_weight_spec((1, D), lambda i: (0, 0)),
    ]
    args = [x, p["ln_g"], p["ln_b"], p["w1"], p["b1"], p["w2"], p["b2"]]
    if fuse:
        in_specs += [_const_weight_spec((1, D), lambda i: (0, 0)),
                     _const_weight_spec((1, D), lambda i: (0, 0))]
        args += [final_ln[0], final_ln[1]]
    vmem = _vmem_budget(2 * T * D * 4, T * Dff * 4,
                        _nbytes(p["w1"]), _nbytes(p["w2"]))
    # TODO(synk): at production D/Dff (e.g. 1024/4096) add a Dff-tile grid axis
    # (VMEM f32 accumulator + pl.when init/finalize) to bound weight + hidden
    # residency on v7x's 64 MiB VMEM; optionally tile T for a 2nd parallel axis.
    out = pl.pallas_call(
        kernel,
        out_shape=jax.ShapeDtypeStruct((B, T, D), jnp.float32),
        grid=(B,),
        in_specs=in_specs,
        out_specs=pl.BlockSpec((1, T, D), lambda i: (i, 0, 0)),
        compiler_params=pltpu.CompilerParams(
            dimension_semantics=("parallel",), vmem_limit_bytes=vmem),
    )(*args)
    return out, None    # non-MoE FFN: gating_variance is None (as in reference)


# ----------------------------------------------------------------------------
# Decoder head: fused final LayerNorm + classifier, tiled over vocab lanes
# ----------------------------------------------------------------------------
def _ln_classifier_kernel(x_ref, g_ref, b_ref, w_ref, bc_ref, o_ref, *, eps):
    # LN recomputed per vocab tile — cheap VPU/XLU work vs the (T,D)x(D,TV) matmul.
    xn = _ln(x_ref[0], g_ref[...], b_ref[...], eps)
    o_ref[0] = jnp.dot(_bf16(xn), w_ref[...],
                       preferred_element_type=jnp.float32) + bc_ref[...]


def ln_classifier(p, x):
    B, T, D = x.shape
    V = p["cls_w"].shape[1]
    TV = _pick_vocab_tile(V)
    nv = V // TV
    vmem = _vmem_budget(T * D * 4, D * TV * 2, T * TV * 4)
    return pl.pallas_call(
        functools.partial(_ln_classifier_kernel, eps=_EPS),
        out_shape=jax.ShapeDtypeStruct((B, T, V), jnp.float32),
        grid=(B, nv),
        in_specs=[
            pl.BlockSpec((1, T, D), lambda i, j: (i, 0, 0)),
            _const_weight_spec((1, D), lambda i, j: (0, 0)),
            _const_weight_spec((1, D), lambda i, j: (0, 0)),
            pl.BlockSpec((D, TV), lambda i, j: (0, j)),        # vocab-tiled bf16 W
            pl.BlockSpec((1, TV), lambda i, j: (0, j)),
        ],
        out_specs=pl.BlockSpec((1, T, TV), lambda i, j: (i, 0, j)),
        compiler_params=pltpu.CompilerParams(
            dimension_semantics=("parallel", "parallel"), vmem_limit_bytes=vmem),
    )(x, p["ln_g"], p["ln_b"], p["cls_w"], p["cls_b"])


# ----------------------------------------------------------------------------
# Model glue (plain JAX only for embedding gather / layer loop)
# ----------------------------------------------------------------------------
def encoder_forward(p, token_ids, lengths, n_heads):
    T = token_ids.shape[1]
    D = p["embedding"].shape[1]
    # TODO(synk): dynamic embedding gather + positional add kept in XLA.
    x = p["embedding"][token_ids] * math.sqrt(D) + p["pos_enc"][:, :T, :]
    gating = []
    n_layers = len(p["layers"])
    for li, lp in enumerate(p["layers"]):
        x = self_attn_sublayer(lp["self_attn"], x, lengths,
                               n_heads=n_heads, causal=False)
        # fuse the encoder's final LayerNorm into the last FFN kernel
        fln = (p["ln_g"], p["ln_b"]) if li == n_layers - 1 else None
        x, gv = ffn_sublayer(lp["fcn"], x, final_ln=fln)
        if gv is not None:
            gating.append(gv)
    return x, gating


def decoder_forward(p, token_ids, dec_lengths, enc_x, enc_lengths, n_heads):
    T = token_ids.shape[1]
    D = p["embedding"].shape[1]
    x = p["embedding"][token_ids] * math.sqrt(D) + p["pos_enc"][:, :T, :]
    gating = []
    for lp in p["layers"]:
        x = self_attn_sublayer(lp["self_attn"], x, dec_lengths,
                               n_heads=n_heads, causal=True)
        x = cross_attn_sublayer(lp["cross_attn"], x, enc_x, enc_lengths,
                                n_heads=n_heads)
        x, gv = ffn_sublayer(lp["fcn"], x)
        if gv is not None:
            gating.append(gv)
    logits = ln_classifier(p, x)     # fused final LN + classifier (vocab-tiled)
    return logits, gating


@functools.partial(jax.jit, static_argnames=("n_heads",))
def transformer_forward(params, encoder_sequences, decoder_sequences,
                        encoder_sequence_lengths, decoder_sequence_lengths,
                        *, n_heads):
    enc_out, enc_gv = encoder_forward(params["encoder"], encoder_sequences,
                                      encoder_sequence_lengths, n_heads)
    dec_out, dec_gv = decoder_forward(params["decoder"], decoder_sequences,
                                      decoder_sequence_lengths, enc_out,
                                      encoder_sequence_lengths, n_heads)
    return dec_out, enc_gv, dec_gv


# ----------------------------------------------------------------------------
# Parameter init (f32, reference-like) + host-side preprocessing (bf16 weights)
# ----------------------------------------------------------------------------
def positional_encoding(max_len, d_model):
    pos = jnp.arange(max_len, dtype=jnp.float32)[:, None]
    i = jnp.arange(0, d_model, 2, dtype=jnp.float32)
    angle = pos / jnp.power(10000.0, i / d_model)
    pe = jnp.zeros((max_len, d_model), jnp.float32)
    pe = pe.at[:, 0::2].set(jnp.sin(angle))
    pe = pe.at[:, 1::2].set(jnp.cos(angle))
    return pe[None]  # (1, max_len, d_model)


class _KeyGen:
    def __init__(self, key):
        self.key = key

    def __call__(self):
        self.key, sub = jax.random.split(self.key)
        return sub


def _mha_params(kg, d_model, scale=0.02):
    return {
        "ln_g": jnp.ones((d_model,), jnp.float32),
        "ln_b": jnp.zeros((d_model,), jnp.float32),
        "wqkv": scale * jax.random.normal(kg(), (d_model, 3 * d_model), jnp.float32),
        "bqkv": jnp.zeros((3 * d_model,), jnp.float32),
        "wo": scale * jax.random.normal(kg(), (d_model, d_model), jnp.float32),
        "bo": jnp.zeros((d_model,), jnp.float32),
    }


def _fcn_params(kg, d_model, d_ff, scale=0.02):
    return {
        "ln_g": jnp.ones((d_model,), jnp.float32),
        "ln_b": jnp.zeros((d_model,), jnp.float32),
        "w1": scale * jax.random.normal(kg(), (d_model, d_ff), jnp.float32),
        "b1": jnp.zeros((d_ff,), jnp.float32),
        "w2": scale * jax.random.normal(kg(), (d_ff, d_model), jnp.float32),
        "b2": jnp.zeros((d_model,), jnp.float32),
    }


def init_transformer(key, src_vocab, tgt_vocab, d_model, d_ff,
                     n_enc_layers, n_dec_layers, max_len):
    kg = _KeyGen(key)
    pe = positional_encoding(max_len, d_model)
    enc = {
        "embedding": 0.02 * jax.random.normal(kg(), (src_vocab, d_model), jnp.float32),
        "pos_enc": pe,
        "layers": [{"self_attn": _mha_params(kg, d_model),
                    "fcn": _fcn_params(kg, d_model, d_ff)}
                   for _ in range(n_enc_layers)],
        "ln_g": jnp.ones((d_model,), jnp.float32),
        "ln_b": jnp.zeros((d_model,), jnp.float32),
    }
    dec = {
        "embedding": 0.02 * jax.random.normal(kg(), (tgt_vocab, d_model), jnp.float32),
        "pos_enc": pe,
        "layers": [{"self_attn": _mha_params(kg, d_model),
                    "cross_attn": _mha_params(kg, d_model),
                    "fcn": _fcn_params(kg, d_model, d_ff)}
                   for _ in range(n_dec_layers)],
        "ln_g": jnp.ones((d_model,), jnp.float32),
        "ln_b": jnp.zeros((d_model,), jnp.float32),
        "cls_w": 0.02 * jax.random.normal(kg(), (d_model, tgt_vocab), jnp.float32),
        "cls_b": jnp.zeros((tgt_vocab,), jnp.float32),
    }
    return {"encoder": enc, "decoder": dec}


def preprocess_params(params):
    """Host-side, one-time: cast large weights to bf16, reshape biases/LN to
    lane-dense (1, N), and pre-slice Q / KV weights for cross-attention."""
    probe_single_buffering()

    def prep_attn(p, cross):
        D = p["wo"].shape[0]
        out = {
            "ln_g": p["ln_g"].reshape(1, D),
            "ln_b": p["ln_b"].reshape(1, D),
            "wo": p["wo"].astype(jnp.bfloat16),
            "bo": p["bo"].reshape(1, D),
        }
        if cross:
            out["wq"] = p["wqkv"][:, :D].astype(jnp.bfloat16)
            out["bq"] = p["bqkv"][:D].reshape(1, D)
            out["wkv"] = p["wqkv"][:, D:].astype(jnp.bfloat16)
            out["bkv"] = p["bqkv"][D:].reshape(1, 2 * D)
        else:
            out["wqkv"] = p["wqkv"].astype(jnp.bfloat16)
            out["bqkv"] = p["bqkv"].reshape(1, 3 * D)
        return out

    def prep_fcn(p):
        D, Dff = p["w1"].shape
        return {
            "ln_g": p["ln_g"].reshape(1, D),
            "ln_b": p["ln_b"].reshape(1, D),
            "w1": p["w1"].astype(jnp.bfloat16),
            "b1": p["b1"].reshape(1, Dff),
            "w2": p["w2"].astype(jnp.bfloat16),
            "b2": p["b2"].reshape(1, D),
        }

    enc_in, dec_in = params["encoder"], params["decoder"]
    D = enc_in["embedding"].shape[1]
    V = dec_in["cls_w"].shape[1]
    enc = {
        "embedding": enc_in["embedding"],
        "pos_enc": enc_in["pos_enc"],
        "layers": [{"self_attn": prep_attn(lp["self_attn"], cross=False),
                    "fcn": prep_fcn(lp["fcn"])}
                   for lp in enc_in["layers"]],
        "ln_g": enc_in["ln_g"].reshape(1, D),
        "ln_b": enc_in["ln_b"].reshape(1, D),
    }
    dec = {
        "embedding": dec_in["embedding"],
        "pos_enc": dec_in["pos_enc"],
        "layers": [{"self_attn": prep_attn(lp["self_attn"], cross=False),
                    "cross_attn": prep_attn(lp["cross_attn"], cross=True),
                    "fcn": prep_fcn(lp["fcn"])}
                   for lp in dec_in["layers"]],
        "ln_g": dec_in["ln_g"].reshape(1, D),
        "ln_b": dec_in["ln_b"].reshape(1, D),
        "cls_w": dec_in["cls_w"].astype(jnp.bfloat16),
        "cls_b": dec_in["cls_b"].reshape(1, V),
    }
    return {"encoder": enc, "decoder": dec}


# ----------------------------------------------------------------------------
# Main
# ----------------------------------------------------------------------------
if __name__ == "__main__":
    # Small config: batch=2, enc_seq=8, dec_seq=8, d_model=32, heads=4, d_ff=64
    B, T_ENC, T_DEC = 2, 8, 8
    D_MODEL, N_HEADS, D_FF = 32, 4, 64
    SRC_VOCAB, TGT_VOCAB = 40, 48
    N_ENC_LAYERS, N_DEC_LAYERS = 2, 2
    MAX_LEN = 16

    root = jax.random.PRNGKey(0)
    k_params, k_enc, k_dec = jax.random.split(root, 3)

    raw_params = init_transformer(k_params, SRC_VOCAB, TGT_VOCAB, D_MODEL, D_FF,
                                  N_ENC_LAYERS, N_DEC_LAYERS, MAX_LEN)
    params = preprocess_params(raw_params)     # bf16 weight pre-cast (host, once)

    encoder_sequences = jax.random.randint(k_enc, (B, T_ENC), 0, SRC_VOCAB, jnp.int32)
    decoder_sequences = jax.random.randint(k_dec, (B, T_DEC), 0, TGT_VOCAB, jnp.int32)
    encoder_sequence_lengths = jnp.array([T_ENC, 5], jnp.int32)
    decoder_sequence_lengths = jnp.array([T_DEC, 6], jnp.int32)

    dec_logits, enc_gv, dec_gv = transformer_forward(
        params, encoder_sequences, decoder_sequences,
        encoder_sequence_lengths, decoder_sequence_lengths, n_heads=N_HEADS)

    jax.block_until_ready(dec_logits)
    assert dec_logits.shape == (B, T_DEC, TGT_VOCAB)
    assert jnp.all(jnp.isfinite(dec_logits))
    # TODO(synk): admin_torch residual modules and MoE gating-variance paths are
    # config-disabled in the reference default (use_admin=False, non-MoE FFN).
    # TODO(synk): residual stream / encoder memory could be carried in bf16
    # (halves activation HBM traffic) pending an accuracy-tolerance check.
    print("KERNEL_OK")
</pallas_src>

<mosaic_0001>
module attributes {stable_mosaic.version = 11 : i64} {
  func.func @k(%arg0: i32, %arg1: memref<8x128xf32, #tpu.memory_space<vmem>>, %arg2: memref<8x128xf32, #tpu.memory_space<vmem>>, %arg3: memref<8x128xf32, #tpu.memory_space<vmem>>) attributes {dimension_semantics = [#tpu.dimension_semantics<arbitrary>], iteration_bounds = array<i64: 2>, scalar_prefetch = 0 : i64, scratch_operands = 0 : i64, tpu.core_type = #tpu.core_type<tc>, window_params = [{pipeline_mode = #tpu.pipeline_mode<synchronous>, transform_indices = @transform_0, window_bounds = array<i64: 8, 128>}, {transform_indices = @transform_1, window_bounds = array<i64: 8, 128>}, {transform_indices = @transform_2, window_bounds = array<i64: 8, 128>}]} {
    %c0 = arith.constant 0 : index
    %c0_0 = arith.constant 0 : index
    %0 = vector.load %arg2[%c0, %c0_0] : memref<8x128xf32, #tpu.memory_space<vmem>>, vector<8x128xf32>
    %c0_1 = arith.constant 0 : index
    %c0_2 = arith.constant 0 : index
    %1 = vector.load %arg1[%c0_1, %c0_2] : memref<8x128xf32, #tpu.memory_space<vmem>>, vector<8x128xf32>
    %2 = arith.addf %0, %1 : vector<8x128xf32>
    %c0_3 = arith.constant 0 : index
    %c0_4 = arith.constant 0 : index
    %3 = vector.load %arg3[%c0_3, %c0_4] : memref<8x128xf32, #tpu.memory_space<vmem>>, vector<8x128xf32>
    tpu.vector_store %arg3[%c0_3, %c0_4], %2 {strides = array<i32>} : memref<8x128xf32, #tpu.memory_space<vmem>>, vector<8x128xf32>,
    return
  }
  func.func @transform_0(%arg0: i32) -> (i32, i32) {
    %c0_i32 = arith.constant 0 : i32
    %c0_i32_0 = arith.constant 0 : i32
    %c0_i32_1 = arith.constant 0 : i32
    return %c0_i32, %c0_i32_0 : i32, i32
  }
  func.func @transform_1(%arg0: i32) -> (i32, i32) {
    %c0_i32 = arith.constant 0 : i32
    %c0_i32_0 = arith.constant 0 : i32
    return %arg0, %c0_i32 : i32, i32
  }
  func.func @transform_2(%arg0: i32) -> (i32, i32) {
    %c0_i32 = arith.constant 0 : i32
    %c0_i32_0 = arith.constant 0 : i32
    return %arg0, %c0_i32 : i32, i32
  }
}

module attributes {stable_mosaic.version = 11 : i64} {
  func.func @_self_attn_kernel(%arg0: i32, %arg1: memref<2xi32, #tpu.memory_space<smem>>, %arg2: memref<1x8x32xf32, #tpu.memory_space<vmem>>, %arg3: memref<1x32xf32, #tpu.memory_space<vmem>>, %arg4: memref<1x32xf32, #tpu.memory_space<vmem>>, %arg5: memref<32x96xbf16, #tpu.memory_space<vmem>>, %arg6: memref<1x96xf32, #tpu.memory_space<vmem>>, %arg7: memref<32x32xbf16, #tpu.memory_space<vmem>>, %arg8: memref<1x32xf32, #tpu.memory_space<vmem>>, %arg9: memref<1x8x32xf32, #tpu.memory_space<vmem>>) attributes {dimension_semantics = [#tpu.dimension_semantics<parallel>], iteration_bounds = array<i64: 2>, scalar_prefetch = 1 : i64, scratch_operands = 0 : i64, tpu.core_type = #tpu.core_type<tc>, window_params = [{transform_indices = @transform_0, window_bounds = array<i64: 1, 8, 32>}, {pipeline_mode = #tpu.pipeline_mode<synchronous>, transform_indices = @transform_1, window_bounds = array<i64: 1, 32>}, {pipeline_mode = #tpu.pipeline_mode<synchronous>, transform_indices = @transform_2, window_bounds = array<i64: 1, 32>}, {pipeline_mode = #tpu.pipeline_mode<synchronous>, transform_indices = @transform_3, window_bounds = array<i64: 32, 96>}, {pipeline_mode = #tpu.pipeline_mode<synchronous>, transform_indices = @transform_4, window_bounds = array<i64: 1, 96>}, {pipeline_mode = #tpu.pipeline_mode<synchronous>, transform_indices = @transform_5, window_bounds = array<i64: 32, 32>}, {pipeline_mode = #tpu.pipeline_mode<synchronous>, transform_indices = @transform_6, window_bounds = array<i64: 1, 32>}, {transform_indices = @transform_7, window_bounds = array<i64: 1, 8, 32>}]} {
    %c0 = arith.constant 0 : index
    %c0_0 = arith.constant 0 : index
    %c0_1 = arith.constant 0 : index
    %0 = vector.load %arg2[%c0, %c0_0, %c0_1] : memref<1x8x32xf32, #tpu.memory_space<vmem>>, vector<1x8x32xf32>
    %1 = vector.shape_cast %0 : vector<1x8x32xf32> to vector<8x32xf32>
    %c0_2 = arith.constant 0 : index
    %c0_3 = arith.constant 0 : index
    %2 = vector.load %arg3[%c0_2, %c0_3] : memref<1x32xf32, #tpu.memory_space<vmem>>, vector<1x32xf32>
    %c0_4 = arith.constant 0 : index
    %c0_5 = arith.constant 0 : index
    %3 = vector.load %arg4[%c0_4, %c0_5] : memref<1x32xf32, #tpu.memory_space<vmem>>, vector<1x32xf32>
    %cst = arith.constant dense<0.000000e+00> : vector<8xf32>
    %4 = vector.multi_reduction <add>, %1, %cst [1] : vector<8x32xf32> to vector<8xf32>
    %5 = vector.shape_cast %4 : vector<8xf32> to vector<8x1xf32>
    %cst_6 = arith.constant 3.200000e+01 : f32
    %6 = vector.broadcast %cst_6 : f32 to vector<8x1xf32>
    %7 = arith.divf %5, %6 : vector<8x1xf32>
    %8 = vector.broadcast %7 : vector<8x1xf32> to vector<8x32xf32>
    %9 = arith.subf %1, %8 : vector<8x32xf32>
    %10 = vector.broadcast %7 : vector<8x1xf32> to vector<8x32xf32>
    %11 = arith.subf %1, %10 : vector<8x32xf32>
    %12 = arith.mulf %9, %11 : vector<8x32xf32>
    %cst_7 = arith.constant dense<0.000000e+00> : vector<8xf32>
    %13 = vector.multi_reduction <add>, %12, %cst_7 [1] : vector<8x32xf32> to vector<8xf32>
    %14 = vector.shape_cast %13 : vector<8xf32> to vector<8x1xf32>
    %cst_8 = arith.constant 3.200000e+01 : f32
    %15 = vector.broadcast %cst_8 : f32 to vector<8x1xf32>
    %16 = arith.divf %14, %15 : vector<8x1xf32>
    %17 = vector.broadcast %7 : vector<8x1xf32> to vector<8x32xf32>
    %18 = arith.subf %1, %17 : vector<8x32xf32>
    %cst_9 = arith.constant 9.99999974E-6 : f32
    %19 = vector.broadcast %cst_9 : f32 to vector<8x1xf32>
    %20 = arith.addf %16, %19 : vector<8x1xf32>
    %21 = math.rsqrt %20 : vector<8x1xf32>
    %22 = vector.broadcast %21 : vector<8x1xf32> to vector<8x32xf32>
    %23 = arith.mulf %18, %22 : vector<8x32xf32>
    %24 = vector.broadcast %2 : vector<1x32xf32> to vector<8x32xf32>
    %25 = arith.mulf %23, %24 : vector<8x32xf32>
    %26 = vector.broadcast %3 : vector<1x32xf32> to vector<8x32xf32>
    %27 = arith.addf %25, %26 : vector<8x32xf32>
    %28 = arith.truncf %27 : vector<8x32xf32> to vector<8x32xbf16>
    %c0_10 = arith.constant 0 : index
    %c0_11 = arith.constant 0 : index
    %29 = vector.load %arg5[%c0_10, %c0_11] : memref<32x96xbf16, #tpu.memory_space<vmem>>, vector<32x96xbf16>
    %cst_12 = arith.constant dense<0.000000e+00> : vector<8x96xf32>
    %30 = tpu.matmul %28, %29, %cst_12 {dimension_numbers = #tpu.dot_dimension_numbers<[1], [0], [0], [1], [0, 0, 1, 1], [], []>} : vector<8x32xbf16>, vector<32x96xbf16>, vector<8x96xf32> -> vector<8x96xf32>
    %c0_13 = arith.constant 0 : index
    %c0_14 = arith.constant 0 : index
    %31 = vector.load %arg6[%c0_13, %c0_14] : memref<1x96xf32, #tpu.memory_space<vmem>>, vector<1x96xf32>
    %32 = vector.broadcast %31 : vector<1x96xf32> to vector<8x96xf32>
    %33 = arith.addf %30, %32 : vector<8x96xf32>
    %34 = vector.extract_strided_slice %33 {offsets = [0, 0], sizes = [8, 32], strides = [1, 1]} : vector<8x96xf32> to vector<8x32xf32>
    %35 = vector.extract_strided_slice %33 {offsets = [0, 32], sizes = [8, 32], strides = [1, 1]} : vector<8x96xf32> to vector<8x32xf32>
    %36 = vector.extract_strided_slice %33 {offsets = [0, 64], sizes = [8, 32], strides = [1, 1]} : vector<8x96xf32> to vector<8x32xf32>
    %37 = arith.index_cast %arg0 : i32 to index
    %38 = memref.load %arg1[%37] : memref<2xi32, #tpu.memory_space<smem>>
    %39 = tpu.iota {dimensions = array<i32: 1>} : vector<8x8xi32>
    %40 = vector.broadcast %38 : i32 to vector<8x8xi32>
    %41 = arith.cmpi sge, %39, %40 : vector<8x8xi32>
    %42 = tpu.iota {dimensions = array<i32: 0>} : vector<8x8xi32>
    %43 = arith.cmpi sgt, %39, %42 : vector<8x8xi32>
    %44 = arith.ori %41, %43 : vector<8x8xi1>
    %45 = vector.shape_cast %34 : vector<8x32xf32> to vector<8x4x8xf32>
    %46 = tpu.transpose %45, [1, 0, 2] : vector<8x4x8xf32> -> vector<4x8x8xf32>
    %47 = arith.truncf %46 : vector<4x8x8xf32> to vector<4x8x8xbf16>
    %48 = vector.shape_cast %35 : vector<8x32xf32> to vector<8x4x8xf32>
    %49 = tpu.transpose %48, [1, 0, 2] : vector<8x4x8xf32> -> vector<4x8x8xf32>
    %50 = arith.truncf %49 : vector<4x8x8xf32> to vector<4x8x8xbf16>
    %51 = vector.shape_cast %36 : vector<8x32xf32> to vector<8x4x8xf32>
    %52 = tpu.transpose %51, [1, 0, 2] : vector<8x4x8xf32> -> vector<4x8x8xf32>
    %53 = arith.truncf %52 : vector<4x8x8xf32> to vector<4x8x8xbf16>
    "tpu.trace_start"() <{level = 10 : i32, message = "hqd,hkd->hqk"}> : () -> ()
    %cst_15 = arith.constant dense<0.000000e+00> : vector<4x8x8xf32>
    %54 = tpu.matmul %47, %50, %cst_15 {dimension_numbers = #tpu.dot_dimension_numbers<[2], [2], [1], [1], [0, 0, 0, 1, 1, 1], [0], [0]>} : vector<4x8x8xbf16>, vector<4x8x8xbf16>, vector<4x8x8xf32> -> vector<4x8x8xf32>
    "tpu.trace_stop"() : () -> ()
    %cst_16 = arith.constant 0.353553385 : f32
    %55 = vector.broadcast %cst_16 : f32 to vector<4x8x8xf32>
    %56 = arith.mulf %54, %55 : vector<4x8x8xf32>
    %57 = vector.shape_cast %44 : vector<8x8xi1> to vector<1x8x8xi1>
    %cst_17 = arith.constant -1.000000e+09 : f32
    %58 = vector.shape_cast %57 : vector<1x8x8xi1> to vector<1x8x8xi1>
    %59 = vector.broadcast %58 : vector<1x8x8xi1> to vector<4x8x8xi1>
    %60 = vector.broadcast %cst_17 : f32 to vector<4x8x8xf32>
    %61 = arith.select %59, %60, %56 : vector<4x8x8xi1>, vector<4x8x8xf32>
    %cst_18 = arith.constant dense<0xFF800000> : vector<4x8xf32>
    %62 = vector.multi_reduction <maximumf>, %61, %cst_18 [2] : vector<4x8x8xf32> to vector<4x8xf32>
    %63 = vector.shape_cast %62 : vector<4x8xf32> to vector<4x8x1xf32>
    %64 = vector.broadcast %63 : vector<4x8x1xf32> to vector<4x8x8xf32>
    %65 = arith.subf %61, %64 : vector<4x8x8xf32>
    %66 = math.exp %65 : vector<4x8x8xf32>
    %cst_19 = arith.constant dense<0.000000e+00> : vector<4x8xf32>
    %67 = vector.multi_reduction <add>, %66, %cst_19 [2] : vector<4x8x8xf32> to vector<4x8xf32>
    %68 = vector.shape_cast %67 : vector<4x8xf32> to vector<4x8x1xf32>
    %69 = vector.broadcast %68 : vector<4x8x1xf32> to vector<4x8x8xf32>
    %70 = arith.divf %66, %69 : vector<4x8x8xf32>
    %71 = arith.truncf %70 : vector<4x8x8xf32> to vector<4x8x8xbf16>
    "tpu.trace_start"() <{level = 10 : i32, message = "hqk,hkd->hqd"}> : () -> ()
    %cst_20 = arith.constant dense<0.000000e+00> : vector<4x8x8xf32>
    %72 = tpu.matmul %71, %53, %cst_20 {dimension_numbers = #tpu.dot_dimension_numbers<[2], [1], [1], [2], [0, 0, 0, 1, 1, 2], [0], [0]>} : vector<4x8x8xbf16>, vector<4x8x8xbf16>, vector<4x8x8xf32> -> vector<4x8x8xf32>
    "tpu.trace_stop"() : () -> ()
    %73 = tpu.transpose %72, [1, 0, 2] : vector<4x8x8xf32> -> vector<8x4x8xf32>
    %74 = vector.shape_cast %73 : vector<8x4x8xf32> to vector<8x32xf32>
    %75 = arith.truncf %74 : vector<8x32xf32> to vector<8x32xbf16>
    %c0_21 = arith.constant 0 : index
    %c0_22 = arith.constant 0 : index
    %76 = vector.load %arg7[%c0_21, %c0_22] : memref<32x32xbf16, #tpu.memory_space<vmem>>, vector<32x32xbf16>
    %cst_23 = arith.constant dense<0.000000e+00> : vector<8x32xf32>
    %77 = tpu.matmul %75, %76, %cst_23 {dimension_numbers = #tpu.dot_dimension_numbers<[1], [0], [0], [1], [0, 0, 1, 1], [], []>} : vector<8x32xbf16>, vector<32x32xbf16>, vector<8x32xf32> -> vector<8x32xf32>
    %78 = arith.addf %1, %77 : vector<8x32xf32>
    %c0_24 = arith.constant 0 : index
    %c0_25 = arith.constant 0 : index
    %79 = vector.load %arg8[%c0_24, %c0_25] : memref<1x32xf32, #tpu.memory_space<vmem>>, vector<1x32xf32>
    %80 = vector.broadcast %79 : vector<1x32xf32> to vector<8x32xf32>
    %81 = arith.addf %78, %80 : vector<8x32xf32>
    %c0_26 = arith.constant 0 : index
    %c0_27 = arith.constant 0 : index
    %c0_28 = arith.constant 0 : index
    %82 = vector.load %arg9[%c0_26, %c0_27, %c0_28] : memref<1x8x32xf32, #tpu.memory_space<vmem>>, vector<1x8x32xf32>
    %83 = vector.shape_cast %82 : vector<1x8x32xf32> to vector<8x32xf32>
    %84 = vector.shape_cast %81 : vector<8x32xf32> to vector<1x8x32xf32>
    tpu.vector_store %arg9[%c0_26, %c0_27, %c0_28], %84 {strides = array<i32>} : memref<1x8x32xf32, #tpu.memory_space<vmem>>, vector<1x8x32xf32>,
    return
  }
  func.func @transform_0(%arg0: i32, %arg1: memref<2xi32, #tpu.memory_space<smem>>) -> (i32, i32, i32) {
    %c0_i32 = arith.constant 0 : i32
    %c0_i32_0 = arith.constant 0 : i32
    %c0_i32_1 = arith.constant 0 : i32
    return %arg0, %c0_i32, %c0_i32_0 : i32, i32, i32
  }
  func.func @transform_1(%arg0: i32, %arg1: memref<2xi32, #tpu.memory_space<smem>>) -> (i32, i32) {
    %c0_i32 = arith.constant 0 : i32
    %c0_i32_0 = arith.constant 0 : i32
    %c0_i32_1 = arith.constant 0 : i32
    return %c0_i32, %c0_i32_0 : i32, i32
  }
  func.func @transform_2(%arg0: i32, %arg1: memref<2xi32, #tpu.memory_space<smem>>) -> (i32, i32) {
    %c0_i32 = arith.constant 0 : i32
    %c0_i32_0 = arith.constant 0 : i32
    %c0_i32_1 = arith.constant 0 : i32
    return %c0_i32, %c0_i32_0 : i32, i32
  }
  func.func @transform_3(%arg0: i32, %arg1: memref<2xi32, #tpu.memory_space<smem>>) -> (i32, i32) {
    %c0_i32 = arith.constant 0 : i32
    %c0_i32_0 = arith.constant 0 : i32
    %c0_i32_1 = arith.constant 0 : i32
    return %c0_i32, %c0_i32_0 : i32, i32
  }
  func.func @transform_4(%arg0: i32, %arg1: memref<2xi32, #tpu.memory_space<smem>>) -> (i32, i32) {
    %c0_i32 = arith.constant 0 : i32
    %c0_i32_0 = arith.constant 0 : i32
    %c0_i32_1 = arith.constant 0 : i32
    return %c0_i32, %c0_i32_0 : i32, i32
  }
  func.func @transform_5(%arg0: i32, %arg1: memref<2xi32, #tpu.memory_space<smem>>) -> (i32, i32) {
    %c0_i32 = arith.constant 0 : i32
    %c0_i32_0 = arith.constant 0 : i32
    %c0_i32_1 = arith.constant 0 : i32
    return %c0_i32, %c0_i32_0 : i32, i32
  }
  func.func @transform_6(%arg0: i32, %arg1: memref<2xi32, #tpu.memory_space<smem>>) -> (i32, i32) {
    %c0_i32 = arith.constant 0 : i32
    %c0_i32_0 = arith.constant 0 : i32
    %c0_i32_1 = arith.constant 0 : i32
    return %c0_i32, %c0_i32_0 : i32, i32
  }
  func.func @transform_7(%arg0: i32, %arg1: memref<2xi32, #tpu.memory_space<smem>>) -> (i32, i32, i32) {
    %c0_i32 = arith.constant 0 : i32
    %c0_i32_0 = arith.constant 0 : i32
    %c0_i32_1 = arith.constant 0 : i32
    return %arg0, %c0_i32, %c0_i32_0 : i32, i32, i32
  }
}

module attributes {stable_mosaic.version = 11 : i64} {
  func.func @_self_attn_kernel(%arg0: i32, %arg1: memref<2xi32, #tpu.memory_space<smem>>, %arg2: memref<1x8x32xf32, #tpu.memory_space<vmem>>, %arg3: memref<1x32xf32, #tpu.memory_space<vmem>>, %arg4: memref<1x32xf32, #tpu.memory_space<vmem>>, %arg5: memref<32x96xbf16, #tpu.memory_space<vmem>>, %arg6: memref<1x96xf32, #tpu.memory_space<vmem>>, %arg7: memref<32x32xbf16, #tpu.memory_space<vmem>>, %arg8: memref<1x32xf32, #tpu.memory_space<vmem>>, %arg9: memref<1x8x32xf32, #tpu.memory_space<vmem>>) attributes {dimension_semantics = [#tpu.dimension_semantics<parallel>], iteration_bounds = array<i64: 2>, scalar_prefetch = 1 : i64, scratch_operands = 0 : i64, tpu.core_type = #tpu.core_type<tc>, window_params = [{transform_indices = @transform_0, window_bounds = array<i64: 1, 8, 32>}, {pipeline_mode = #tpu.pipeline_mode<synchronous>, transform_indices = @transform_1, window_bounds = array<i64: 1, 32>}, {pipeline_mode = #tpu.pipeline_mode<synchronous>, transform_indices = @transform_2, window_bounds = array<i64: 1, 32>}, {pipeline_mode = #tpu.pipeline_mode<synchronous>, transform_indices = @transform_3, window_bounds = array<i64: 32, 96>}, {pipeline_mode = #tpu.pipeline_mode<synchronous>, transform_indices = @transform_4, window_bounds = array<i64: 1, 96>}, {pipeline_mode = #tpu.pipeline_mode<synchronous>, transform_indices = @transform_5, window_bounds = array<i64: 32, 32>}, {pipeline_mode = #tpu.pipeline_mode<synchronous>, transform_indices = @transform_6, window_bounds = array<i64: 1, 32>}, {transform_indices = @transform_7, window_bounds = array<i64: 1, 8, 32>}]} {
    %c0 = arith.constant 0 : index
    %c0_0 = arith.constant 0 : index
    %c0_1 = arith.constant 0 : index
    %0 = vector.load %arg2[%c0, %c0_0, %c0_1] : memref<1x8x32xf32, #tpu.memory_space<vmem>>, vector<1x8x32xf32>
    %1 = vector.shape_cast %0 : vector<1x8x32xf32> to vector<8x32xf32>
    %c0_2 = arith.constant 0 : index
    %c0_3 = arith.constant 0 : index
    %2 = vector.load %arg3[%c0_2, %c0_3] : memref<1x32xf32, #tpu.memory_space<vmem>>, vector<1x32xf32>
    %c0_4 = arith.constant 0 : index
    %c0_5 = arith.constant 0 : index
    %3 = vector.load %arg4[%c0_4, %c0_5] : memref<1x32xf32, #tpu.memory_space<vmem>>, vector<1x32xf32>
    %cst = arith.constant dense<0.000000e+00> : vector<8xf32>
    %4 = vector.multi_reduction <add>, %1, %cst [1] : vector<8x32xf32> to vector<8xf32>
    %5 = vector.shape_cast %4 : vector<8xf32> to vector<8x1xf32>
    %cst_6 = arith.constant 3.200000e+01 : f32
    %6 = vector.broadcast %cst_6 : f32 to vector<8x1xf32>
    %7 = arith.divf %5, %6 : vector<8x1xf32>
    %8 = vector.broadcast %7 : vector<8x1xf32> to vector<8x32xf32>
    %9 = arith.subf %1, %8 : vector<8x32xf32>
    %10 = vector.broadcast %7 : vector<8x1xf32> to vector<8x32xf32>
    %11 = arith.subf %1, %10 : vector<8x32xf32>
    %12 = arith.mulf %9, %11 : vector<8x32xf32>
    %cst_7 = arith.constant dense<0.000000e+00> : vector<8xf32>
    %13 = vector.multi_reduction <add>, %12, %cst_7 [1] : vector<8x32xf32> to vector<8xf32>
    %14 = vector.shape_cast %13 : vector<8xf32> to vector<8x1xf32>
    %cst_8 = arith.constant 3.200000e+01 : f32
    %15 = vector.broadcast %cst_8 : f32 to vector<8x1xf32>
    %16 = arith.divf %14, %15 : vector<8x1xf32>
    %17 = vector.broadcast %7 : vector<8x1xf32> to vector<8x32xf32>
    %18 = arith.subf %1, %17 : vector<8x32xf32>
    %cst_9 = arith.constant 9.99999974E-6 : f32
    %19 = vector.broadcast %cst_9 : f32 to vector<8x1xf32>
    %20 = arith.addf %16, %19 : vector<8x1xf32>
    %21 = math.rsqrt %20 : vector<8x1xf32>
    %22 = vector.broadcast %21 : vector<8x1xf32> to vector<8x32xf32>
    %23 = arith.mulf %18, %22 : vector<8x32xf32>
    %24 = vector.broadcast %2 : vector<1x32xf32> to vector<8x32xf32>
    %25 = arith.mulf %23, %24 : vector<8x32xf32>
    %26 = vector.broadcast %3 : vector<1x32xf32> to vector<8x32xf32>
    %27 = arith.addf %25, %26 : vector<8x32xf32>
    %28 = arith.truncf %27 : vector<8x32xf32> to vector<8x32xbf16>
    %c0_10 = arith.constant 0 : index
    %c0_11 = arith.constant 0 : index
    %29 = vector.load %arg5[%c0_10, %c0_11] : memref<32x96xbf16, #tpu.memory_space<vmem>>, vector<32x96xbf16>
    %cst_12 = arith.constant dense<0.000000e+00> : vector<8x96xf32>
    %30 = tpu.matmul %28, %29, %cst_12 {dimension_numbers = #tpu.dot_dimension_numbers<[1], [0], [0], [1], [0, 0, 1, 1], [], []>} : vector<8x32xbf16>, vector<32x96xbf16>, vector<8x96xf32> -> vector<8x96xf32>
    %c0_13 = arith.constant 0 : index
    %c0_14 = arith.constant 0 : index
    %31 = vector.load %arg6[%c0_13, %c0_14] : memref<1x96xf32, #tpu.memory_space<vmem>>, vector<1x96xf32>
    %32 = vector.broadcast %31 : vector<1x96xf32> to vector<8x96xf32>
    %33 = arith.addf %30, %32 : vector<8x96xf32>
    %34 = vector.extract_strided_slice %33 {offsets = [0, 0], sizes = [8, 32], strides = [1, 1]} : vector<8x96xf32> to vector<8x32xf32>
    %35 = vector.extract_strided_slice %33 {offsets = [0, 32], sizes = [8, 32], strides = [1, 1]} : vector<8x96xf32> to vector<8x32xf32>
    %36 = vector.extract_strided_slice %33 {offsets = [0, 64], sizes = [8, 32], strides = [1, 1]} : vector<8x96xf32> to vector<8x32xf32>
    %37 = arith.index_cast %arg0 : i32 to index
    %38 = memref.load %arg1[%37] : memref<2xi32, #tpu.memory_space<smem>>
    %39 = tpu.iota {dimensions = array<i32: 1>} : vector<8x8xi32>
    %40 = vector.broadcast %38 : i32 to vector<8x8xi32>
    %41 = arith.cmpi sge, %39, %40 : vector<8x8xi32>
    %42 = vector.shape_cast %34 : vector<8x32xf32> to vector<8x4x8xf32>
    %43 = tpu.transpose %42, [1, 0, 2] : vector<8x4x8xf32> -> vector<4x8x8xf32>
    %44 = arith.truncf %43 : vector<4x8x8xf32> to vector<4x8x8xbf16>
    %45 = vector.shape_cast %35 : vector<8x32xf32> to vector<8x4x8xf32>
    %46 = tpu.transpose %45, [1, 0, 2] : vector<8x4x8xf32> -> vector<4x8x8xf32>
    %47 = arith.truncf %46 : vector<4x8x8xf32> to vector<4x8x8xbf16>
    %48 = vector.shape_cast %36 : vector<8x32xf32> to vector<8x4x8xf32>
    %49 = tpu.transpose %48, [1, 0, 2] : vector<8x4x8xf32> -> vector<4x8x8xf32>
    %50 = arith.truncf %49 : vector<4x8x8xf32> to vector<4x8x8xbf16>
    "tpu.trace_start"() <{level = 10 : i32, message = "hqd,hkd->hqk"}> : () -> ()
    %cst_15 = arith.constant dense<0.000000e+00> : vector<4x8x8xf32>
    %51 = tpu.matmul %44, %47, %cst_15 {dimension_numbers = #tpu.dot_dimension_numbers<[2], [2], [1], [1], [0, 0, 0, 1, 1, 1], [0], [0]>} : vector<4x8x8xbf16>, vector<4x8x8xbf16>, vector<4x8x8xf32> -> vector<4x8x8xf32>
    "tpu.trace_stop"() : () -> ()
    %cst_16 = arith.constant 0.353553385 : f32
    %52 = vector.broadcast %cst_16 : f32 to vector<4x8x8xf32>
    %53 = arith.mulf %51, %52 : vector<4x8x8xf32>
    %54 = vector.shape_cast %41 : vector<8x8xi1> to vector<1x8x8xi1>
    %cst_17 = arith.constant -1.000000e+09 : f32
    %55 = vector.shape_cast %54 : vector<1x8x8xi1> to vector<1x8x8xi1>
    %56 = vector.broadcast %55 : vector<1x8x8xi1> to vector<4x8x8xi1>
    %57 = vector.broadcast %cst_17 : f32 to vector<4x8x8xf32>
    %58 = arith.select %56, %57, %53 : vector<4x8x8xi1>, vector<4x8x8xf32>
    %cst_18 = arith.constant dense<0xFF800000> : vector<4x8xf32>
    %59 = vector.multi_reduction <maximumf>, %58, %cst_18 [2] : vector<4x8x8xf32> to vector<4x8xf32>
    %60 = vector.shape_cast %59 : vector<4x8xf32> to vector<4x8x1xf32>
    %61 = vector.broadcast %60 : vector<4x8x1xf32> to vector<4x8x8xf32>
    %62 = arith.subf %58, %61 : vector<4x8x8xf32>
    %63 = math.exp %62 : vector<4x8x8xf32>
    %cst_19 = arith.constant dense<0.000000e+00> : vector<4x8xf32>
    %64 = vector.multi_reduction <add>, %63, %cst_19 [2] : vector<4x8x8xf32> to vector<4x8xf32>
    %65 = vector.shape_cast %64 : vector<4x8xf32> to vector<4x8x1xf32>
    %66 = vector.broadcast %65 : vector<4x8x1xf32> to vector<4x8x8xf32>
    %67 = arith.divf %63, %66 : vector<4x8x8xf32>
    %68 = arith.truncf %67 : vector<4x8x8xf32> to vector<4x8x8xbf16>
    "tpu.trace_start"() <{level = 10 : i32, message = "hqk,hkd->hqd"}> : () -> ()
    %cst_20 = arith.constant dense<0.000000e+00> : vector<4x8x8xf32>
    %69 = tpu.matmul %68, %50, %cst_20 {dimension_numbers = #tpu.dot_dimension_numbers<[2], [1], [1], [2], [0, 0, 0, 1, 1, 2], [0], [0]>} : vector<4x8x8xbf16>, vector<4x8x8xbf16>, vector<4x8x8xf32> -> vector<4x8x8xf32>
    "tpu.trace_stop"() : () -> ()
    %70 = tpu.transpose %69, [1, 0, 2] : vector<4x8x8xf32> -> vector<8x4x8xf32>
    %71 = vector.shape_cast %70 : vector<8x4x8xf32> to vector<8x32xf32>
    %72 = arith.truncf %71 : vector<8x32xf32> to vector<8x32xbf16>
    %c0_21 = arith.constant 0 : index
    %c0_22 = arith.constant 0 : index
    %73 = vector.load %arg7[%c0_21, %c0_22] : memref<32x32xbf16, #tpu.memory_space<vmem>>, vector<32x32xbf16>
    %cst_23 = arith.constant dense<0.000000e+00> : vector<8x32xf32>
    %74 = tpu.matmul %72, %73, %cst_23 {dimension_numbers = #tpu.dot_dimension_numbers<[1], [0], [0], [1], [0, 0, 1, 1], [], []>} : vector<8x32xbf16>, vector<32x32xbf16>, vector<8x32xf32> -> vector<8x32xf32>
    %75 = arith.addf %1, %74 : vector<8x32xf32>
    %c0_24 = arith.constant 0 : index
    %c0_25 = arith.constant 0 : index
    %76 = vector.load %arg8[%c0_24, %c0_25] : memref<1x32xf32, #tpu.memory_space<vmem>>, vector<1x32xf32>
    %77 = vector.broadcast %76 : vector<1x32xf32> to vector<8x32xf32>
    %78 = arith.addf %75, %77 : vector<8x32xf32>
    %c0_26 = arith.constant 0 : index
    %c0_27 = arith.constant 0 : index
    %c0_28 = arith.constant 0 : index
    %79 = vector.load %arg9[%c0_26, %c0_27, %c0_28] : memref<1x8x32xf32, #tpu.memory_space<vmem>>, vector<1x8x32xf32>
    %80 = vector.shape_cast %79 : vector<1x8x32xf32> to vector<8x32xf32>
    %81 = vector.shape_cast %78 : vector<8x32xf32> to vector<1x8x32xf32>
    tpu.vector_store %arg9[%c0_26, %c0_27, %c0_28], %81 {strides = array<i32>} : memref<1x8x32xf32, #tpu.memory_space<vmem>>, vector<1x8x32xf32>,
    return
  }
  func.func @transform_0(%arg0: i32, %arg1: memref<2xi32, #tpu.memory_space<smem>>) -> (i32, i32, i32) {
    %c0_i32 = arith.constant 0 : i32
    %c0_i32_0 = arith.constant 0 : i32
    %c0_i32_1 = arith.constant 0 : i32
    return %arg0, %c0_i32, %c0_i32_0 : i32, i32, i32
  }
  func.func @transform_1(%arg0: i32, %arg1: memref<2xi32, #tpu.memory_space<smem>>) -> (i32, i32) {
    %c0_i32 = arith.constant 0 : i32
    %c0_i32_0 = arith.constant 0 : i32
    %c0_i32_1 = arith.constant 0 : i32
    return %c0_i32, %c0_i32_0 : i32, i32
  }
  func.func @transform_2(%arg0: i32, %arg1: memref<2xi32, #tpu.memory_space<smem>>) -> (i32, i32) {
    %c0_i32 = arith.constant 0 : i32
    %c0_i32_0 = arith.constant 0 : i32
    %c0_i32_1 = arith.constant 0 : i32
    return %c0_i32, %c0_i32_0 : i32, i32
  }
  func.func @transform_3(%arg0: i32, %arg1: memref<2xi32, #tpu.memory_space<smem>>) -> (i32, i32) {
    %c0_i32 = arith.constant 0 : i32
    %c0_i32_0 = arith.constant 0 : i32
    %c0_i32_1 = arith.constant 0 : i32
    return %c0_i32, %c0_i32_0 : i32, i32
  }
  func.func @transform_4(%arg0: i32, %arg1: memref<2xi32, #tpu.memory_space<smem>>) -> (i32, i32) {
    %c0_i32 = arith.constant 0 : i32
    %c0_i32_0 = arith.constant 0 : i32
    %c0_i32_1 = arith.constant 0 : i32
    return %c0_i32, %c0_i32_0 : i32, i32
  }
  func.func @transform_5(%arg0: i32, %arg1: memref<2xi32, #tpu.memory_space<smem>>) -> (i32, i32) {
    %c0_i32 = arith.constant 0 : i32
    %c0_i32_0 = arith.constant 0 : i32
    %c0_i32_1 = arith.constant 0 : i32
    return %c0_i32, %c0_i32_0 : i32, i32
  }
  func.func @transform_6(%arg0: i32, %arg1: memref<2xi32, #tpu.memory_space<smem>>) -> (i32, i32) {
    %c0_i32 = arith.constant 0 : i32
    %c0_i32_0 = arith.constant 0 : i32
    %c0_i32_1 = arith.constant 0 : i32
    return %c0_i32, %c0_i32_0 : i32, i32
  }
  func.func @transform_7(%arg0: i32, %arg1: memref<2xi32, #tpu.memory_space<smem>>) -> (i32, i32, i32) {
    %c0_i32 = arith.constant 0 : i32
    %c0_i32_0 = arith.constant 0 : i32
    %c0_i32_1 = arith.constant 0 : i32
    return %arg0, %c0_i32, %c0_i32_0 : i32, i32, i32
  }
}

module attributes {stable_mosaic.version = 11 : i64} {
  func.func @_ffn_kernel(%arg0: i32, %arg1: memref<1x8x32xf32, #tpu.memory_space<vmem>>, %arg2: memref<1x32xf32, #tpu.memory_space<vmem>>, %arg3: memref<1x32xf32, #tpu.memory_space<vmem>>, %arg4: memref<32x64xbf16, #tpu.memory_space<vmem>>, %arg5: memref<1x64xf32, #tpu.memory_space<vmem>>, %arg6: memref<64x32xbf16, #tpu.memory_space<vmem>>, %arg7: memref<1x32xf32, #tpu.memory_space<vmem>>, %arg8: memref<1x8x32xf32, #tpu.memory_space<vmem>>) attributes {dimension_semantics = [#tpu.dimension_semantics<parallel>], iteration_bounds = array<i64: 2>, scalar_prefetch = 0 : i64, scratch_operands = 0 : i64, tpu.core_type = #tpu.core_type<tc>, window_params = [{transform_indices = @transform_0, window_bounds = array<i64: 1, 8, 32>}, {pipeline_mode = #tpu.pipeline_mode<synchronous>, transform_indices = @transform_1, window_bounds = array<i64: 1, 32>}, {pipeline_mode = #tpu.pipeline_mode<synchronous>, transform_indices = @transform_2, window_bounds = array<i64: 1, 32>}, {pipeline_mode = #tpu.pipeline_mode<synchronous>, transform_indices = @transform_3, window_bounds = array<i64: 32, 64>}, {pipeline_mode = #tpu.pipeline_mode<synchronous>, transform_indices = @transform_4, window_bounds = array<i64: 1, 64>}, {pipeline_mode = #tpu.pipeline_mode<synchronous>, transform_indices = @transform_5, window_bounds = array<i64: 64, 32>}, {pipeline_mode = #tpu.pipeline_mode<synchronous>, transform_indices = @transform_6, window_bounds = array<i64: 1, 32>}, {transform_indices = @transform_7, window_bounds = array<i64: 1, 8, 32>}]} {
    %c0 = arith.constant 0 : index
    %c0_0 = arith.constant 0 : index
    %c0_1 = arith.constant 0 : index
    %0 = vector.load %arg1[%c0, %c0_0, %c0_1] : memref<1x8x32xf32, #tpu.memory_space<vmem>>, vector<1x8x32xf32>
    %1 = vector.shape_cast %0 : vector<1x8x32xf32> to vector<8x32xf32>
    %c0_2 = arith.constant 0 : index
    %c0_3 = arith.constant 0 : index
    %2 = vector.load %arg2[%c0_2, %c0_3] : memref<1x32xf32, #tpu.memory_space<vmem>>, vector<1x32xf32>
    %c0_4 = arith.constant 0 : index
    %c0_5 = arith.constant 0 : index
    %3 = vector.load %arg3[%c0_4, %c0_5] : memref<1x32xf32, #tpu.memory_space<vmem>>, vector<1x32xf32>
    %cst = arith.constant dense<0.000000e+00> : vector<8xf32>
    %4 = vector.multi_reduction <add>, %1, %cst [1] : vector<8x32xf32> to vector<8xf32>
    %5 = vector.shape_cast %4 : vector<8xf32> to vector<8x1xf32>
    %cst_6 = arith.constant 3.200000e+01 : f32
    %6 = vector.broadcast %cst_6 : f32 to vector<8x1xf32>
    %7 = arith.divf %5, %6 : vector<8x1xf32>
    %8 = vector.broadcast %7 : vector<8x1xf32> to vector<8x32xf32>
    %9 = arith.subf %1, %8 : vector<8x32xf32>
    %10 = vector.broadcast %7 : vector<8x1xf32> to vector<8x32xf32>
    %11 = arith.subf %1, %10 : vector<8x32xf32>
    %12 = arith.mulf %9, %11 : vector<8x32xf32>
    %cst_7 = arith.constant dense<0.000000e+00> : vector<8xf32>
    %13 = vector.multi_reduction <add>, %12, %cst_7 [1] : vector<8x32xf32> to vector<8xf32>
    %14 = vector.shape_cast %13 : vector<8xf32> to vector<8x1xf32>
    %cst_8 = arith.constant 3.200000e+01 : f32
    %15 = vector.broadcast %cst_8 : f32 to vector<8x1xf32>
    %16 = arith.divf %14, %15 : vector<8x1xf32>
    %17 = vector.broadcast %7 : vector<8x1xf32> to vector<8x32xf32>
    %18 = arith.subf %1, %17 : vector<8x32xf32>
    %cst_9 = arith.constant 9.99999974E-6 : f32
    %19 = vector.broadcast %cst_9 : f32 to vector<8x1xf32>
    %20 = arith.addf %16, %19 : vector<8x1xf32>
    %21 = math.rsqrt %20 : vector<8x1xf32>
    %22 = vector.broadcast %21 : vector<8x1xf32> to vector<8x32xf32>
    %23 = arith.mulf %18, %22 : vector<8x32xf32>
    %24 = vector.broadcast %2 : vector<1x32xf32> to vector<8x32xf32>
    %25 = arith.mulf %23, %24 : vector<8x32xf32>
    %26 = vector.broadcast %3 : vector<1x32xf32> to vector<8x32xf32>
    %27 = arith.addf %25, %26 : vector<8x32xf32>
    %28 = arith.truncf %27 : vector<8x32xf32> to vector<8x32xbf16>
    %c0_10 = arith.constant 0 : index
    %c0_11 = arith.constant 0 : index
    %29 = vector.load %arg4[%c0_10, %c0_11] : memref<32x64xbf16, #tpu.memory_space<vmem>>, vector<32x64xbf16>
    %cst_12 = arith.constant dense<0.000000e+00> : vector<8x64xf32>
    %30 = tpu.matmul %28, %29, %cst_12 {dimension_numbers = #tpu.dot_dimension_numbers<[1], [0], [0], [1], [0, 0, 1, 1], [], []>} : vector<8x32xbf16>, vector<32x64xbf16>, vector<8x64xf32> -> vector<8x64xf32>
    %c0_13 = arith.constant 0 : index
    %c0_14 = arith.constant 0 : index
    %31 = vector.load %arg5[%c0_13, %c0_14] : memref<1x64xf32, #tpu.memory_space<vmem>>, vector<1x64xf32>
    %32 = vector.broadcast %31 : vector<1x64xf32> to vector<8x64xf32>
    %33 = arith.addf %30, %32 : vector<8x64xf32>
    %cst_15 = arith.constant 0.000000e+00 : f32
    %34 = vector.broadcast %cst_15 : f32 to vector<8x64xf32>
    %35 = arith.maximumf %33, %34 : vector<8x64xf32>
    %36 = arith.truncf %35 : vector<8x64xf32> to vector<8x64xbf16>
    %c0_16 = arith.constant 0 : index
    %c0_17 = arith.constant 0 : index
    %37 = vector.load %arg6[%c0_16, %c0_17] : memref<64x32xbf16, #tpu.memory_space<vmem>>, vector<64x32xbf16>
    %cst_18 = arith.constant dense<0.000000e+00> : vector<8x32xf32>
    %38 = tpu.matmul %36, %37, %cst_18 {dimension_numbers = #tpu.dot_dimension_numbers<[1], [0], [0], [1], [0, 0, 1, 1], [], []>} : vector<8x64xbf16>, vector<64x32xbf16>, vector<8x32xf32> -> vector<8x32xf32>
    %c0_19 = arith.constant 0 : index
    %c0_20 = arith.constant 0 : index
    %39 = vector.load %arg7[%c0_19, %c0_20] : memref<1x32xf32, #tpu.memory_space<vmem>>, vector<1x32xf32>
    %40 = vector.broadcast %39 : vector<1x32xf32> to vector<8x32xf32>
    %41 = arith.addf %38, %40 : vector<8x32xf32>
    %42 = arith.addf %1, %41 : vector<8x32xf32>
    %c0_21 = arith.constant 0 : index
    %c0_22 = arith.constant 0 : index
    %c0_23 = arith.constant 0 : index
    %43 = vector.load %arg8[%c0_21, %c0_22, %c0_23] : memref<1x8x32xf32, #tpu.memory_space<vmem>>, vector<1x8x32xf32>
    %44 = vector.shape_cast %43 : vector<1x8x32xf32> to vector<8x32xf32>
    %45 = vector.shape_cast %42 : vector<8x32xf32> to vector<1x8x32xf32>
    tpu.vector_store %arg8[%c0_21, %c0_22, %c0_23], %45 {strides = array<i32>} : memref<1x8x32xf32, #tpu.memory_space<vmem>>, vector<1x8x32xf32>,
    return
  }
  func.func @transform_0(%arg0: i32) -> (i32, i32, i32) {
    %c0_i32 = arith.constant 0 : i32
    %c0_i32_0 = arith.constant 0 : i32
    %c0_i32_1 = arith.constant 0 : i32
    return %arg0, %c0_i32, %c0_i32_0 : i32, i32, i32
  }
  func.func @transform_1(%arg0: i32) -> (i32, i32) {
    %c0_i32 = arith.constant 0 : i32
    %c0_i32_0 = arith.constant 0 : i32
    %c0_i32_1 = arith.constant 0 : i32
    return %c0_i32, %c0_i32_0 : i32, i32
  }
  func.func @transform_2(%arg0: i32) -> (i32, i32) {
    %c0_i32 = arith.constant 0 : i32
    %c0_i32_0 = arith.constant 0 : i32
    %c0_i32_1 = arith.constant 0 : i32
    return %c0_i32, %c0_i32_0 : i32, i32
  }
  func.func @transform_3(%arg0: i32) -> (i32, i32) {
    %c0_i32 = arith.constant 0 : i32
    %c0_i32_0 = arith.constant 0 : i32
    %c0_i32_1 = arith.constant 0 : i32
    return %c0_i32, %c0_i32_0 : i32, i32
  }
  func.func @transform_4(%arg0: i32) -> (i32, i32) {
    %c0_i32 = arith.constant 0 : i32
    %c0_i32_0 = arith.constant 0 : i32
    %c0_i32_1 = arith.constant 0 : i32
    return %c0_i32, %c0_i32_0 : i32, i32
  }
  func.func @transform_5(%arg0: i32) -> (i32, i32) {
    %c0_i32 = arith.constant 0 : i32
    %c0_i32_0 = arith.constant 0 : i32
    %c0_i32_1 = arith.constant 0 : i32
    return %c0_i32, %c0_i32_0 : i32, i32
  }
  func.func @transform_6(%arg0: i32) -> (i32, i32) {
    %c0_i32 = arith.constant 0 : i32
    %c0_i32_0 = arith.constant 0 : i32
    %c0_i32_1 = arith.constant 0 : i32
    return %c0_i32, %c0_i32_0 : i32, i32
  }
  func.func @transform_7(%arg0: i32) -> (i32, i32, i32) {
    %c0_i32 = arith.constant 0 : i32
    %c0_i32_0 = arith.constant 0 : i32
    %c0_i32_1 = arith.constant 0 : i32
    return %arg0, %c0_i32, %c0_i32_0 : i32, i32, i32
  }
}

module attributes {stable_mosaic.version = 11 : i64} {
  func.func @_ffn_kernel(%arg0: i32, %arg1: memref<1x8x32xf32, #tpu.memory_space<vmem>>, %arg2: memref<1x32xf32, #tpu.memory_space<vmem>>, %arg3: memref<1x32xf32, #tpu.memory_space<vmem>>, %arg4: memref<32x64xbf16, #tpu.memory_space<vmem>>, %arg5: memref<1x64xf32, #tpu.memory_space<vmem>>, %arg6: memref<64x32xbf16, #tpu.memory_space<vmem>>, %arg7: memref<1x32xf32, #tpu.memory_space<vmem>>, %arg8: memref<1x32xf32, #tpu.memory_space<vmem>>, %arg9: memref<1x32xf32, #tpu.memory_space<vmem>>, %arg10: memref<1x8x32xf32, #tpu.memory_space<vmem>>) attributes {dimension_semantics = [#tpu.dimension_semantics<parallel>], iteration_bounds = array<i64: 2>, scalar_prefetch = 0 : i64, scratch_operands = 0 : i64, tpu.core_type = #tpu.core_type<tc>, window_params = [{transform_indices = @transform_0, window_bounds = array<i64: 1, 8, 32>}, {pipeline_mode = #tpu.pipeline_mode<synchronous>, transform_indices = @transform_1, window_bounds = array<i64: 1, 32>}, {pipeline_mode = #tpu.pipeline_mode<synchronous>, transform_indices = @transform_2, window_bounds = array<i64: 1, 32>}, {pipeline_mode = #tpu.pipeline_mode<synchronous>, transform_indices = @transform_3, window_bounds = array<i64: 32, 64>}, {pipeline_mode = #tpu.pipeline_mode<synchronous>, transform_indices = @transform_4, window_bounds = array<i64: 1, 64>}, {pipeline_mode = #tpu.pipeline_mode<synchronous>, transform_indices = @transform_5, window_bounds = array<i64: 64, 32>}, {pipeline_mode = #tpu.pipeline_mode<synchronous>, transform_indices = @transform_6, window_bounds = array<i64: 1, 32>}, {pipeline_mode = #tpu.pipeline_mode<synchronous>, transform_indices = @transform_7, window_bounds = array<i64: 1, 32>}, {pipeline_mode = #tpu.pipeline_mode<synchronous>, transform_indices = @transform_8, window_bounds = array<i64: 1, 32>}, {transform_indices = @transform_9, window_bounds = array<i64: 1, 8, 32>}]} {
    %c0 = arith.constant 0 : index
    %c0_0 = arith.constant 0 : index
    %c0_1 = arith.constant 0 : index
    %0 = vector.load %arg1[%c0, %c0_0, %c0_1] : memref<1x8x32xf32, #tpu.memory_space<vmem>>, vector<1x8x32xf32>
    %1 = vector.shape_cast %0 : vector<1x8x32xf32> to vector<8x32xf32>
    %c0_2 = arith.constant 0 : index
    %c0_3 = arith.constant 0 : index
    %2 = vector.load %arg2[%c0_2, %c0_3] : memref<1x32xf32, #tpu.memory_space<vmem>>, vector<1x32xf32>
    %c0_4 = arith.constant 0 : index
    %c0_5 = arith.constant 0 : index
    %3 = vector.load %arg3[%c0_4, %c0_5] : memref<1x32xf32, #tpu.memory_space<vmem>>, vector<1x32xf32>
    %cst = arith.constant dense<0.000000e+00> : vector<8xf32>
    %4 = vector.multi_reduction <add>, %1, %cst [1] : vector<8x32xf32> to vector<8xf32>
    %5 = vector.shape_cast %4 : vector<8xf32> to vector<8x1xf32>
    %cst_6 = arith.constant 3.200000e+01 : f32
    %6 = vector.broadcast %cst_6 : f32 to vector<8x1xf32>
    %7 = arith.divf %5, %6 : vector<8x1xf32>
    %8 = vector.broadcast %7 : vector<8x1xf32> to vector<8x32xf32>
    %9 = arith.subf %1, %8 : vector<8x32xf32>
    %10 = vector.broadcast %7 : vector<8x1xf32> to vector<8x32xf32>
    %11 = arith.subf %1, %10 : vector<8x32xf32>
    %12 = arith.mulf %9, %11 : vector<8x32xf32>
    %cst_7 = arith.constant dense<0.000000e+00> : vector<8xf32>
    %13 = vector.multi_reduction <add>, %12, %cst_7 [1] : vector<8x32xf32> to vector<8xf32>
    %14 = vector.shape_cast %13 : vector<8xf32> to vector<8x1xf32>
    %cst_8 = arith.constant 3.200000e+01 : f32
    %15 = vector.broadcast %cst_8 : f32 to vector<8x1xf32>
    %16 = arith.divf %14, %15 : vector<8x1xf32>
    %17 = vector.broadcast %7 : vector<8x1xf32> to vector<8x32xf32>
    %18 = arith.subf %1, %17 : vector<8x32xf32>
    %cst_9 = arith.constant 9.99999974E-6 : f32
    %19 = vector.broadcast %cst_9 : f32 to vector<8x1xf32>
    %20 = arith.addf %16, %19 : vector<8x1xf32>
    %21 = math.rsqrt %20 : vector<8x1xf32>
    %22 = vector.broadcast %21 : vector<8x1xf32> to vector<8x32xf32>
    %23 = arith.mulf %18, %22 : vector<8x32xf32>
    %24 = vector.broadcast %2 : vector<1x32xf32> to vector<8x32xf32>
    %25 = arith.mulf %23, %24 : vector<8x32xf32>
    %26 = vector.broadcast %3 : vector<1x32xf32> to vector<8x32xf32>
    %27 = arith.addf %25, %26 : vector<8x32xf32>
    %28 = arith.truncf %27 : vector<8x32xf32> to vector<8x32xbf16>
    %c0_10 = arith.constant 0 : index
    %c0_11 = arith.constant 0 : index
    %29 = vector.load %arg4[%c0_10, %c0_11] : memref<32x64xbf16, #tpu.memory_space<vmem>>, vector<32x64xbf16>
    %cst_12 = arith.constant dense<0.000000e+00> : vector<8x64xf32>
    %30 = tpu.matmul %28, %29, %cst_12 {dimension_numbers = #tpu.dot_dimension_numbers<[1], [0], [0], [1], [0, 0, 1, 1], [], []>} : vector<8x32xbf16>, vector<32x64xbf16>, vector<8x64xf32> -> vector<8x64xf32>
    %c0_13 = arith.constant 0 : index
    %c0_14 = arith.constant 0 : index
    %31 = vector.load %arg5[%c0_13, %c0_14] : memref<1x64xf32, #tpu.memory_space<vmem>>, vector<1x64xf32>
    %32 = vector.broadcast %31 : vector<1x64xf32> to vector<8x64xf32>
    %33 = arith.addf %30, %32 : vector<8x64xf32>
    %cst_15 = arith.constant 0.000000e+00 : f32
    %34 = vector.broadcast %cst_15 : f32 to vector<8x64xf32>
    %35 = arith.maximumf %33, %34 : vector<8x64xf32>
    %36 = arith.truncf %35 : vector<8x64xf32> to vector<8x64xbf16>
    %c0_16 = arith.constant 0 : index
    %c0_17 = arith.constant 0 : index
    %37 = vector.load %arg6[%c0_16, %c0_17] : memref<64x32xbf16, #tpu.memory_space<vmem>>, vector<64x32xbf16>
    %cst_18 = arith.constant dense<0.000000e+00> : vector<8x32xf32>
    %38 = tpu.matmul %36, %37, %cst_18 {dimension_numbers = #tpu.dot_dimension_numbers<[1], [0], [0], [1], [0, 0, 1, 1], [], []>} : vector<8x64xbf16>, vector<64x32xbf16>, vector<8x32xf32> -> vector<8x32xf32>
    %c0_19 = arith.constant 0 : index
    %c0_20 = arith.constant 0 : index
    %39 = vector.load %arg7[%c0_19, %c0_20] : memref<1x32xf32, #tpu.memory_space<vmem>>, vector<1x32xf32>
    %40 = vector.broadcast %39 : vector<1x32xf32> to vector<8x32xf32>
    %41 = arith.addf %38, %40 : vector<8x32xf32>
    %42 = arith.addf %1, %41 : vector<8x32xf32>
    %c0_21 = arith.constant 0 : index
    %c0_22 = arith.constant 0 : index
    %43 = vector.load %arg8[%c0_21, %c0_22] : memref<1x32xf32, #tpu.memory_space<vmem>>, vector<1x32xf32>
    %c0_23 = arith.constant 0 : index
    %c0_24 = arith.constant 0 : index
    %44 = vector.load %arg9[%c0_23, %c0_24] : memref<1x32xf32, #tpu.memory_space<vmem>>, vector<1x32xf32>
    %cst_25 = arith.constant dense<0.000000e+00> : vector<8xf32>
    %45 = vector.multi_reduction <add>, %42, %cst_25 [1] : vector<8x32xf32> to vector<8xf32>
    %46 = vector.shape_cast %45 : vector<8xf32> to vector<8x1xf32>
    %cst_26 = arith.constant 3.200000e+01 : f32
    %47 = vector.broadcast %cst_26 : f32 to vector<8x1xf32>
    %48 = arith.divf %46, %47 : vector<8x1xf32>
    %49 = vector.broadcast %48 : vector<8x1xf32> to vector<8x32xf32>
    %50 = arith.subf %42, %49 : vector<8x32xf32>
    %51 = vector.broadcast %48 : vector<8x1xf32> to vector<8x32xf32>
    %52 = arith.subf %42, %51 : vector<8x32xf32>
    %53 = arith.mulf %50, %52 : vector<8x32xf32>
    %cst_27 = arith.constant dense<0.000000e+00> : vector<8xf32>
    %54 = vector.multi_reduction <add>, %53, %cst_27 [1] : vector<8x32xf32> to vector<8xf32>
    %55 = vector.shape_cast %54 : vector<8xf32> to vector<8x1xf32>
    %cst_28 = arith.constant 3.200000e+01 : f32
    %56 = vector.broadcast %cst_28 : f32 to vector<8x1xf32>
    %57 = arith.divf %55, %56 : vector<8x1xf32>
    %58 = vector.broadcast %48 : vector<8x1xf32> to vector<8x32xf32>
    %59 = arith.subf %42, %58 : vector<8x32xf32>
    %cst_29 = arith.constant 9.99999974E-6 : f32
    %60 = vector.broadcast %cst_29 : f32 to vector<8x1xf32>
    %61 = arith.addf %57, %60 : vector<8x1xf32>
    %62 = math.rsqrt %61 : vector<8x1xf32>
    %63 = vector.broadcast %62 : vector<8x1xf32> to vector<8x32xf32>
    %64 = arith.mulf %59, %63 : vector<8x32xf32>
    %65 = vector.broadcast %43 : vector<1x32xf32> to vector<8x32xf32>
    %66 = arith.mulf %64, %65 : vector<8x32xf32>
    %67 = vector.broadcast %44 : vector<1x32xf32> to vector<8x32xf32>
    %68 = arith.addf %66, %67 : vector<8x32xf32>
    %c0_30 = arith.constant 0 : index
    %c0_31 = arith.constant 0 : index
    %c0_32 = arith.constant 0 : index
    %69 = vector.load %arg10[%c0_30, %c0_31, %c0_32] : memref<1x8x32xf32, #tpu.memory_space<vmem>>, vector<1x8x32xf32>
    %70 = vector.shape_cast %69 : vector<1x8x32xf32> to vector<8x32xf32>
    %71 = vector.shape_cast %68 : vector<8x32xf32> to vector<1x8x32xf32>
    tpu.vector_store %arg10[%c0_30, %c0_31, %c0_32], %71 {strides = array<i32>} : memref<1x8x32xf32, #tpu.memory_space<vmem>>, vector<1x8x32xf32>,
    return
  }
  func.func @transform_0(%arg0: i32) -> (i32, i32, i32) {
    %c0_i32 = arith.constant 0 : i32
    %c0_i32_0 = arith.constant 0 : i32
    %c0_i32_1 = arith.constant 0 : i32
    return %arg0, %c0_i32, %c0_i32_0 : i32, i32, i32
  }
  func.func @transform_1(%arg0: i32) -> (i32, i32) {
    %c0_i32 = arith.constant 0 : i32
    %c0_i32_0 = arith.constant 0 : i32
    %c0_i32_1 = arith.constant 0 : i32
    return %c0_i32, %c0_i32_0 : i32, i32
  }
  func.func @transform_2(%arg0: i32) -> (i32, i32) {
    %c0_i32 = arith.constant 0 : i32
    %c0_i32_0 = arith.constant 0 : i32
    %c0_i32_1 = arith.constant 0 : i32
    return %c0_i32, %c0_i32_0 : i32, i32
  }
  func.func @transform_3(%arg0: i32) -> (i32, i32) {
    %c0_i32 = arith.constant 0 : i32
    %c0_i32_0 = arith.constant 0 : i32
    %c0_i32_1 = arith.constant 0 : i32
    return %c0_i32, %c0_i32_0 : i32, i32
  }
  func.func @transform_4(%arg0: i32) -> (i32, i32) {
    %c0_i32 = arith.constant 0 : i32
    %c0_i32_0 = arith.constant 0 : i32
    %c0_i32_1 = arith.constant 0 : i32
    return %c0_i32, %c0_i32_0 : i32, i32
  }
  func.func @transform_5(%arg0: i32) -> (i32, i32) {
    %c0_i32 = arith.constant 0 : i32
    %c0_i32_0 = arith.constant 0 : i32
    %c0_i32_1 = arith.constant 0 : i32
    return %c0_i32, %c0_i32_0 : i32, i32
  }
  func.func @transform_6(%arg0: i32) -> (i32, i32) {
    %c0_i32 = arith.constant 0 : i32
    %c0_i32_0 = arith.constant 0 : i32
    %c0_i32_1 = arith.constant 0 : i32
    return %c0_i32, %c0_i32_0 : i32, i32
  }
  func.func @transform_7(%arg0: i32) -> (i32, i32) {
    %c0_i32 = arith.constant 0 : i32
    %c0_i32_0 = arith.constant 0 : i32
    %c0_i32_1 = arith.constant 0 : i32
    return %c0_i32, %c0_i32_0 : i32, i32
  }
  func.func @transform_8(%arg0: i32) -> (i32, i32) {
    %c0_i32 = arith.constant 0 : i32
    %c0_i32_0 = arith.constant 0 : i32
    %c0_i32_1 = arith.constant 0 : i32
    return %c0_i32, %c0_i32_0 : i32, i32
  }
  func.func @transform_9(%arg0: i32) -> (i32, i32, i32) {
    %c0_i32 = arith.constant 0 : i32
    %c0_i32_0 = arith.constant 0 : i32
    %c0_i32_1 = arith.constant 0 : i32
    return %arg0, %c0_i32, %c0_i32_0 : i32, i32, i32
  }
}

module attributes {stable_mosaic.version = 11 : i64} {
  func.func @_cross_attn_kernel(%arg0: i32, %arg1: memref<2xi32, #tpu.memory_space<smem>>, %arg2: memref<1x8x32xf32, #tpu.memory_space<vmem>>, %arg3: memref<1x8x32xf32, #tpu.memory_space<vmem>>, %arg4: memref<1x32xf32, #tpu.memory_space<vmem>>, %arg5: memref<1x32xf32, #tpu.memory_space<vmem>>, %arg6: memref<32x32xbf16, #tpu.memory_space<vmem>>, %arg7: memref<1x32xf32, #tpu.memory_space<vmem>>, %arg8: memref<32x64xbf16, #tpu.memory_space<vmem>>, %arg9: memref<1x64xf32, #tpu.memory_space<vmem>>, %arg10: memref<32x32xbf16, #tpu.memory_space<vmem>>, %arg11: memref<1x32xf32, #tpu.memory_space<vmem>>, %arg12: memref<1x8x32xf32, #tpu.memory_space<vmem>>) attributes {dimension_semantics = [#tpu.dimension_semantics<parallel>], iteration_bounds = array<i64: 2>, scalar_prefetch = 1 : i64, scratch_operands = 0 : i64, tpu.core_type = #tpu.core_type<tc>, window_params = [{transform_indices = @transform_0, window_bounds = array<i64: 1, 8, 32>}, {transform_indices = @transform_1, window_bounds = array<i64: 1, 8, 32>}, {pipeline_mode = #tpu.pipeline_mode<synchronous>, transform_indices = @transform_2, window_bounds = array<i64: 1, 32>}, {pipeline_mode = #tpu.pipeline_mode<synchronous>, transform_indices = @transform_3, window_bounds = array<i64: 1, 32>}, {pipeline_mode = #tpu.pipeline_mode<synchronous>, transform_indices = @transform_4, window_bounds = array<i64: 32, 32>}, {pipeline_mode = #tpu.pipeline_mode<synchronous>, transform_indices = @transform_5, window_bounds = array<i64: 1, 32>}, {pipeline_mode = #tpu.pipeline_mode<synchronous>, transform_indices = @transform_6, window_bounds = array<i64: 32, 64>}, {pipeline_mode = #tpu.pipeline_mode<synchronous>, transform_indices = @transform_7, window_bounds = array<i64: 1, 64>}, {pipeline_mode = #tpu.pipeline_mode<synchronous>, transform_indices = @transform_8, window_bounds = array<i64: 32, 32>}, {pipeline_mode = #tpu.pipeline_mode<synchronous>, transform_indices = @transform_9, window_bounds = array<i64: 1, 32>}, {transform_indices = @transform_10, window_bounds = array<i64: 1, 8, 32>}]} {
    %c0 = arith.constant 0 : index
    %c0_0 = arith.constant 0 : index
    %c0_1 = arith.constant 0 : index
    %0 = vector.load %arg2[%c0, %c0_0, %c0_1] : memref<1x8x32xf32, #tpu.memory_space<vmem>>, vector<1x8x32xf32>
    %1 = vector.shape_cast %0 : vector<1x8x32xf32> to vector<8x32xf32>
    %c0_2 = arith.constant 0 : index
    %c0_3 = arith.constant 0 : index
    %c0_4 = arith.constant 0 : index
    %2 = vector.load %arg3[%c0_2, %c0_3, %c0_4] : memref<1x8x32xf32, #tpu.memory_space<vmem>>, vector<1x8x32xf32>
    %3 = vector.shape_cast %2 : vector<1x8x32xf32> to vector<8x32xf32>
    %c0_5 = arith.constant 0 : index
    %c0_6 = arith.constant 0 : index
    %4 = vector.load %arg4[%c0_5, %c0_6] : memref<1x32xf32, #tpu.memory_space<vmem>>, vector<1x32xf32>
    %c0_7 = arith.constant 0 : index
    %c0_8 = arith.constant 0 : index
    %5 = vector.load %arg5[%c0_7, %c0_8] : memref<1x32xf32, #tpu.memory_space<vmem>>, vector<1x32xf32>
    %cst = arith.constant dense<0.000000e+00> : vector<8xf32>
    %6 = vector.multi_reduction <add>, %1, %cst [1] : vector<8x32xf32> to vector<8xf32>
    %7 = vector.shape_cast %6 : vector<8xf32> to vector<8x1xf32>
    %cst_9 = arith.constant 3.200000e+01 : f32
    %8 = vector.broadcast %cst_9 : f32 to vector<8x1xf32>
    %9 = arith.divf %7, %8 : vector<8x1xf32>
    %10 = vector.broadcast %9 : vector<8x1xf32> to vector<8x32xf32>
    %11 = arith.subf %1, %10 : vector<8x32xf32>
    %12 = vector.broadcast %9 : vector<8x1xf32> to vector<8x32xf32>
    %13 = arith.subf %1, %12 : vector<8x32xf32>
    %14 = arith.mulf %11, %13 : vector<8x32xf32>
    %cst_10 = arith.constant dense<0.000000e+00> : vector<8xf32>
    %15 = vector.multi_reduction <add>, %14, %cst_10 [1] : vector<8x32xf32> to vector<8xf32>
    %16 = vector.shape_cast %15 : vector<8xf32> to vector<8x1xf32>
    %cst_11 = arith.constant 3.200000e+01 : f32
    %17 = vector.broadcast %cst_11 : f32 to vector<8x1xf32>
    %18 = arith.divf %16, %17 : vector<8x1xf32>
    %19 = vector.broadcast %9 : vector<8x1xf32> to vector<8x32xf32>
    %20 = arith.subf %1, %19 : vector<8x32xf32>
    %cst_12 = arith.constant 9.99999974E-6 : f32
    %21 = vector.broadcast %cst_12 : f32 to vector<8x1xf32>
    %22 = arith.addf %18, %21 : vector<8x1xf32>
    %23 = math.rsqrt %22 : vector<8x1xf32>
    %24 = vector.broadcast %23 : vector<8x1xf32> to vector<8x32xf32>
    %25 = arith.mulf %20, %24 : vector<8x32xf32>
    %26 = vector.broadcast %4 : vector<1x32xf32> to vector<8x32xf32>
    %27 = arith.mulf %25, %26 : vector<8x32xf32>
    %28 = vector.broadcast %5 : vector<1x32xf32> to vector<8x32xf32>
    %29 = arith.addf %27, %28 : vector<8x32xf32>
    %30 = arith.truncf %29 : vector<8x32xf32> to vector<8x32xbf16>
    %c0_13 = arith.constant 0 : index
    %c0_14 = arith.constant 0 : index
    %31 = vector.load %arg6[%c0_13, %c0_14] : memref<32x32xbf16, #tpu.memory_space<vmem>>, vector<32x32xbf16>
    %cst_15 = arith.constant dense<0.000000e+00> : vector<8x32xf32>
    %32 = tpu.matmul %30, %31, %cst_15 {dimension_numbers = #tpu.dot_dimension_numbers<[1], [0], [0], [1], [0, 0, 1, 1], [], []>} : vector<8x32xbf16>, vector<32x32xbf16>, vector<8x32xf32> -> vector<8x32xf32>
    %c0_16 = arith.constant 0 : index
    %c0_17 = arith.constant 0 : index
    %33 = vector.load %arg7[%c0_16, %c0_17] : memref<1x32xf32, #tpu.memory_space<vmem>>, vector<1x32xf32>
    %34 = vector.broadcast %33 : vector<1x32xf32> to vector<8x32xf32>
    %35 = arith.addf %32, %34 : vector<8x32xf32>
    %36 = arith.truncf %3 : vector<8x32xf32> to vector<8x32xbf16>
    %c0_18 = arith.constant 0 : index
    %c0_19 = arith.constant 0 : index
    %37 = vector.load %arg8[%c0_18, %c0_19] : memref<32x64xbf16, #tpu.memory_space<vmem>>, vector<32x64xbf16>
    %cst_20 = arith.constant dense<0.000000e+00> : vector<8x64xf32>
    %38 = tpu.matmul %36, %37, %cst_20 {dimension_numbers = #tpu.dot_dimension_numbers<[1], [0], [0], [1], [0, 0, 1, 1], [], []>} : vector<8x32xbf16>, vector<32x64xbf16>, vector<8x64xf32> -> vector<8x64xf32>
    %c0_21 = arith.constant 0 : index
    %c0_22 = arith.constant 0 : index
    %39 = vector.load %arg9[%c0_21, %c0_22] : memref<1x64xf32, #tpu.memory_space<vmem>>, vector<1x64xf32>
    %40 = vector.broadcast %39 : vector<1x64xf32> to vector<8x64xf32>
    %41 = arith.addf %38, %40 : vector<8x64xf32>
    %42 = vector.extract_strided_slice %41 {offsets = [0, 0], sizes = [8, 32], strides = [1, 1]} : vector<8x64xf32> to vector<8x32xf32>
    %43 = vector.extract_strided_slice %41 {offsets = [0, 32], sizes = [8, 32], strides = [1, 1]} : vector<8x64xf32> to vector<8x32xf32>
    %44 = arith.index_cast %arg0 : i32 to index
    %45 = memref.load %arg1[%44] : memref<2xi32, #tpu.memory_space<smem>>
    %46 = tpu.iota {dimensions = array<i32: 1>} : vector<8x8xi32>
    %47 = vector.broadcast %45 : i32 to vector<8x8xi32>
    %48 = arith.cmpi sge, %46, %47 : vector<8x8xi32>
    %49 = vector.shape_cast %35 : vector<8x32xf32> to vector<8x4x8xf32>
    %50 = tpu.transpose %49, [1, 0, 2] : vector<8x4x8xf32> -> vector<4x8x8xf32>
    %51 = arith.truncf %50 : vector<4x8x8xf32> to vector<4x8x8xbf16>
    %52 = vector.shape_cast %42 : vector<8x32xf32> to vector<8x4x8xf32>
    %53 = tpu.transpose %52, [1, 0, 2] : vector<8x4x8xf32> -> vector<4x8x8xf32>
    %54 = arith.truncf %53 : vector<4x8x8xf32> to vector<4x8x8xbf16>
    %55 = vector.shape_cast %43 : vector<8x32xf32> to vector<8x4x8xf32>
    %56 = tpu.transpose %55, [1, 0, 2] : vector<8x4x8xf32> -> vector<4x8x8xf32>
    %57 = arith.truncf %56 : vector<4x8x8xf32> to vector<4x8x8xbf16>
    "tpu.trace_start"() <{level = 10 : i32, message = "hqd,hkd->hqk"}> : () -> ()
    %cst_23 = arith.constant dense<0.000000e+00> : vector<4x8x8xf32>
    %58 = tpu.matmul %51, %54, %cst_23 {dimension_numbers = #tpu.dot_dimension_numbers<[2], [2], [1], [1], [0, 0, 0, 1, 1, 1], [0], [0]>} : vector<4x8x8xbf16>, vector<4x8x8xbf16>, vector<4x8x8xf32> -> vector<4x8x8xf32>
    "tpu.trace_stop"() : () -> ()
    %cst_24 = arith.constant 0.353553385 : f32
    %59 = vector.broadcast %cst_24 : f32 to vector<4x8x8xf32>
    %60 = arith.mulf %58, %59 : vector<4x8x8xf32>
    %61 = vector.shape_cast %48 : vector<8x8xi1> to vector<1x8x8xi1>
    %cst_25 = arith.constant -1.000000e+09 : f32
    %62 = vector.shape_cast %61 : vector<1x8x8xi1> to vector<1x8x8xi1>
    %63 = vector.broadcast %62 : vector<1x8x8xi1> to vector<4x8x8xi1>
    %64 = vector.broadcast %cst_25 : f32 to vector<4x8x8xf32>
    %65 = arith.select %63, %64, %60 : vector<4x8x8xi1>, vector<4x8x8xf32>
    %cst_26 = arith.constant dense<0xFF800000> : vector<4x8xf32>
    %66 = vector.multi_reduction <maximumf>, %65, %cst_26 [2] : vector<4x8x8xf32> to vector<4x8xf32>
    %67 = vector.shape_cast %66 : vector<4x8xf32> to vector<4x8x1xf32>
    %68 = vector.broadcast %67 : vector<4x8x1xf32> to vector<4x8x8xf32>
    %69 = arith.subf %65, %68 : vector<4x8x8xf32>
    %70 = math.exp %69 : vector<4x8x8xf32>
    %cst_27 = arith.constant dense<0.000000e+00> : vector<4x8xf32>
    %71 = vector.multi_reduction <add>, %70, %cst_27 [2] : vector<4x8x8xf32> to vector<4x8xf32>
    %72 = vector.shape_cast %71 : vector<4x8xf32> to vector<4x8x1xf32>
    %73 = vector.broadcast %72 : vector<4x8x1xf32> to vector<4x8x8xf32>
    %74 = arith.divf %70, %73 : vector<4x8x8xf32>
    %75 = arith.truncf %74 : vector<4x8x8xf32> to vector<4x8x8xbf16>
    "tpu.trace_start"() <{level = 10 : i32, message = "hqk,hkd->hqd"}> : () -> ()
    %cst_28 = arith.constant dense<0.000000e+00> : vector<4x8x8xf32>
    %76 = tpu.matmul %75, %57, %cst_28 {dimension_numbers = #tpu.dot_dimension_numbers<[2], [1], [1], [2], [0, 0, 0, 1, 1, 2], [0], [0]>} : vector<4x8x8xbf16>, vector<4x8x8xbf16>, vector<4x8x8xf32> -> vector<4x8x8xf32>
    "tpu.trace_stop"() : () -> ()
    %77 = tpu.transpose %76, [1, 0, 2] : vector<4x8x8xf32> -> vector<8x4x8xf32>
    %78 = vector.shape_cast %77 : vector<8x4x8xf32> to vector<8x32xf32>
    %79 = arith.truncf %78 : vector<8x32xf32> to vector<8x32xbf16>
    %c0_29 = arith.constant 0 : index
    %c0_30 = arith.constant 0 : index
    %80 = vector.load %arg10[%c0_29, %c0_30] : memref<32x32xbf16, #tpu.memory_space<vmem>>, vector<32x32xbf16>
    %cst_31 = arith.constant dense<0.000000e+00> : vector<8x32xf32>
    %81 = tpu.matmul %79, %80, %cst_31 {dimension_numbers = #tpu.dot_dimension_numbers<[1], [0], [0], [1], [0, 0, 1, 1], [], []>} : vector<8x32xbf16>, vector<32x32xbf16>, vector<8x32xf32> -> vector<8x32xf32>
    %82 = arith.addf %1, %81 : vector<8x32xf32>
    %c0_32 = arith.constant 0 : index
    %c0_33 = arith.constant 0 : index
    %83 = vector.load %arg11[%c0_32, %c0_33] : memref<1x32xf32, #tpu.memory_space<vmem>>, vector<1x32xf32>
    %84 = vector.broadcast %83 : vector<1x32xf32> to vector<8x32xf32>
    %85 = arith.addf %82, %84 : vector<8x32xf32>
    %c0_34 = arith.constant 0 : index
    %c0_35 = arith.constant 0 : index
    %c0_36 = arith.constant 0 : index
    %86 = vector.load %arg12[%c0_34, %c0_35, %c0_36] : memref<1x8x32xf32, #tpu.memory_space<vmem>>, vector<1x8x32xf32>
    %87 = vector.shape_cast %86 : vector<1x8x32xf32> to vector<8x32xf32>
    %88 = vector.shape_cast %85 : vector<8x32xf32> to vector<1x8x32xf32>
    tpu.vector_store %arg12[%c0_34, %c0_35, %c0_36], %88 {strides = array<i32>} : memref<1x8x32xf32, #tpu.memory_space<vmem>>, vector<1x8x32xf32>,
    return
  }
  func.func @transform_0(%arg0: i32, %arg1: memref<2xi32, #tpu.memory_space<smem>>) -> (i32, i32, i32) {
    %c0_i32 = arith.constant 0 : i32
    %c0_i32_0 = arith.constant 0 : i32
    %c0_i32_1 = arith.constant 0 : i32
    return %arg0, %c0_i32, %c0_i32_0 : i32, i32, i32
  }
  func.func @transform_1(%arg0: i32, %arg1: memref<2xi32, #tpu.memory_space<smem>>) -> (i32, i32, i32) {
    %c0_i32 = arith.constant 0 : i32
    %c0_i32_0 = arith.constant 0 : i32
    %c0_i32_1 = arith.constant 0 : i32
    return %arg0, %c0_i32, %c0_i32_0 : i32, i32, i32
  }
  func.func @transform_2(%arg0: i32, %arg1: memref<2xi32, #tpu.memory_space<smem>>) -> (i32, i32) {
    %c0_i32 = arith.constant 0 : i32
    %c0_i32_0 = arith.constant 0 : i32
    %c0_i32_1 = arith.constant 0 : i32
    return %c0_i32, %c0_i32_0 : i32, i32
  }
  func.func @transform_3(%arg0: i32, %arg1: memref<2xi32, #tpu.memory_space<smem>>) -> (i32, i32) {
    %c0_i32 = arith.constant 0 : i32
    %c0_i32_0 = arith.constant 0 : i32
    %c0_i32_1 = arith.constant 0 : i32
    return %c0_i32, %c0_i32_0 : i32, i32
  }
  func.func @transform_4(%arg0: i32, %arg1: memref<2xi32, #tpu.memory_space<smem>>) -> (i32, i32) {
    %c0_i32 = arith.constant 0 : i32
    %c0_i32_0 = arith.constant 0 : i32
    %c0_i32_1 = arith.constant 0 : i32
    return %c0_i32, %c0_i32_0 : i32, i32
  }
  func.func @transform_5(%arg0: i32, %arg1: memref<2xi32, #tpu.memory_space<smem>>) -> (i32, i32) {
    %c0_i32 = arith.constant 0 : i32
    %c0_i32_0 = arith.constant 0 : i32
    %c0_i32_1 = arith.constant 0 : i32
    return %c0_i32, %c0_i32_0 : i32, i32
  }
  func.func @transform_6(%arg0: i32, %arg1: memref<2xi32, #tpu.memory_space<smem>>) -> (i32, i32) {
    %c0_i32 = arith.constant 0 : i32
    %c0_i32_0 = arith.constant 0 : i32
    %c0_i32_1 = arith.constant 0 : i32
    return %c0_i32, %c0_i32_0 : i32, i32
  }
  func.func @transform_7(%arg0: i32, %arg1: memref<2xi32, #tpu.memory_space<smem>>) -> (i32, i32) {
    %c0_i32 = arith.constant 0 : i32
    %c0_i32_0 = arith.constant 0 : i32
    %c0_i32_1 = arith.constant 0 : i32
    return %c0_i32, %c0_i32_0 : i32, i32
  }
  func.func @transform_8(%arg0: i32, %arg1: memref<2xi32, #tpu.memory_space<smem>>) -> (i32, i32) {
    %c0_i32 = arith.constant 0 : i32
    %c0_i32_0 = arith.constant 0 : i32
    %c0_i32_1 = arith.constant 0 : i32
    return %c0_i32, %c0_i32_0 : i32, i32
  }
  func.func @transform_9(%arg0: i32, %arg1: memref<2xi32, #tpu.memory_space<smem>>) -> (i32, i32) {
    %c0_i32 = arith.constant 0 : i32
    %c0_i32_0 = arith.constant 0 : i32
    %c0_i32_1 = arith.constant 0 : i32
    return %c0_i32, %c0_i32_0 : i32, i32
  }
  func.func @transform_10(%arg0: i32, %arg1: memref<2xi32, #tpu.memory_space<smem>>) -> (i32, i32, i32) {
    %c0_i32 = arith.constant 0 : i32
    %c0_i32_0 = arith.constant 0 : i32
    %c0_i32_1 = arith.constant 0 : i32
    return %arg0, %c0_i32, %c0_i32_0 : i32, i32, i32
  }
}

module attributes {stable_mosaic.version = 11 : i64} {
  func.func @_ln_classifier_kernel(%arg0: i32, %arg1: i32, %arg2: memref<1x8x32xf32, #tpu.memory_space<vmem>>, %arg3: memref<1x32xf32, #tpu.memory_space<vmem>>, %arg4: memref<1x32xf32, #tpu.memory_space<vmem>>, %arg5: memref<32x48xbf16, #tpu.memory_space<vmem>>, %arg6: memref<1x48xf32, #tpu.memory_space<vmem>>, %arg7: memref<1x8x48xf32, #tpu.memory_space<vmem>>) attributes {dimension_semantics = [#tpu.dimension_semantics<parallel>, #tpu.dimension_semantics<parallel>], iteration_bounds = array<i64: 2, 1>, scalar_prefetch = 0 : i64, scratch_operands = 0 : i64, tpu.core_type = #tpu.core_type<tc>, window_params = [{transform_indices = @transform_0, window_bounds = array<i64: 1, 8, 32>}, {pipeline_mode = #tpu.pipeline_mode<synchronous>, transform_indices = @transform_1, window_bounds = array<i64: 1, 32>}, {pipeline_mode = #tpu.pipeline_mode<synchronous>, transform_indices = @transform_2, window_bounds = array<i64: 1, 32>}, {transform_indices = @transform_3, window_bounds = array<i64: 32, 48>}, {transform_indices = @transform_4, window_bounds = array<i64: 1, 48>}, {transform_indices = @transform_5, window_bounds = array<i64: 1, 8, 48>}]} {
    %c0 = arith.constant 0 : index
    %c0_0 = arith.constant 0 : index
    %c0_1 = arith.constant 0 : index
    %0 = vector.load %arg2[%c0, %c0_0, %c0_1] : memref<1x8x32xf32, #tpu.memory_space<vmem>>, vector<1x8x32xf32>
    %1 = vector.shape_cast %0 : vector<1x8x32xf32> to vector<8x32xf32>
    %c0_2 = arith.constant 0 : index
    %c0_3 = arith.constant 0 : index
    %2 = vector.load %arg3[%c0_2, %c0_3] : memref<1x32xf32, #tpu.memory_space<vmem>>, vector<1x32xf32>
    %c0_4 = arith.constant 0 : index
    %c0_5 = arith.constant 0 : index
    %3 = vector.load %arg4[%c0_4, %c0_5] : memref<1x32xf32, #tpu.memory_space<vmem>>, vector<1x32xf32>
    %cst = arith.constant dense<0.000000e+00> : vector<8xf32>
    %4 = vector.multi_reduction <add>, %1, %cst [1] : vector<8x32xf32> to vector<8xf32>
    %5 = vector.shape_cast %4 : vector<8xf32> to vector<8x1xf32>
    %cst_6 = arith.constant 3.200000e+01 : f32
    %6 = vector.broadcast %cst_6 : f32 to vector<8x1xf32>
    %7 = arith.divf %5, %6 : vector<8x1xf32>
    %8 = vector.broadcast %7 : vector<8x1xf32> to vector<8x32xf32>
    %9 = arith.subf %1, %8 : vector<8x32xf32>
    %10 = vector.broadcast %7 : vector<8x1xf32> to vector<8x32xf32>
    %11 = arith.subf %1, %10 : vector<8x32xf32>
    %12 = arith.mulf %9, %11 : vector<8x32xf32>
    %cst_7 = arith.constant dense<0.000000e+00> : vector<8xf32>
    %13 = vector.multi_reduction <add>, %12, %cst_7 [1] : vector<8x32xf32> to vector<8xf32>
    %14 = vector.shape_cast %13 : vector<8xf32> to vector<8x1xf32>
    %cst_8 = arith.constant 3.200000e+01 : f32
    %15 = vector.broadcast %cst_8 : f32 to vector<8x1xf32>
    %16 = arith.divf %14, %15 : vector<8x1xf32>
    %17 = vector.broadcast %7 : vector<8x1xf32> to vector<8x32xf32>
    %18 = arith.subf %1, %17 : vector<8x32xf32>
    %cst_9 = arith.constant 9.99999974E-6 : f32
    %19 = vector.broadcast %cst_9 : f32 to vector<8x1xf32>
    %20 = arith.addf %16, %19 : vector<8x1xf32>
    %21 = math.rsqrt %20 : vector<8x1xf32>
    %22 = vector.broadcast %21 : vector<8x1xf32> to vector<8x32xf32>
    %23 = arith.mulf %18, %22 : vector<8x32xf32>
    %24 = vector.broadcast %2 : vector<1x32xf32> to vector<8x32xf32>
    %25 = arith.mulf %23, %24 : vector<8x32xf32>
    %26 = vector.broadcast %3 : vector<1x32xf32> to vector<8x32xf32>
    %27 = arith.addf %25, %26 : vector<8x32xf32>
    %28 = arith.truncf %27 : vector<8x32xf32> to vector<8x32xbf16>
    %c0_10 = arith.constant 0 : index
    %c0_11 = arith.constant 0 : index
    %29 = vector.load %arg5[%c0_10, %c0_11] : memref<32x48xbf16, #tpu.memory_space<vmem>>, vector<32x48xbf16>
    %cst_12 = arith.constant dense<0.000000e+00> : vector<8x48xf32>
    %30 = tpu.matmul %28, %29, %cst_12 {dimension_numbers = #tpu.dot_dimension_numbers<[1], [0], [0], [1], [0, 0, 1, 1], [], []>} : vector<8x32xbf16>, vector<32x48xbf16>, vector<8x48xf32> -> vector<8x48xf32>
    %c0_13 = arith.constant 0 : index
    %c0_14 = arith.constant 0 : index
    %31 = vector.load %arg6[%c0_13, %c0_14] : memref<1x48xf32, #tpu.memory_space<vmem>>, vector<1x48xf32>
    %32 = vector.broadcast %31 : vector<1x48xf32> to vector<8x48xf32>
    %33 = arith.addf %30, %32 : vector<8x48xf32>
    %c0_15 = arith.constant 0 : index
    %c0_16 = arith.constant 0 : index
    %c0_17 = arith.constant 0 : index
    %34 = vector.load %arg7[%c0_15, %c0_16, %c0_17] : memref<1x8x48xf32, #tpu.memory_space<vmem>>, vector<1x8x48xf32>
    %35 = vector.shape_cast %34 : vector<1x8x48xf32> to vector<8x48xf32>
    %36 = vector.shape_cast %33 : vector<8x48xf32> to vector<1x8x48xf32>
    tpu.vector_store %arg7[%c0_15, %c0_16, %c0_17], %36 {strides = array<i32>} : memref<1x8x48xf32, #tpu.memory_space<vmem>>, vector<1x8x48xf32>,
    return
  }
  func.func @transform_0(%arg0: i32, %arg1: i32) -> (i32, i32, i32) {
    %c0_i32 = arith.constant 0 : i32
    %c0_i32_0 = arith.constant 0 : i32
    %c0_i32_1 = arith.constant 0 : i32
    return %arg0, %c0_i32, %c0_i32_0 : i32, i32, i32
  }
  func.func @transform_1(%arg0: i32, %arg1: i32) -> (i32, i32) {
    %c0_i32 = arith.constant 0 : i32
    %c0_i32_0 = arith.constant 0 : i32
    %c0_i32_1 = arith.constant 0 : i32
    return %c0_i32, %c0_i32_0 : i32, i32
  }
  func.func @transform_2(%arg0: i32, %arg1: i32) -> (i32, i32) {
    %c0_i32 = arith.constant 0 : i32
    %c0_i32_0 = arith.constant 0 : i32
    %c0_i32_1 = arith.constant 0 : i32
    return %c0_i32, %c0_i32_0 : i32, i32
  }
  func.func @transform_3(%arg0: i32, %arg1: i32) -> (i32, i32) {
    %c0_i32 = arith.constant 0 : i32
    %c0_i32_0 = arith.constant 0 : i32
    return %c0_i32, %arg1 : i32, i32
  }
  func.func @transform_4(%arg0: i32, %arg1: i32) -> (i32, i32) {
    %c0_i32 = arith.constant 0 : i32
    %c0_i32_0 = arith.constant 0 : i32
    return %c0_i32, %arg1 : i32, i32
  }
  func.func @transform_5(%arg0: i32, %arg1: i32) -> (i32, i32, i32) {
    %c0_i32 = arith.constant 0 : i32
    %c0_i32_0 = arith.constant 0 : i32
    return %arg0, %c0_i32, %arg1 : i32, i32, i32
  }
}

</mosaic_0001>

<bundles_post_ra>
// kernel: tpu_custom_call.1
= control target key start
LH: loop header
LB: loop body
LE: loop exit
PB: predicated region body
PF: predicated region fallthrough
CT: control target
= control target key end

     0   :  { %7 = vsyncpa [#allocation3], 0  ;;  %s692_s0 = inlined_call_operand.hbm [shape: f32[8,128], index: 0, kind: input, shape index: {}]   ;;  %s693_s1 = inlined_call_operand.hbm [shape: f32[16,128], index: 1, kind: input, shape index: {}]   ;;  %s694_s2 = inlined_call_operand.hbm [shape: f32[16,128], index: 2, kind: output, shape index: {}]  }
   0x1   :  { %8 = vsyncpa [#allocation6], 0 }
   0x2   :  { %10 = vsyncpa [#allocation6 + $0x1], 0 }
   0x3   :  { %11 = vsyncpa [#allocation4], 0 }
   0x4   :  { %13 = vsyncpa [#allocation4 + $0x1], 0  ;;  %s491_s9 = smov 0   ;;  %s493_s10 = smov 0  }
   0x5   :  { %s495_s11 = smov 0   ;;  %s497_s12 = smov 0  }
   0x6 LB: > { %s512_s13 = sadd.s32 4294967295, %s471_s12   ;;  %s272_s14 = sadd.s32 4294967294, %s471_s12   ;;  %s471_s12 = sphi %s497_s12, %s718_s12   ;;  %s467_s11 = sphi %s495_s11, %s717_s11   ;;  %s463_s10 = sphi %s493_s10, %s716_s10   ;;  %s459_s9 = sphi %s491_s9, %s715_s9  }
   0x7   : > { %p60_p0 = scmp.ne.s32.totalorder %s463_s10, %s459_s9  ;;  %p695_p1 = scmp.eq.s32.totalorder %s512_s13, 0 }
   0x8   : > { %p90_p3 = scmp.eq.s32.totalorder %s272_s14, 1  ;;  %p273_p5 = scmp.ge.s32.totalorder %s471_s12, 1 }
   0x9   : > { %p521_p4 = por %p695_p1, %p60_p0  ;;  %p97_p7 = scmp.lt.s32.totalorder %s471_s12, 3 }
   0xa   : > { %p526_p6 = por %p90_p3, %p60_p0  ;;  %s473_s18 = smov [#allocation2]  }
   0xb   : > { %s698_s15 = scalar_select %p521_p4, 1, 0 }
   0xc   : > { %s699_s16 = scalar_select %p526_p6, 1, 0 }
   0xd   : > { %p531_p8 = pnand %p273_p5, %p97_p7  ;;  %s110_s19 = sshll.u32 %s473_s18, 4  ;;  %s111_s19 = int_to_ptr.vmem [resolvable:$true] %s110_s19 }
   0xe   : > { %s539_s20 = sadd.s32 1, %s471_s12   ;;  %s47_s24 = sadd.s32 1, %s467_s11 }
   0xf   : > { %s700_s17 = scalar_select %p531_p8, 1, 0 }
  0x10   : > { %p294_p10 = pneg %p531_p8  ;;  %s44_s22 = ssub.s32 %s471_s12, %s539_s20 }
  0x11   : > { %p549_p12 = scmp.eq.s32.totalorder %s44_s22, 0  ;;  %s343_s27 = scalar_lea.hbm %s692_s0, 128 }
  0x12   : > { %p543_p11 = pnand %p294_p10, %p695_p1  ;;  %p344_p0 = scmp.ne.s32.totalorder %s692_s0, %s343_s27 }
  0x13   : > { %s702_s23 = scalar_select %p549_p12, 1, 0 }
  0x14   : > { %p345_p3 = pneg %p543_p11  ;;  %p350_p10 = scmp.lt.u32.totalorder %s343_s27, %s692_s0 }
  0x16   : > { %p346_p5 = pnand %p345_p3, %p344_p0 }
  0x18   : > { %p347_p7 = pneg %p346_p5 }
  0x1a   : > { %p352_p9 = pnand %p350_p10, %p347_p7 }
  0x1c   : > { %355 = shalt.err (!%p352_p9)
}
  0x1d   : > { %s356_s4 = scalar_lea.vmem %s111_s19, 128  ;;  %p364_p6 = scmp.lt.s32.totalorder %s111_s19, %s111_s19 }
  0x1e   : > { %p357_p1 = scmp.ne.s32.totalorder %s111_s19, %s356_s4  ;;  %p365_p4 = scmp.lt.s32.totalorder %s356_s4, %s356_s4 }
  0x20   : > { %p359_p2 = pnand %p357_p1, %p345_p3  ;;  %p366_p8 = por %p365_p4, %p364_p6 }
  0x22   : > { %p360_p13 = pneg %p359_p2 }
  0x24   : > { %p367_p12 = pnand %p366_p8, %p360_p13 }
  0x26   : > { %370 = shalt.err (!%p367_p12)
}
  0x27   : > { %297 = dma.hbm_to_vmem [thread:$0]  (!%p543_p11), %s692_s0, 128, %s111_s19, [#allocation3]  }
  0x28   : > { %p703_p1 = scmp.ne.s32.totalorder %s702_s23, 0  ;;  %p55_p2 = scmp.eq.s32.totalorder %s471_s12, 0 }
  0x29   : > { %p704_p4 = scmp.ne.s32.totalorder %s467_s11, %s463_s10  ;;  %p705_p6 = scmp.eq.s32.totalorder %s512_s13, 1 }
  0x2a   : > { %s575_s7 = scalar_select %p703_p1, %s467_s11, %s47_s24  }
  0x2b   : > { %p583_p8 = por %p705_p6, %p704_p4  ;;  %p307_p9 = scmp.lt.s32.totalorder %s471_s12, 2 }
  0x2c   : > { %s121_s14 = sand.u32 1, %s467_s11   ;;  %p707_p12 = pmov %p704_p4 }
  0x2d   : > { %s276_s18 = sshll.u32 %s121_s14, 3  ;;  %s277_s21 = sshll.u32 %s471_s12, 7 }
  0x2e   : > { %p56_p13 = por %p55_p2, %p707_p12  ;;  %s596_s19 = scalar_lea.hbm %s693_s1, %s277_s21 }
  0x2f   : > { %s125_s23 = scalar_lea.vmem [#allocation5], %s276_s18  ;;  %s122_s27 = scalar_lea.sflag [#allocation6], %s121_s14 }
  0x30   : > { %s132_s24 = sshll.u32 %s125_s23, 4  ;;  %p598_p11 = pnand %p307_p9, %p56_p13  ;;  %s602_s24 = int_to_ptr.vmem [resolvable:$true] %s132_s24 }
  0x31   : > { %s371_s28 = scalar_lea.hbm %s596_s19, 128  ;;  %s376_s3 = scalar_lea.hbm %s693_s1, 256 }
  0x32   : > { %p372_p0 = scmp.ne.s32.totalorder %s596_s19, %s371_s28  ;;  %p373_p3 = pneg %p598_p11 }
  0x33   : > { %p377_p10 = scmp.lt.u32.totalorder %s596_s19, %s693_s1  ;;  %p378_p1 = scmp.lt.u32.totalorder %s376_s3, %s371_s28 }
  0x34   : > { %p374_p5 = pnand %p373_p3, %p372_p0  ;;  %p380_p4 = scmp.lt.u32.totalorder %s371_s28, %s596_s19 }
  0x35   : > { %p379_p2 = por %p378_p1, %p377_p10 }
  0x36   : > { %p375_p7 = pneg %p374_p5 }
  0x37   : > { %p381_p6 = por %p380_p4, %p379_p2 }
  0x39   : > { %p382_p9 = pnand %p381_p6, %p375_p7 }
  0x3b   : > { %385 = shalt.err (!%p382_p9)
}
  0x3c   : > { %s386_s6 = scalar_lea.vmem %s602_s24, 128  ;;  %s474_s14 = smov [#allocation5]  }
  0x3d   : > { %p387_p12 = scmp.ne.s32.totalorder %s602_s24, %s386_s6  ;;  %s391_s18 = sshll.u32 %s474_s14, 4  ;;  %s392_s18 = int_to_ptr.vmem [resolvable:$false] %s391_s18 }
  0x3e   : > { %s393_s21 = scalar_lea.vmem %s392_s18, 256  ;;  %p394_p5 = scmp.lt.s32.totalorder %s602_s24, %s392_s18 }
  0x3f   : > { %p389_p13 = pnand %p387_p12, %p373_p3  ;;  %p395_p10 = scmp.lt.s32.totalorder %s393_s21, %s386_s6 }
  0x41   : > { %p390_p0 = pneg %p389_p13  ;;  %p396_p1 = por %p395_p10, %p394_p5 }
  0x43   : > { %p397_p2 = pnand %p396_p1, %p390_p0 }
  0x45   : > { %400 = shalt.err (!%p397_p2)
}
  0x46   : > { %301 = dma.hbm_to_vmem [thread:$0]  (!%p598_p11), %s596_s19, 128, %s602_s24, %s122_s27  }
  0x47   : > { %p709_p7 = scmp.ne.s32.totalorder %s700_s17, 0 }
  0x48   : > { %p710_p3 = scmp.eq.s32.totalorder (!%p709_p7), %s512_s13, 0 }
  0x49   : > { %141 = sbr.rel (%p709_p7) target bundleno = 110 (0x6e), region = 28 }
  0x50   : > { %446 = dma.done.wait (%p710_p3), [#allocation3], 128   ;;  %p711_p4 = pmov %p710_p3 }
  0x51   : > { %s636_s22 = sand.u32 1, %s463_s10   ;;  %p712_p6 = scmp.ne.s32.totalorder %s698_s15, 0 }
  0x52   : > { %448 = vsyncadd (%p711_p4), [#allocation3], 4294967168  ;;  %s280_s25 = sshll.u32 %s636_s22, 3  ;;  %s148_s23 = scalar_lea.sflag [#allocation6], %s636_s22 }
  0x53   : > { %s151_s26 = scalar_lea.vmem [#allocation5], %s280_s25 }
  0x54   : > { %450 = dma.done.wait (%p712_p6), %s148_s23, 128  }
  0x55   : > { %452 = vsyncadd (%p712_p6), %s148_s23, 4294967168  ;;  %s171_s17 = scalar_lea.vmem [#allocation7], %s280_s25  ;;  %s283_s24 = sshll.u32 %s512_s13, 7  ;;  %v172_v0 = vld [vmem:[%s151_s26] sm:$0xff]  ;;  %v173_v1 = vld [vmem:[#allocation2] sm:$0xff] }
  0x56   : > { %s190_s19 = sshll.u32 %s171_s17, 4  ;;  %v174_v2 = vadd.f32 %v173_v1, %v172_v0  ;;  %s650_s29 = scalar_lea.hbm %s694_s2, %s283_s24  ;;  %s645_s19 = int_to_ptr.vmem [resolvable:$true] %s190_s19 }
  0x57   : > { %s177_s15 = scalar_lea.sflag [#allocation4], %s636_s22  ;;  %s401_s30 = scalar_lea.vmem %s645_s19, 128 }
  0x58   : > { %175 = vst [vmem:[%s171_s17] sm:$0xff] %v174_v2  ;;  %p402_p11 = scmp.ne.s32.totalorder %s645_s19, %s401_s30  ;;  %s475_s13 = smov [#allocation7]  }
  0x59   : > { %s405_s3 = sshll.u32 %s475_s13, 4  ;;  %s406_s3 = int_to_ptr.vmem [resolvable:$false] %s405_s3 }
  0x5a   : > { %p403_p9 = pnand %p402_p11, %p583_p8  ;;  %s407_s4 = scalar_lea.vmem %s406_s3, 256 }
  0x5b   : > { %p408_p13 = scmp.lt.s32.totalorder %s645_s19, %s406_s3  ;;  %p409_p0 = scmp.lt.s32.totalorder %s407_s4, %s401_s30 }
  0x5c   : > { %p404_p12 = pneg %p403_p9 }
  0x5d   : > { %p410_p5 = por %p409_p0, %p408_p13 }
  0x5f   : > { %p411_p10 = pnand %p410_p5, %p404_p12 }
  0x61   : > { %414 = shalt.err (!%p411_p10)
}
  0x62   : > { %s415_s5 = scalar_lea.hbm %s650_s29, 128  ;;  %s419_s18 = scalar_lea.hbm %s694_s2, 256 }
  0x63   : > { %p416_p1 = scmp.ne.s32.totalorder %s650_s29, %s415_s5  ;;  %p420_p3 = scmp.lt.u32.totalorder %s650_s29, %s694_s2 }
  0x64   : > { %p421_p4 = scmp.lt.u32.totalorder %s419_s18, %s415_s5  ;;  %p423_p11 = scmp.lt.u32.totalorder %s415_s5, %s650_s29 }
  0x65   : > { %p417_p2 = pnand %p416_p1, %p583_p8 }
  0x66   : > { %p422_p6 = por %p421_p4, %p420_p3 }
  0x67   : > { %p418_p7 = pneg %p417_p2 }
  0x68   : > { %p424_p9 = por %p423_p11, %p422_p6 }
  0x6a   : > { %p425_p12 = pnand %p424_p9, %p418_p7 }
  0x6c   : > { %428 = shalt.err (!%p425_p12)
}
  0x6d   : > { %292 = dma.vmem_to_hbm [thread:$0]  (%p583_p8), %s645_s19, 128, %s650_s29, %s177_s15  }
  0x6e PF: > { %s202_s25 = sand.u32 1, %s459_s9   ;;  %p713_p13 = scmp.ne.s32.totalorder %s699_s16, 0 }
  0x6f   : > { %p714_p0 = scmp.ge.s32.totalorder %s471_s12, 2  ;;  %s203_s23 = scalar_lea.sflag [#allocation4], %s202_s25 }
  0x71   : > { %p303_p5 = pnand %p714_p0, %p713_p13 }
  0x73   : > { %454 = dma.done.wait (!%p303_p5), %s203_s23, 128  }
  0x74   : > { %456 = vsyncadd (!%p303_p5), %s203_s23, 4294967168  ;;  %p16_p10 = scmp.ge.s32.totalorder %s539_s20, 4   ;;  %s715_s9 = smov %s463_s10 }
  0x75   : > { %s716_s10 = smov %s467_s11  ;;  %s717_s11 = smov %s575_s7 }
  0x76   : > { %s718_s12 = smov %s539_s20  ;;  %18 = sbr.rel (!%p16_p10) target bundleno = 6 (0x6), region = 78 }
  0x7d   :  { %208 = vsyncpa [#allocation3], 1 }
  0x7e   :  { %210 = vsyncpa [#allocation3 + $0x1], 1 }
  0x7f   :  { %211 = vsyncpa [#allocation6], 1 }
  0x80   :  { %213 = vsyncpa [#allocation6 + $0x1], 1 }
  0x81   :  { %214 = vsyncpa [#allocation4], 1 }
  0x82   :  { %216 = vsyncpa [#allocation4 + $0x1], 1 }

// kernel: transformer_forward.15
= control target key start
LH: loop header
LB: loop body
LE: loop exit
PB: predicated region body
PF: predicated region fallthrough
CT: control target
= control target key end

     0   :  { %s2045_s0 = inlined_call_operand.vmem [shape: s32[2], index: 0, kind: input, shape index: {}]   ;;  %s2046_s1 = inlined_call_operand.vmem [shape: f32[2,8,32], index: 1, kind: input, shape index: {}]   ;;  %s2047_s2 = inlined_call_operand.vmem [shape: f32[1,32], index: 2, kind: input, shape index: {}]   ;;  %s2048_s3 = inlined_call_operand.vmem [shape: f32[1,32], index: 3, kind: input, shape index: {}]   ;;  %s2049_s4 = inlined_call_operand.vmem [shape: bf16[32,96], index: 4, kind: input, shape index: {}]   ;;  %s2050_s5 = inlined_call_operand.vmem [shape: f32[1,96], index: 5, kind: input, shape index: {}]   ;;  %s2051_s6 = inlined_call_operand.vmem [shape: bf16[32,32], index: 6, kind: input, shape index: {}]   ;;  %s2052_s7 = inlined_call_operand.vmem [shape: f32[1,32], index: 7, kind: input, shape index: {}]   ;;  %s2053_s8 = inlined_call_operand.vmem [shape: f32[2,8,32], index: 8, kind: output, shape index: {}]  }
   0x1   :  { %s13_s29 = sshll.u32 %s2045_s0, 4  ;;  %s14_s29 = int_to_ptr.vmem [resolvable:$true] %s13_s29 }
   0x2   :  { %s1712_s30 = scalar_lea.vmem %s14_s29, 16  ;;  %p1717_p1 = scmp.lt.s32.totalorder %s14_s29, %s14_s29 }
   0x3   :  { %p1713_p0 = scmp.ne.s32.totalorder %s14_s29, %s1712_s30  ;;  %p1718_p2 = scmp.lt.s32.totalorder %s1712_s30, %s1712_s30 }
   0x5   :  { %p1719_p3 = por %p1718_p2, %p1717_p1 }
   0x7   :  { %p1720_p4 = pnand %p1719_p3, %p1713_p0 }
   0x9   :  { %1723 = shalt.err (!%p1720_p4)  }
   0xa   :  { %s1734_s9 = smov [#allocation3]  }
   0xb   :  { %16 = dma.vmem_to_smem %s14_s29, 16, %s1734_s9, [#allocation2] }
   0xc   :  { %1728 = dma.done.wait [#allocation2], 16 }
   0xd   :  { %1729 = vsyncadd [#allocation2], 4294967280 }
   0xe   :  { %18 = sfence }
   0xf   :  { %s1795_s10 = smov 0  }
  0x10 LB: > { %s1801_s0 = sadd.s32 4294967295, %s1732_s10   ;;  %p1552_p5 = scmp.ge.s32.totalorder %s1732_s10, 1  ;;  %s1732_s10 = sphi %s1795_s10, %s24_s10  }
  0x11   : > { %p243_p6 = scmp.lt.s32.totalorder %s1732_s10, 3 }
  0x13   : > { %p244_p7 = pnand %p1552_p5, %p243_p6 }
  0x14   : > { %p273_p8 = scmp.lt.s32.totalorder (!%p244_p7), %s1801_s0, 1  ;;  %vm285_vm0 = vcmask (!%p244_p7), 261120   ;;  %v1690_v7 = vld [vmem:[%s2049_s4] sm:$0xff] (!%p244_p7)   ;;  %v1735_v8 = vmov (!%p244_p7), 0.0   ;;  %vm1736_vm1 = vmmov (!%p244_p7), 0   ;;  %v1691_v9 = vld [vmem:[%s2049_s4 + $0x8] sm:$0xff] (!%p244_p7)   ;;  %v382_v29 = vlaneseq (!%p244_p7) }
  0x15   : > { %247 = sbr.rel (%p244_p7) target bundleno = 1985 (0x7c1), region = 48  ;;  %1605 = vmatprep.subr.bf16.mxu0 (!%p244_p7), %v1735_v8  ;;  %1609 = vmatprep.mubr.msk.bf16.mxu0 (!%p244_p7), %vm1736_vm1, %v1735_v8  ;;  %v1555_v14 = vld [vmem:[%s2047_s2] ss:$0 sm:$0xff] (!%p244_p7)  ;;  %s1737_s26 = smov (!%p244_p7), 104   ;;  %v1741_v30 = vmov (!%p244_p7), 1983009808  }
  0x16   : > { %1606 = vmatpush3.bf16.msra.mxu0 (!%p244_p7), %v1690_v7  ;;  %1613 = vmatprep.subr.bf16.mxu1 (!%p244_p7), %v1735_v8  ;;  %v1556_v16 = vld [vmem:[%s2048_s3] ss:$0 sm:$0xff] (!%p244_p7)  ;;  %s1738_s27 = smov (!%p244_p7), 120   ;;  %s1739_s28 = smov (!%p244_p7), 112   ;;  %v403_v31 = vunpack.c.l.s4 (!%p244_p7), %v1741_v30  ;;  %v1863_v32 = vshrl.u32 (!%p244_p7), %v382_v29, 7  ;;  %vm844_vm2 = vcmask (!%p244_p7), 64512  }
  0x17   : > { %1607 = vmatprep.subr.bf16.mxu0 (!%p244_p7), %v1735_v8  ;;  %1615 = vmatprep.mubr.msk.bf16.mxu1 (!%p244_p7), %vm1736_vm1, %v1735_v8  ;;  %v1557_v20 = vld [vmem:[%s2050_s5] ss:$0 sm:$0xff] (!%p244_p7)  ;;  %s1740_s29 = smov (!%p244_p7), 96   ;;  %v1742_v35 = vmov (!%p244_p7), 1934713408   ;;  %s381_s30 = sld [smem:[#allocation3 + %s1801_s0]] (!%p244_p7) }
  0x18   : > { %v404_v33 = vunpack.c.0.s8 (!%p244_p7), %v403_v31  ;;  %v435_v36 = vunpack.c.l.s4 (!%p244_p7), %v1742_v35  ;;  %s1743_s9 = smov (!%p244_p7), 64   ;;  %vm1090_vm6 = vcmask (!%p244_p7), 1043456   ;;  %s1744_s16 = smov (!%p244_p7), 16   ;;  %vm1421_vm7 = vcmask (!%p244_p7), 130048  }
  0x19   : > { %s1745_s17 = smov (!%p244_p7), 8   ;;  %s1746_s18 = smov (!%p244_p7), 24   ;;  %vm1423_vm8 = vcmask (!%p244_p7), 195584  }
  0x1a   : > { %1608 = vmatpush3.bf16.msra.mxu0 (!%p244_p7), %v1691_v9  ;;  %v1870_v39 = vsub.s32 (!%p244_p7), %v404_v33, %v1863_v32  ;;  %v436_v43 = vunpack.c.0.s8 (!%p244_p7), %v435_v36 }
  0x1b   : > { %1619 = vmatprep.subr.bf16.mxu0 (!%p244_p7), %v1735_v8 }
  0x1c   : > { %s1807_s11 = scalar_select %p273_p8, %s1801_s0, 1  ;;  %v1881_v49 = vsub.s32 %v436_v43, %v1863_v32 }
  0x1e   : > { %s1553_s12 = sshll.u32 %s1807_s11, 3 }
  0x1f   : > { %s276_s15 = scalar_lea.vmem %s2046_s1, %s1553_s12  ;;  %s280_s23 = scalar_lea.vmem %s2053_s8, %s1553_s12 }
  0x20   : > { %v1815_v0 = vld [vmem:[%s276_s15] sm:$0xff] }
  0x21   : > { %v286_v1 = vsel %vm285_vm0, %v1815_v0, 0.0 }
  0x22   : > { %287 = vadd.xlane.f32.xlu0 %v286_v1 }
  0xaf   : > { %v288_v2 = vpop.xlane.xlu0 %287 }
  0xb0   : > { %v290_v3 = vmul.f32 0.03125, %v288_v2 }
  0xb2   : > { %v291_v4 = vsub.f32 %v1815_v0, %v290_v3 }
  0xb4   : > { %v292_v5 = vmul.f32 %v291_v4, %v291_v4 }
  0xb6   : > { %v293_v6 = vsel %vm285_vm0, %v292_v5, 0.0 }
  0xb7   : > { %294 = vadd.xlane.f32.xlu0 %v293_v6 }
 0x144   : > { %v295_v10 = vpop.xlane.xlu0 %294 }
 0x145   : > { %v296_v11 = vmul.f32 0.03125, %v295_v10 }
 0x147   : > { %v297_v12 = vadd.f32 1e-05, %v296_v11 }
 0x149   : > { %1694 = vrsqrt.f32 %v297_v12 }
 0x153   : > { %v1695_v13 = vpop.eup %1694 }
 0x154   : > { %v299_v15 = vmul.f32 %v1695_v13, %v291_v4 }
 0x156   : > { %v306_v17 = vmul.f32 %v1555_v14, %v299_v15 }
 0x158   : > { %v313_v18 = vadd.f32 %v1556_v16, %v306_v17 }
 0x15a   : > { %v314_v19 = vpack.c.bf16 %v313_v18, %v313_v18 }
 0x15c   : > { %1610 = vmatmul.mubr.msk.bf16.vlgmr.msra.gmra.mrb[0].mxu0 %vm285_vm0, %v314_v19 }
 0x15d   : > { %1621 = vmatprep.mubr.msk.bf16.mxu0 %vm1736_vm1, %v1735_v8 }
 0x22f   : > { %v375_v21 = vpop.f32.mrb[0].mxu0 }
 0x230   : > { %v1847_v22 = vadd.f32 %v1557_v20, %v375_v21  ;;  %v1611_v23 = vpop.f32.mrb[1].mxu0 }
 0x231   : > { %v378_v24 = vpop.f32.mrb[2].mxu0 }
 0x232   : > { %397 = vrot.lane.b32.xlu0 %v1847_v22, %s1737_s26  ;;  %391 = vrot.lane.b32.xlu1 %v1847_v22, %s1738_s27  ;;  %v1612_v25 = vpop.f32.mrb[3].mxu0 }
 0x236   : > { %394 = vrot.lane.b32.xlu1 %v1847_v22, %s1739_s28 }
 0x23a   : > { %540 = vrot.lane.b32.xlu1 %v1847_v22, %s1740_s29 }
 0x2a4   : > { %v1853_v26 = vpop.permute.xlu1 %391  ;;  %v1859_v28 = vpop.permute.xlu0 %397 }
 0x2a5   : > { %542 = vrot.lane.b32.xlu1 %v1853_v26, %s1740_s29  ;;  %v416_v40 = vcombine.low %v1853_v26, %v1859_v28  ;;  %v417_v41 = vcombine.high %v1853_v26, %v1859_v28 }
 0x2a7   : > { %v424_v46 = vrot.slane %v416_v40, %v1870_v39  ;;  %v431_v47 = vrot.slane %v417_v41, %v1870_v39 }
 0x2a8   : > { %v1856_v27 = vpop.permute.xlu1 %394 }
 0x2a9   : > { %544 = vrot.lane.b32.xlu1 %v1856_v27, %s1740_s29  ;;  %v400_v37 = vcombine.low %v1847_v22, %v1856_v27  ;;  %v401_v38 = vcombine.high %v1847_v22, %v1856_v27 }
 0x2ab   : > { %v408_v44 = vrot.slane %v400_v37, %v1870_v39  ;;  %v415_v45 = vrot.slane %v401_v38, %v1870_v39 }
 0x2ac   : > { %v541_v34 = vpop.permute.xlu1 %540 }
 0x2ad   : > { %546 = vrot.lane.b32.xlu1 %v1859_v28, %s1740_s29  ;;  %v432_v50 = vcombine.low %v408_v44, %v424_v46  ;;  %v433_v51 = vcombine.high %v408_v44, %v424_v46  ;;  %v448_v52 = vcombine.low %v415_v45, %v431_v47  ;;  %v449_v53 = vcombine.high %v415_v45, %v431_v47 }
 0x2af   : > { %v440_v59 = vrot.slane %v432_v50, %v1881_v49  ;;  %v447_v60 = vrot.slane %v433_v51, %v1881_v49  ;;  %v456_v61 = vrot.slane %v448_v52, %v1881_v49  ;;  %v463_v62 = vrot.slane %v449_v53, %v1881_v49 }
 0x2b1   : > { %v468_v9 = vcombine.low %v440_v59, %v447_v60  ;;  %v1561_v10 = vcombine.high %v440_v59, %v447_v60  ;;  %v484_v11 = vcombine.low %v456_v61, %v463_v62  ;;  %v1562_v12 = vcombine.high %v456_v61, %v463_v62 }
 0x2b3   : > { %v475_v21 = vrot.slane %v468_v9, %v1870_v39  ;;  %v483_v23 = vrot.slane %v1561_v10, %v1870_v39  ;;  %v491_v24 = vrot.slane %v484_v11, %v1870_v39  ;;  %v499_v25 = vrot.slane %v1562_v12, %v1870_v39 }
 0x2b4   : > { %v383_v11 = vand.u32 127, %v382_v29  ;;  %v384_v12 = vstv %s381_s30 }
 0x2b5   : > { %v516_v43 = vcombine.low %v491_v24, %v499_v25 }
 0x2b6   : > { %vm385_vm3 = vcmp.ge.s32.totalorder %v383_v11, %v384_v12  ;;  %vm388_vm4 = vcmp.gt.s32.totalorder %v383_v11, %v1863_v32 }
 0x2b7   : > { %v524_v52 = vrot.slane %v516_v43, %v1881_v49  ;;  %vm1934_vm5 = vmor %vm385_vm3, %vm388_vm4 }
 0x317   : > { %v543_v42 = vpop.permute.xlu1 %542 }
 0x31b   : > { %v545_v48 = vpop.permute.xlu1 %544 }
 0x31c   : > { %v552_v54 = vcombine.low %v541_v34, %v545_v48  ;;  %v553_v55 = vcombine.high %v541_v34, %v545_v48 }
 0x31e   : > { %v560_v63 = vrot.slane %v552_v54, %v1870_v39  ;;  %v567_v1 = vrot.slane %v553_v55, %v1870_v39 }
 0x31f   : > { %v547_v56 = vpop.permute.xlu1 %546 }
 0x320   : > { %v568_v57 = vcombine.low %v543_v42, %v547_v56  ;;  %v569_v58 = vcombine.high %v543_v42, %v547_v56  ;;  %v500_v42 = vcombine.low %v475_v21, %v483_v23 }
 0x322   : > { %v576_v2 = vrot.slane %v568_v57, %v1870_v39  ;;  %v583_v3 = vrot.slane %v569_v58, %v1870_v39  ;;  %v508_v51 = vrot.slane %v500_v42, %v1881_v49  ;;  %v501_v57 = vcombine.high %v475_v21, %v483_v23 }
 0x323   : > { %v517_v58 = vcombine.high %v491_v24, %v499_v25 }
 0x324   : > { %v584_v4 = vcombine.low %v560_v63, %v576_v2  ;;  %v585_v5 = vcombine.high %v560_v63, %v576_v2  ;;  %v600_v6 = vcombine.low %v567_v1, %v583_v3  ;;  %v601_v7 = vcombine.high %v567_v1, %v583_v3 }
 0x325   : > { %v532_v59 = vcombine.low %v508_v51, %v524_v52  ;;  %v533_v60 = vcombine.high %v508_v51, %v524_v52  ;;  %v515_v2 = vrot.slane %v501_v57, %v1881_v49  ;;  %v531_v3 = vrot.slane %v517_v58, %v1881_v49 }
 0x326   : > { %v592_v13 = vrot.slane %v584_v4, %v1881_v49  ;;  %v599_v14 = vrot.slane %v585_v5, %v1881_v49  ;;  %v608_v15 = vrot.slane %v600_v6, %v1881_v49  ;;  %v615_v16 = vrot.slane %v601_v7, %v1881_v49 }
 0x327   : > { %v536_v63 = vpack.c.bf16 %v532_v59, %v532_v59  ;;  %v537_v1 = vpack.c.bf16 %v533_v60, %v533_v60  ;;  %v534_v6 = vcombine.low %v515_v2, %v531_v3  ;;  %v535_v7 = vcombine.high %v515_v2, %v531_v3 }
 0x328   : > { %v620_v17 = vcombine.low %v592_v13, %v599_v14  ;;  %v1563_v18 = vcombine.high %v592_v13, %v599_v14  ;;  %v636_v19 = vcombine.low %v608_v15, %v615_v16  ;;  %v1564_v20 = vcombine.high %v608_v15, %v615_v16 }
 0x329   : > { %v538_v9 = vpack.c.bf16 %v534_v6, %v534_v6  ;;  %v539_v10 = vpack.c.bf16 %v535_v7, %v535_v7 }
 0x32a   : > { %v627_v30 = vrot.slane %v620_v17, %v1870_v39  ;;  %v635_v31 = vrot.slane %v1563_v18, %v1870_v39  ;;  %v643_v33 = vrot.slane %v636_v19, %v1870_v39  ;;  %v651_v34 = vrot.slane %v1564_v20, %v1870_v39 }
 0x32c   : > { %v652_v35 = vcombine.low %v627_v30, %v635_v31  ;;  %v668_v36 = vcombine.low %v643_v33, %v651_v34  ;;  %v653_v37 = vcombine.high %v627_v30, %v635_v31  ;;  %v669_v38 = vcombine.high %v643_v33, %v651_v34 }
 0x32e   : > { %v660_v40 = vrot.slane %v652_v35, %v1881_v49  ;;  %v676_v41 = vrot.slane %v668_v36, %v1881_v49  ;;  %v667_v46 = vrot.slane %v653_v37, %v1881_v49  ;;  %v683_v47 = vrot.slane %v669_v38, %v1881_v49 }
 0x330   : > { %v684_v44 = vcombine.low %v660_v40, %v676_v41  ;;  %v685_v45 = vcombine.high %v660_v40, %v676_v41  ;;  %v686_v55 = vcombine.low %v667_v46, %v683_v47  ;;  %v687_v56 = vcombine.high %v667_v46, %v683_v47 }
 0x332   : > { %v688_v48 = vpack.c.bf16 %v684_v44, %v684_v44  ;;  %v689_v50 = vpack.c.bf16 %v685_v45, %v685_v45  ;;  %v690_v61 = vpack.c.bf16 %v686_v55, %v686_v55  ;;  %v691_v62 = vpack.c.bf16 %v687_v56, %v687_v56 }
 0x334   : > { %v849_v53 = vsel %vm844_vm2, %v688_v48, 0  ;;  %v895_v54 = vsel %vm844_vm2, %v689_v50, 0  ;;  %v941_v4 = vsel %vm844_vm2, %v690_v61, 0  ;;  %v987_v5 = vsel %vm844_vm2, %v691_v62, 0 }
 0x335   : > { %1614 = vmatpush3.bf16.xpose.msra.mxu1 %v849_v53  ;;  %1620 = vmatpush3.bf16.xpose.msra.mxu0 %v895_v54 }
 0x336   : > { %1625 = vmatprep.subr.bf16.mxu1 %v1735_v8  ;;  %1631 = vmatprep.subr.bf16.mxu0 %v1735_v8 }
 0x33c   : > { %1616 = vmatmul.mubr.msk.bf16.vlgmr.msra.gmra.mrb[0].mxu1 %vm844_vm2, %v536_v63  ;;  %1622 = vmatmul.mubr.msk.bf16.vlgmr.msra.gmra.mrb[4].mxu0 %vm844_vm2, %v537_v1 }
 0x33d   : > { %1626 = vmatpush3.bf16.xpose.msra.mxu1 %v941_v4  ;;  %1632 = vmatpush3.bf16.xpose.msra.mxu0 %v987_v5 }
 0x33e   : > { %1627 = vmatprep.mubr.msk.bf16.mxu1 %vm1736_vm1, %v1735_v8  ;;  %1633 = vmatprep.mubr.msk.bf16.mxu0 %vm1736_vm1, %v1735_v8 }
 0x33f   : > { %1637 = vmatprep.subr.bf16.mxu1 %v1735_v8  ;;  %1643 = vmatprep.subr.bf16.mxu0 %v1735_v8 }
 0x344   : > { %1628 = vmatmul.mubr.msk.bf16.vlgmr.msra.gmra.mrb[4].mxu1 %vm844_vm2, %v538_v9  ;;  %1634 = vmatmul.mubr.msk.bf16.vlgmr.msra.gmra.mrb[8].mxu0 %vm844_vm2, %v539_v10 }
 0x345   : > { %1639 = vmatprep.mubr.msk.bf16.mxu1 %vm1736_vm1, %v1735_v8  ;;  %1645 = vmatprep.mubr.msk.bf16.mxu0 %vm1736_vm1, %v1735_v8 }
 0x40f   : > { %v885_v13 = vpop.f32.mrb[0].mxu1  ;;  %v931_v14 = vpop.f32.mrb[4].mxu0 }
 0x410   : > { %v1029_v16 = vmul.f32 0.35355338, %v885_v13  ;;  %v1030_v17 = vmul.f32 0.35355338, %v931_v14  ;;  %v1617_v18 = vpop.f32.mrb[1].mxu1  ;;  %v1623_v19 = vpop.f32.mrb[5].mxu0 }
 0x411   : > { %v888_v20 = vpop.f32.mrb[2].mxu1  ;;  %v934_v21 = vpop.f32.mrb[6].mxu0 }
 0x412   : > { %v1618_v23 = vpop.f32.mrb[3].mxu1  ;;  %v1624_v24 = vpop.f32.mrb[7].mxu0  ;;  %v1035_v29 = vsel %vm1934_vm5, -1e+09, %v1029_v16  ;;  %v1036_v32 = vsel %vm1934_vm5, -1e+09, %v1030_v17 }
 0x413   : > { %v1039_v25 = vsel %vm844_vm2, %v1035_v29, -inf  ;;  %v1042_v30 = vsel %vm844_vm2, %v1036_v32, -inf }
 0x414   : > { %1040 = vmax.xlane.f32.xlu1 %v1039_v25  ;;  %1043 = vmax.xlane.f32.xlu0 %v1042_v30 }
 0x417   : > { %v977_v31 = vpop.f32.mrb[4].mxu1  ;;  %v1023_v33 = vpop.f32.mrb[8].mxu0 }
 0x418   : > { %v1031_v34 = vmul.f32 0.35355338, %v977_v31  ;;  %v1032_v35 = vmul.f32 0.35355338, %v1023_v33  ;;  %v1629_v36 = vpop.f32.mrb[5].mxu1  ;;  %v1635_v37 = vpop.f32.mrb[9].mxu0 }
 0x419   : > { %v980_v38 = vpop.f32.mrb[6].mxu1  ;;  %v1026_v40 = vpop.f32.mrb[10].mxu0 }
 0x41a   : > { %v1630_v41 = vpop.f32.mrb[7].mxu1  ;;  %v1636_v42 = vpop.f32.mrb[11].mxu0  ;;  %v1037_v43 = vsel %vm1934_vm5, -1e+09, %v1031_v34  ;;  %v1038_v44 = vsel %vm1934_vm5, -1e+09, %v1032_v35 }
 0x41b   : > { %v1045_v45 = vsel %vm844_vm2, %v1037_v43, -inf  ;;  %v1048_v46 = vsel %vm844_vm2, %v1038_v44, -inf }
 0x41c   : > { %1046 = vmax.xlane.f32.xlu1 %v1045_v45  ;;  %1049 = vmax.xlane.f32.xlu0 %v1048_v46 }
 0x42d   : > { %692 = vrot.lane.b32.xlu1 %v1847_v22, %s1743_s9 }
 0x4a1   : > { %v1041_v47 = vpop.xlane.xlu1 %1040  ;;  %v1044_v48 = vpop.xlane.xlu0 %1043 }
 0x4a2   : > { %v1051_v50 = vsub.f32 %v1035_v29, %v1041_v47  ;;  %v1052_v51 = vsub.f32 %v1036_v32, %v1044_v48 }
 0x4a4   : > { %v1055_v52 = vmul.f32 1.442695, %v1051_v50  ;;  %v1057_v53 = vmul.f32 1.442695, %v1052_v51 }
 0x4a6   : > { %1696 = vpow2.f32 %v1055_v52 }
 0x4a7   : > { %1698 = vpow2.f32 %v1057_v53 }
 0x4a9   : > { %v1047_v22 = vpop.xlane.xlu1 %1046  ;;  %v1050_v59 = vpop.xlane.xlu0 %1049 }
 0x4aa   : > { %v1053_v58 = vsub.f32 %v1037_v43, %v1047_v22  ;;  %v1054_v60 = vsub.f32 %v1038_v44, %v1050_v59 }
 0x4ac   : > { %v1059_v61 = vmul.f32 1.442695, %v1053_v58  ;;  %v1061_v62 = vmul.f32 1.442695, %v1054_v60 }
 0x4ae   : > { %1700 = vpow2.f32 %v1059_v61 }
 0x4af   : > { %1702 = vpow2.f32 %v1061_v62 }
 0x4b0   : > { %v1951_v54 = vpop.eup %1696 }
 0x4b1   : > { %v1953_v55 = vpop.eup %1698  ;;  %v1063_v56 = vsel %vm844_vm2, %v1951_v54, 0.0 }
 0x4b2   : > { %1064 = vadd.xlane.f32.xlu1 %v1063_v56  ;;  %v1066_v57 = vsel %vm844_vm2, %v1953_v55, 0.0 }
 0x4b3   : > { %1067 = vadd.xlane.f32.xlu0 %v1066_v57 }
 0x4b8   : > { %v1962_v63 = vpop.eup %1700 }
 0x4b9   : > { %v1964_v1 = vpop.eup %1702  ;;  %v1069_v2 = vsel %vm844_vm2, %v1962_v63, 0.0 }
 0x4c3   : > { %696 = vrot.lane.b32.xlu1 %v1856_v27, %s1743_s9  ;;  %v1072_v27 = vsel %vm844_vm2, %v1964_v1, 0.0 }
 0x4c7   : > { %698 = vrot.lane.b32.xlu1 %v1859_v28, %s1743_s9 }
 0x4c9   : > { %694 = vrot.lane.b32.xlu0 %v1853_v26, %s1743_s9  ;;  %v693_v26 = vpop.permute.xlu1 %692 }
 0x4e8   : > { %1070 = vadd.xlane.f32.xlu0 %v1069_v2 }
 0x4eb   : > { %1073 = vadd.xlane.f32.xlu1 %v1072_v27 }
 0x53f   : > { %v1065_v28 = vpop.xlane.xlu1 %1064 }
 0x540   : > { %v1068_v3 = vpop.xlane.xlu0 %1067  ;;  %1704 = vrcp.f32 %v1065_v28 }
 0x541   : > { %1706 = vrcp.f32 %v1068_v3 }
 0x543   : > { %v697_v4 = vpop.permute.xlu1 %696 }
 0x544   : > { %v704_v5 = vcombine.low %v693_v26, %v697_v4  ;;  %v705_v6 = vcombine.high %v693_v26, %v697_v4  ;;  %v695_v7 = vpop.permute.xlu0 %694 }
 0x546   : > { %v712_v12 = vrot.slane %v704_v5, %v1870_v39  ;;  %v719_v13 = vrot.slane %v705_v6, %v1870_v39 }
 0x547   : > { %v699_v9 = vpop.permute.xlu1 %698 }
 0x548   : > { %v720_v10 = vcombine.low %v695_v7, %v699_v9  ;;  %v721_v11 = vcombine.high %v695_v7, %v699_v9  ;;  %v1692_v7 = vld [vmem:[%s2051_s6] sm:$0xff]  }
 0x54a   : > { %v728_v14 = vrot.slane %v720_v10, %v1870_v39  ;;  %v735_v15 = vrot.slane %v721_v11, %v1870_v39  ;;  %v1705_v43 = vpop.eup %1704 }
 0x54b   : > { %v1707_v46 = vpop.eup %1706  ;;  %v1076_v52 = vmul.f32 %v1705_v43, %v1951_v54 }
 0x54c   : > { %v736_v16 = vcombine.low %v712_v12, %v728_v14  ;;  %v737_v17 = vcombine.high %v712_v12, %v728_v14  ;;  %v752_v18 = vcombine.low %v719_v13, %v735_v15  ;;  %v753_v19 = vcombine.high %v719_v13, %v735_v15 }
 0x54d   : > { %v1078_v53 = vmul.f32 %v1707_v46, %v1953_v55  ;;  %v1083_v61 = vpack.c.bf16 %v1076_v52, %v1076_v52 }
 0x54e   : > { %v744_v20 = vrot.slane %v736_v16, %v1881_v49  ;;  %v751_v21 = vrot.slane %v737_v17, %v1881_v49  ;;  %v760_v23 = vrot.slane %v752_v18, %v1881_v49  ;;  %v767_v24 = vrot.slane %v753_v19, %v1881_v49 }
 0x54f   : > { %v1084_v62 = vpack.c.bf16 %v1078_v53, %v1078_v53 }
 0x550   : > { %v772_v29 = vcombine.low %v744_v20, %v751_v21  ;;  %v1565_v32 = vcombine.high %v744_v20, %v751_v21  ;;  %v788_v25 = vcombine.low %v760_v23, %v767_v24  ;;  %v1566_v30 = vcombine.high %v760_v23, %v767_v24 }
 0x552   : > { %v779_v31 = vrot.slane %v772_v29, %v1870_v39  ;;  %v787_v33 = vrot.slane %v1565_v32, %v1870_v39  ;;  %v795_v34 = vrot.slane %v788_v25, %v1870_v39  ;;  %v803_v35 = vrot.slane %v1566_v30, %v1870_v39 }
 0x554   : > { %v804_v36 = vcombine.low %v779_v31, %v787_v33  ;;  %v805_v37 = vcombine.high %v779_v31, %v787_v33  ;;  %v820_v38 = vcombine.low %v795_v34, %v803_v35  ;;  %v821_v40 = vcombine.high %v795_v34, %v803_v35 }
 0x556   : > { %v812_v41 = vrot.slane %v804_v36, %v1881_v49  ;;  %v819_v42 = vrot.slane %v805_v37, %v1881_v49  ;;  %v828_v44 = vrot.slane %v820_v38, %v1881_v49  ;;  %v835_v45 = vrot.slane %v821_v40, %v1881_v49  ;;  %v1693_v38 = vld [vmem:[%s2051_s6 + $0x8] sm:$0xff]  }
 0x558   : > { %v836_v47 = vcombine.low %v812_v41, %v828_v44  ;;  %v837_v48 = vcombine.high %v812_v41, %v828_v44  ;;  %v838_v50 = vcombine.low %v819_v42, %v835_v45  ;;  %v839_v51 = vcombine.high %v819_v42, %v835_v45 }
 0x55a   : > { %v840_v56 = vpack.c.bf16 %v836_v47, %v836_v47  ;;  %v841_v57 = vpack.c.bf16 %v837_v48, %v837_v48  ;;  %v842_v59 = vpack.c.bf16 %v838_v50, %v838_v50  ;;  %v843_v60 = vpack.c.bf16 %v839_v51, %v839_v51 }
 0x55c   : > { %v1092_v22 = vsel %vm1090_vm6, %v840_v56, 0  ;;  %v1138_v58 = vsel %vm1090_vm6, %v841_v57, 0  ;;  %v1184_v54 = vsel %vm1090_vm6, %v842_v59, 0  ;;  %v1230_v55 = vsel %vm1090_vm6, %v843_v60, 0 }
 0x55d   : > { %1638 = vmatpush3.bf16.msra.mxu1 %v1092_v22  ;;  %1644 = vmatpush3.bf16.msra.mxu0 %v1138_v58 }
 0x55e   : > { %1649 = vmatprep.subr.bf16.mxu1 %v1735_v8  ;;  %1655 = vmatprep.subr.bf16.mxu0 %v1735_v8 }
 0x560   : > { %1640 = vmatmul.mubr.msk.bf16.vlgmr.msra.gmra.mrb[8].mxu1 %vm844_vm2, %v1083_v61  ;;  %1646 = vmatmul.mubr.msk.bf16.vlgmr.msra.gmra.mrb[12].mxu0 %vm844_vm2, %v1084_v62 }
 0x561   : > { %1650 = vmatpush3.bf16.msra.mxu1 %v1184_v54  ;;  %1656 = vmatpush3.bf16.msra.mxu0 %v1230_v55 }
 0x562   : > { %1651 = vmatprep.mubr.msk.bf16.mxu1 %vm1736_vm1, %v1735_v8  ;;  %1657 = vmatprep.mubr.msk.bf16.mxu0 %vm1736_vm1, %v1735_v8 }
 0x563   : > { %1661 = vmatprep.subr.bf16.mxu1 %v1735_v8 }
 0x575   : > { %v1071_v2 = vpop.xlane.xlu0 %1070 }
 0x576   : > { %1708 = vrcp.f32 %v1071_v2 }
 0x578   : > { %v1074_v27 = vpop.xlane.xlu1 %1073 }
 0x579   : > { %1710 = vrcp.f32 %v1074_v27 }
 0x580   : > { %v1709_v26 = vpop.eup %1708 }
 0x581   : > { %v1080_v28 = vmul.f32 %v1709_v26, %v1962_v63 }
 0x583   : > { %v1711_v3 = vpop.eup %1710  ;;  %v1085_v4 = vpack.c.bf16 %v1080_v28, %v1080_v28 }
 0x584   : > { %v1082_v5 = vmul.f32 %v1711_v3, %v1964_v1 }
 0x585   : > { %1652 = vmatmul.mubr.msk.bf16.vlgmr.msra.gmra.mrb[12].mxu1 %vm844_vm2, %v1085_v4 }
 0x586   : > { %v1086_v6 = vpack.c.bf16 %v1082_v5, %v1082_v5  ;;  %1665 = vmatprep.mubr.msk.bf16.mxu1 %vm1736_vm1, %v1735_v8  ;;  %1662 = vmatpush3.bf16.msra.mxu1 %v1692_v7 }
 0x587   : > { %1663 = vmatprep.subr.bf16.mxu1 %v1735_v8 }
 0x588   : > { %1658 = vmatmul.mubr.msk.bf16.vlgmr.msra.gmra.mrb[16].mxu0 %vm844_vm2, %v1086_v6  ;;  %v1580_v6 = vld [vmem:[%s2052_s7] ss:$0 sm:$0xff] }
 0x58a   : > { %1664 = vmatpush3.bf16.msra.mxu1 %v1693_v38 }
 0x633   : > { %v1128_v63 = vpop.f32.mrb[8].mxu1  ;;  %v1174_v9 = vpop.f32.mrb[12].mxu0 }
 0x634   : > { %v1641_v10 = vpop.f32.mrb[9].mxu1  ;;  %v1647_v11 = vpop.f32.mrb[13].mxu0 }
 0x635   : > { %v1131_v1 = vpop.f32.mrb[10].mxu1  ;;  %v1177_v12 = vpop.f32.mrb[14].mxu0 }
 0x636   : > { %v1642_v13 = vpop.f32.mrb[11].mxu1  ;;  %v1648_v14 = vpop.f32.mrb[15].mxu0 }
 0x658   : > { %v1220_v15 = vpop.f32.mrb[12].mxu1 }
 0x659   : > { %v1272_v16 = vcombine.low %v1128_v63, %v1220_v15  ;;  %v1273_v17 = vcombine.high %v1128_v63, %v1220_v15  ;;  %v1653_v18 = vpop.f32.mrb[13].mxu1 }
 0x65a   : > { %v1223_v19 = vpop.f32.mrb[14].mxu1 }
 0x65b   : > { %v1654_v20 = vpop.f32.mrb[15].mxu1  ;;  %v1266_v21 = vpop.f32.mrb[16].mxu0  ;;  %v1280_v8 = vrot.slane %v1272_v16, %v1870_v39  ;;  %v1287_v25 = vrot.slane %v1273_v17, %v1870_v39 }
 0x65c   : > { %v1288_v23 = vcombine.low %v1174_v9, %v1266_v21  ;;  %v1289_v24 = vcombine.high %v1174_v9, %v1266_v21  ;;  %v1659_v29 = vpop.f32.mrb[17].mxu0 }
 0x65d   : > { %v1269_v32 = vpop.f32.mrb[18].mxu0 }
 0x65e   : > { %v1296_v30 = vrot.slane %v1288_v23, %v1870_v39  ;;  %v1303_v31 = vrot.slane %v1289_v24, %v1870_v39  ;;  %v1660_v33 = vpop.f32.mrb[19].mxu0 }
 0x660   : > { %v1304_v34 = vcombine.low %v1280_v8, %v1296_v30  ;;  %v1305_v35 = vcombine.high %v1280_v8, %v1296_v30  ;;  %v1320_v36 = vcombine.low %v1287_v25, %v1303_v31  ;;  %v1321_v37 = vcombine.high %v1287_v25, %v1303_v31 }
 0x662   : > { %v1312_v40 = vrot.slane %v1304_v34, %v1881_v49  ;;  %v1319_v41 = vrot.slane %v1305_v35, %v1881_v49  ;;  %v1328_v42 = vrot.slane %v1320_v36, %v1881_v49  ;;  %v1335_v43 = vrot.slane %v1321_v37, %v1881_v49 }
 0x664   : > { %v1340_v44 = vcombine.low %v1312_v40, %v1319_v41  ;;  %v1575_v45 = vcombine.high %v1312_v40, %v1319_v41  ;;  %v1356_v46 = vcombine.low %v1328_v42, %v1335_v43  ;;  %v1576_v47 = vcombine.high %v1328_v42, %v1335_v43 }
 0x666   : > { %v1347_v48 = vrot.slane %v1340_v44, %v1870_v39  ;;  %v1355_v50 = vrot.slane %v1575_v45, %v1870_v39  ;;  %v1363_v51 = vrot.slane %v1356_v46, %v1870_v39  ;;  %v1371_v52 = vrot.slane %v1576_v47, %v1870_v39 }
 0x668   : > { %v1373_v53 = vcombine.high %v1347_v48, %v1355_v50  ;;  %v1389_v56 = vcombine.high %v1363_v51, %v1371_v52  ;;  %v1372_v57 = vcombine.low %v1347_v48, %v1355_v50  ;;  %v1388_v22 = vcombine.low %v1363_v51, %v1371_v52 }
 0x66a   : > { %v1387_v58 = vrot.slane %v1373_v53, %v1881_v49  ;;  %v1403_v59 = vrot.slane %v1389_v56, %v1881_v49  ;;  %v1380_v60 = vrot.slane %v1372_v57, %v1881_v49  ;;  %v1396_v61 = vrot.slane %v1388_v22, %v1881_v49 }
 0x66c   : > { %v1406_v62 = vcombine.low %v1387_v58, %v1403_v59  ;;  %v1405_v54 = vcombine.high %v1380_v60, %v1396_v61  ;;  %v1407_v55 = vcombine.high %v1387_v58, %v1403_v59  ;;  %v1404_v2 = vcombine.low %v1380_v60, %v1396_v61 }
 0x66e   : > { %1413 = vrot.lane.b32.xlu1 %v1406_v62, %s1744_s16  ;;  %1409 = vrot.lane.b32.xlu0 %v1405_v54, %s1745_s17 }
 0x672   : > { %1417 = vrot.lane.b32.xlu0 %v1407_v55, %s1746_s18 }
 0x6e0   : > { %v1410_v39 = vpop.permute.xlu0 %1409  ;;  %v1414_v27 = vpop.permute.xlu1 %1413 }
 0x6e1   : > { %v1420_v26 = vsel %vm844_vm2, %v1404_v2, %v1410_v39 }
 0x6e2   : > { %v1422_v3 = vsel %vm1421_vm7, %v1420_v26, %v1414_v27 }
 0x6e4   : > { %v1418_v28 = vpop.permute.xlu0 %1417 }
 0x6e5   : > { %v1424_v49 = vsel %vm1423_vm8, %v1422_v3, %v1418_v28 }
 0x6e6   : > { %v1425_v4 = vpack.c.bf16 %v1424_v49, %v1424_v49 }
 0x6e8   : > { %1666 = vmatmul.mubr.msk.bf16.vlgmr.msra.gmra.mrb[16].mxu1 %vm285_vm0, %v1425_v4 }
 0x7bb   : > { %v1479_v5 = vpop.f32.mrb[16].mxu1 }
 0x7bc   : > { %v1485_v7 = vadd.f32 %v1479_v5, %v1815_v0  ;;  %v1667_v63 = vpop.f32.mrb[17].mxu1 }
 0x7bd   : > { %v1482_v9 = vpop.f32.mrb[18].mxu1 }
 0x7be   : > { %v1493_v10 = vadd.f32 %v1580_v6, %v1485_v7  ;;  %v1668_v11 = vpop.f32.mrb[19].mxu1 }
 0x7c0   : > { %1494 = vst.msk [vmem:[%s280_s23] sm:$0xff] %vm285_vm0, %v1493_v10 }
 0x7c1 PF: > { %s24_s10 = sadd.s32 1, %s1732_s10  }
 0x7c2   : > { %p21_p9 = scmp.ge.s32.totalorder %s24_s10, 4  }
 0x7c4   :  { %23 = sbr.rel (!%p21_p9) target bundleno = 16 (0x10), region = 78 }

// kernel: transformer_forward.12
= control target key start
LH: loop header
LB: loop body
LE: loop exit
PB: predicated region body
PF: predicated region fallthrough
CT: control target
= control target key end

     0   :  { %s631_s24 = smov 0   ;;  %s689_s0 = inlined_call_operand.vmem [shape: f32[2,8,32], index: 0, kind: input, shape index: {}]   ;;  %s690_s1 = inlined_call_operand.vmem [shape: f32[1,32], index: 1, kind: input, shape index: {}]   ;;  %s691_s2 = inlined_call_operand.vmem [shape: f32[1,32], index: 2, kind: input, shape index: {}]   ;;  %s692_s3 = inlined_call_operand.vmem [shape: bf16[32,64], index: 3, kind: input, shape index: {}]   ;;  %s693_s4 = inlined_call_operand.vmem [shape: f32[1,64], index: 4, kind: input, shape index: {}]   ;;  %s694_s5 = inlined_call_operand.vmem [shape: bf16[64,32], index: 5, kind: input, shape index: {}]   ;;  %s695_s6 = inlined_call_operand.vmem [shape: f32[1,32], index: 6, kind: input, shape index: {}]   ;;  %s696_s7 = inlined_call_operand.vmem [shape: f32[2,8,32], index: 7, kind: output, shape index: {}]  }
   0x1 LB: > { %s514_s25 = sadd.s32 4294967295, %s587_s24   ;;  %p518_p0 = scmp.ge.s32.totalorder %s587_s24, 1  ;;  %s587_s24 = sphi %s631_s24, %s17_s24  }
   0x2   : > { %p236_p1 = scmp.lt.s32.totalorder %s587_s24, 3 }
   0x4   : > { %p237_p2 = pnand %p518_p0, %p236_p1 }
   0x5   : > { %p266_p3 = scmp.lt.s32.totalorder (!%p237_p2), %s514_s25, 1  ;;  %vm278_vm0 = vcmask (!%p237_p2), 261120   ;;  %v573_v7 = vld [vmem:[%s692_s3] sm:$0xff] (!%p237_p2)   ;;  %v589_v8 = vmov (!%p237_p2), 0.0   ;;  %v574_v9 = vld [vmem:[%s692_s3 + $0x8] sm:$0xff] (!%p237_p2)   ;;  %vm590_vm1 = vmmov (!%p237_p2), 0  }
   0x6   : > { %240 = sbr.rel (%p237_p2) target bundleno = 767 (0x2ff), region = 48  ;;  %543 = vmatprep.subr.bf16.mxu0 (!%p237_p2), %v589_v8  ;;  %551 = vmatprep.subr.bf16.mxu1 (!%p237_p2), %v589_v8  ;;  %v575_v10 = vld [vmem:[%s694_s5] sm:$0xff] (!%p237_p2)   ;;  %v576_v11 = vld [vmem:[%s694_s5 + $0x8] sm:$0xff] (!%p237_p2)   ;;  %v577_v22 = vld [vmem:[%s694_s5 + $0x10] sm:$0xff] (!%p237_p2)   ;;  %vm415_vm2 = vcmask (!%p237_p2), 523264  }
   0x7   : > { %544 = vmatpush3.bf16.msra.mxu0 (!%p237_p2), %v573_v7  ;;  %547 = vmatprep.mubr.msk.bf16.mxu0 (!%p237_p2), %vm590_vm1, %v589_v8  ;;  %v521_v16 = vld [vmem:[%s690_s1] ss:$0 sm:$0xff] (!%p237_p2)  ;;  %v578_v23 = vld [vmem:[%s694_s5 + $0x18] sm:$0xff] (!%p237_p2)  }
   0x8   : > { %545 = vmatprep.subr.bf16.mxu0 (!%p237_p2), %v589_v8  ;;  %559 = vmatprep.mubr.msk.bf16.mxu1 (!%p237_p2), %vm590_vm1, %v589_v8  ;;  %v522_v18 = vld [vmem:[%s691_s2] ss:$0 sm:$0xff] (!%p237_p2) }
   0x9   : > { %552 = vmatpush3.bf16.msra.mxu1 (!%p237_p2), %v575_v10  ;;  %v523_v24 = vld [vmem:[%s693_s4] ss:$0 sm:$0xff] (!%p237_p2) }
   0xa   : > { %553 = vmatprep.subr.bf16.mxu1 (!%p237_p2), %v589_v8  ;;  %v527_v32 = vld [vmem:[%s695_s6] ss:$0 sm:$0xff] (!%p237_p2) }
   0xb   : > { %546 = vmatpush3.bf16.msra.mxu0 (!%p237_p2), %v574_v9 }
   0xd   : > { %s698_s25 = smov (!%p266_p3, %s514_s25), 1  ;;  %554 = vmatpush3.bf16.msra.mxu1 %v576_v11 }
   0xe   : > { %s519_s26 = sshll.u32 %s698_s25, 3  ;;  %555 = vmatprep.subr.bf16.mxu1 %v589_v8 }
   0xf   : > { %s269_s29 = scalar_lea.vmem %s689_s0, %s519_s26  ;;  %s273_s9 = scalar_lea.vmem %s696_s7, %s519_s26 }
  0x10   : > { %v275_v0 = vld [vmem:[%s269_s29] sm:$0xff] }
  0x11   : > { %v279_v1 = vsel %vm278_vm0, %v275_v0, 0.0  ;;  %556 = vmatpush3.bf16.msra.mxu1 %v577_v22 }
  0x12   : > { %280 = vadd.xlane.f32.xlu0 %v279_v1  ;;  %557 = vmatprep.subr.bf16.mxu1 %v589_v8 }
  0x15   : > { %558 = vmatpush3.bf16.msra.mxu1 %v578_v23 }
  0x9f   : > { %v281_v2 = vpop.xlane.xlu0 %280 }
  0xa0   : > { %v283_v3 = vmul.f32 0.03125, %v281_v2 }
  0xa2   : > { %v284_v4 = vsub.f32 %v275_v0, %v283_v3 }
  0xa4   : > { %v285_v5 = vmul.f32 %v284_v4, %v284_v4 }
  0xa6   : > { %v286_v6 = vsel %vm278_vm0, %v285_v5, 0.0 }
  0xa7   : > { %287 = vadd.xlane.f32.xlu0 %v286_v6 }
 0x134   : > { %v288_v12 = vpop.xlane.xlu0 %287 }
 0x135   : > { %v289_v13 = vmul.f32 0.03125, %v288_v12 }
 0x137   : > { %v290_v14 = vadd.f32 1e-05, %v289_v13 }
 0x139   : > { %579 = vrsqrt.f32 %v290_v14 }
 0x143   : > { %v580_v15 = vpop.eup %579 }
 0x144   : > { %v292_v17 = vmul.f32 %v580_v15, %v284_v4 }
 0x146   : > { %v299_v19 = vmul.f32 %v521_v16, %v292_v17 }
 0x148   : > { %v306_v20 = vadd.f32 %v522_v18, %v299_v19 }
 0x14a   : > { %v307_v21 = vpack.c.bf16 %v306_v20, %v306_v20 }
 0x14c   : > { %548 = vmatmul.mubr.msk.bf16.vlgmr.msra.gmra.mrb[0].mxu0 %vm278_vm0, %v307_v21 }
 0x21f   : > { %v368_v25 = vpop.f32.mrb[0].mxu0 }
 0x220   : > { %v369_v26 = vadd.f32 %v523_v24, %v368_v25  ;;  %v549_v27 = vpop.f32.mrb[1].mxu0 }
 0x221   : > { %v371_v28 = vpop.f32.mrb[2].mxu0 }
 0x222   : > { %v374_v29 = vmax.f32 %v369_v26, 0.0  ;;  %v550_v30 = vpop.f32.mrb[3].mxu0 }
 0x224   : > { %v375_v31 = vpack.c.bf16 %v374_v29, %v374_v29 }
 0x226   : > { %560 = vmatmul.mubr.msk.bf16.vlgmr.msra.gmra.mrb[0].mxu1 %vm415_vm2, %v375_v31 }
 0x2f9   : > { %v453_v33 = vpop.f32.mrb[0].mxu1 }
 0x2fa   : > { %v454_v34 = vadd.f32 %v527_v32, %v453_v33  ;;  %v561_v35 = vpop.f32.mrb[1].mxu1 }
 0x2fb   : > { %v456_v36 = vpop.f32.mrb[2].mxu1 }
 0x2fc   : > { %v459_v37 = vadd.f32 %v454_v34, %v275_v0  ;;  %v562_v38 = vpop.f32.mrb[3].mxu1 }
 0x2fe   : > { %460 = vst.msk [vmem:[%s273_s9] sm:$0xff] %vm278_vm0, %v459_v37 }
 0x2ff PF: > { %s17_s24 = sadd.s32 1, %s587_s24  }
 0x300   : > { %p14_p4 = scmp.ge.s32.totalorder %s17_s24, 4  }
 0x302   :  { %16 = sbr.rel (!%p14_p4) target bundleno = 1 (0x1), region = 78 }

// kernel: transformer_forward.14
= control target key start
LH: loop header
LB: loop body
LE: loop exit
PB: predicated region body
PF: predicated region fallthrough
CT: control target
= control target key end

     0   :  { %s728_s30 = smov 0   ;;  %s794_s0 = inlined_call_operand.vmem [shape: f32[2,8,32], index: 0, kind: input, shape index: {}]   ;;  %s795_s1 = inlined_call_operand.vmem [shape: f32[1,32], index: 1, kind: input, shape index: {}]   ;;  %s796_s2 = inlined_call_operand.vmem [shape: f32[1,32], index: 2, kind: input, shape index: {}]   ;;  %s797_s3 = inlined_call_operand.vmem [shape: bf16[32,64], index: 3, kind: input, shape index: {}]   ;;  %s798_s4 = inlined_call_operand.vmem [shape: f32[1,64], index: 4, kind: input, shape index: {}]   ;;  %s799_s5 = inlined_call_operand.vmem [shape: bf16[64,32], index: 5, kind: input, shape index: {}]   ;;  %s800_s6 = inlined_call_operand.vmem [shape: f32[1,32], index: 6, kind: input, shape index: {}]   ;;  %s801_s7 = inlined_call_operand.vmem [shape: f32[1,32], index: 7, kind: input, shape index: {}]   ;;  %s802_s8 = inlined_call_operand.vmem [shape: f32[1,32], index: 8, kind: input, shape index: {}]   ;;  %s803_s9 = inlined_call_operand.vmem [shape: f32[2,8,32], index: 9, kind: output, shape index: {}]  }
   0x1 LB: > { %s597_s10 = sadd.s32 4294967295, %s674_s30   ;;  %p601_p0 = scmp.ge.s32.totalorder %s674_s30, 1  ;;  %s674_s30 = sphi %s728_s30, %s19_s30  }
   0x2   : > { %p286_p1 = scmp.lt.s32.totalorder %s674_s30, 3 }
   0x4   : > { %p287_p2 = pnand %p601_p0, %p286_p1 }
   0x5   : > { %p320_p3 = scmp.lt.s32.totalorder (!%p287_p2), %s597_s10, 1  ;;  %vm332_vm0 = vcmask (!%p287_p2), 261120   ;;  %v658_v7 = vld [vmem:[%s797_s3] sm:$0xff] (!%p287_p2)   ;;  %v676_v8 = vmov (!%p287_p2), 0.0   ;;  %v659_v9 = vld [vmem:[%s797_s3 + $0x8] sm:$0xff] (!%p287_p2)   ;;  %vm677_vm1 = vmmov (!%p287_p2), 0  }
   0x6   : > { %290 = sbr.rel (%p287_p2) target bundleno = 1080 (0x438), region = 56  ;;  %628 = vmatprep.subr.bf16.mxu0 (!%p287_p2), %v676_v8  ;;  %636 = vmatprep.subr.bf16.mxu1 (!%p287_p2), %v676_v8  ;;  %v660_v10 = vld [vmem:[%s799_s5] sm:$0xff] (!%p287_p2)   ;;  %v661_v11 = vld [vmem:[%s799_s5 + $0x8] sm:$0xff] (!%p287_p2)   ;;  %v662_v22 = vld [vmem:[%s799_s5 + $0x10] sm:$0xff] (!%p287_p2)   ;;  %vm469_vm2 = vcmask (!%p287_p2), 523264  }
   0x7   : > { %629 = vmatpush3.bf16.msra.mxu0 (!%p287_p2), %v658_v7  ;;  %632 = vmatprep.mubr.msk.bf16.mxu0 (!%p287_p2), %vm677_vm1, %v676_v8  ;;  %v604_v16 = vld [vmem:[%s795_s1] ss:$0 sm:$0xff] (!%p287_p2)  ;;  %v663_v23 = vld [vmem:[%s799_s5 + $0x18] sm:$0xff] (!%p287_p2)  }
   0x8   : > { %630 = vmatprep.subr.bf16.mxu0 (!%p287_p2), %v676_v8  ;;  %644 = vmatprep.mubr.msk.bf16.mxu1 (!%p287_p2), %vm677_vm1, %v676_v8  ;;  %v605_v18 = vld [vmem:[%s796_s2] ss:$0 sm:$0xff] (!%p287_p2) }
   0x9   : > { %637 = vmatpush3.bf16.msra.mxu1 (!%p287_p2), %v660_v10  ;;  %v606_v24 = vld [vmem:[%s798_s4] ss:$0 sm:$0xff] (!%p287_p2) }
   0xa   : > { %638 = vmatprep.subr.bf16.mxu1 (!%p287_p2), %v676_v8  ;;  %v610_v32 = vld [vmem:[%s800_s6] ss:$0 sm:$0xff] (!%p287_p2) }
   0xb   : > { %631 = vmatpush3.bf16.msra.mxu0 (!%p287_p2), %v659_v9  ;;  %v616_v49 = vld [vmem:[%s801_s7] ss:$0 sm:$0xff] (!%p287_p2) }
   0xc   : > { %v617_v51 = vld [vmem:[%s802_s8] ss:$0 sm:$0xff] (!%p287_p2) }
   0xd   : > { %s805_s10 = smov (!%p320_p3, %s597_s10), 1  ;;  %639 = vmatpush3.bf16.msra.mxu1 %v661_v11 }
   0xe   : > { %s602_s11 = sshll.u32 %s805_s10, 3  ;;  %640 = vmatprep.subr.bf16.mxu1 %v676_v8 }
   0xf   : > { %s323_s14 = scalar_lea.vmem %s794_s0, %s602_s11  ;;  %s327_s23 = scalar_lea.vmem %s803_s9, %s602_s11 }
  0x10   : > { %v329_v0 = vld [vmem:[%s323_s14] sm:$0xff] }
  0x11   : > { %v333_v1 = vsel %vm332_vm0, %v329_v0, 0.0  ;;  %641 = vmatpush3.bf16.msra.mxu1 %v662_v22 }
  0x12   : > { %334 = vadd.xlane.f32.xlu0 %v333_v1  ;;  %642 = vmatprep.subr.bf16.mxu1 %v676_v8 }
  0x15   : > { %643 = vmatpush3.bf16.msra.mxu1 %v663_v23 }
  0x9f   : > { %v335_v2 = vpop.xlane.xlu0 %334 }
  0xa0   : > { %v337_v3 = vmul.f32 0.03125, %v335_v2 }
  0xa2   : > { %v338_v4 = vsub.f32 %v329_v0, %v337_v3 }
  0xa4   : > { %v339_v5 = vmul.f32 %v338_v4, %v338_v4 }
  0xa6   : > { %v340_v6 = vsel %vm332_vm0, %v339_v5, 0.0 }
  0xa7   : > { %341 = vadd.xlane.f32.xlu0 %v340_v6 }
 0x134   : > { %v342_v12 = vpop.xlane.xlu0 %341 }
 0x135   : > { %v343_v13 = vmul.f32 0.03125, %v342_v12 }
 0x137   : > { %v344_v14 = vadd.f32 1e-05, %v343_v13 }
 0x139   : > { %664 = vrsqrt.f32 %v344_v14 }
 0x143   : > { %v665_v15 = vpop.eup %664 }
 0x144   : > { %v346_v17 = vmul.f32 %v665_v15, %v338_v4 }
 0x146   : > { %v353_v19 = vmul.f32 %v604_v16, %v346_v17 }
 0x148   : > { %v360_v20 = vadd.f32 %v605_v18, %v353_v19 }
 0x14a   : > { %v361_v21 = vpack.c.bf16 %v360_v20, %v360_v20 }
 0x14c   : > { %633 = vmatmul.mubr.msk.bf16.vlgmr.msra.gmra.mrb[0].mxu0 %vm332_vm0, %v361_v21 }
 0x21f   : > { %v422_v25 = vpop.f32.mrb[0].mxu0 }
 0x220   : > { %v423_v26 = vadd.f32 %v606_v24, %v422_v25  ;;  %v634_v27 = vpop.f32.mrb[1].mxu0 }
 0x221   : > { %v425_v28 = vpop.f32.mrb[2].mxu0 }
 0x222   : > { %v428_v29 = vmax.f32 %v423_v26, 0.0  ;;  %v635_v30 = vpop.f32.mrb[3].mxu0 }
 0x224   : > { %v429_v31 = vpack.c.bf16 %v428_v29, %v428_v29 }
 0x226   : > { %645 = vmatmul.mubr.msk.bf16.vlgmr.msra.gmra.mrb[0].mxu1 %vm469_vm2, %v429_v31 }
 0x2f9   : > { %v507_v33 = vpop.f32.mrb[0].mxu1 }
 0x2fa   : > { %v508_v34 = vadd.f32 %v610_v32, %v507_v33  ;;  %v646_v35 = vpop.f32.mrb[1].mxu1 }
 0x2fb   : > { %v510_v36 = vpop.f32.mrb[2].mxu1 }
 0x2fc   : > { %v647_v37 = vpop.f32.mrb[3].mxu1  ;;  %v513_v38 = vadd.f32 %v508_v34, %v329_v0 }
 0x2fe   : > { %v516_v39 = vsel %vm332_vm0, %v513_v38, 0.0 }
 0x2ff   : > { %517 = vadd.xlane.f32.xlu1 %v516_v39 }
 0x38c   : > { %v518_v40 = vpop.xlane.xlu1 %517 }
 0x38d   : > { %v519_v41 = vmul.f32 0.03125, %v518_v40 }
 0x38f   : > { %v520_v42 = vsub.f32 %v513_v38, %v519_v41 }
 0x391   : > { %v521_v43 = vmul.f32 %v520_v42, %v520_v42 }
 0x393   : > { %v522_v44 = vsel %vm332_vm0, %v521_v43, 0.0 }
 0x394   : > { %523 = vadd.xlane.f32.xlu1 %v522_v44 }
 0x421   : > { %v524_v45 = vpop.xlane.xlu1 %523 }
 0x422   : > { %v525_v46 = vmul.f32 0.03125, %v524_v45 }
 0x424   : > { %v526_v47 = vadd.f32 1e-05, %v525_v46 }
 0x426   : > { %666 = vrsqrt.f32 %v526_v47 }
 0x430   : > { %v667_v48 = vpop.eup %666 }
 0x431   : > { %v528_v50 = vmul.f32 %v667_v48, %v520_v42 }
 0x433   : > { %v535_v52 = vmul.f32 %v616_v49, %v528_v50 }
 0x435   : > { %v542_v53 = vadd.f32 %v617_v51, %v535_v52 }
 0x437   : > { %543 = vst.msk [vmem:[%s327_s23] sm:$0xff] %vm332_vm0, %v542_v53 }
 0x438 PF: > { %s19_s30 = sadd.s32 1, %s674_s30  }
 0x439   : > { %p16_p4 = scmp.ge.s32.totalorder %s19_s30, 4  }
 0x43b   :  { %18 = sbr.rel (!%p16_p4) target bundleno = 1 (0x1), region = 86 }

// kernel: transformer_forward.11
= control target key start
LH: loop header
LB: loop body
LE: loop exit
PB: predicated region body
PF: predicated region fallthrough
CT: control target
= control target key end

     0   :  { %s2036_s0 = inlined_call_operand.vmem [shape: s32[2], index: 0, kind: input, shape index: {}]   ;;  %s2037_s1 = inlined_call_operand.vmem [shape: f32[2,8,32], index: 1, kind: input, shape index: {}]   ;;  %s2038_s2 = inlined_call_operand.vmem [shape: f32[1,32], index: 2, kind: input, shape index: {}]   ;;  %s2039_s3 = inlined_call_operand.vmem [shape: f32[1,32], index: 3, kind: input, shape index: {}]   ;;  %s2040_s4 = inlined_call_operand.vmem [shape: bf16[32,96], index: 4, kind: input, shape index: {}]   ;;  %s2041_s5 = inlined_call_operand.vmem [shape: f32[1,96], index: 5, kind: input, shape index: {}]   ;;  %s2042_s6 = inlined_call_operand.vmem [shape: bf16[32,32], index: 6, kind: input, shape index: {}]   ;;  %s2043_s7 = inlined_call_operand.vmem [shape: f32[1,32], index: 7, kind: input, shape index: {}]   ;;  %s2044_s8 = inlined_call_operand.vmem [shape: f32[2,8,32], index: 8, kind: output, shape index: {}]  }
   0x1   :  { %s13_s29 = sshll.u32 %s2036_s0, 4  ;;  %s14_s29 = int_to_ptr.vmem [resolvable:$true] %s13_s29 }
   0x2   :  { %s1708_s30 = scalar_lea.vmem %s14_s29, 16  ;;  %p1713_p1 = scmp.lt.s32.totalorder %s14_s29, %s14_s29 }
   0x3   :  { %p1709_p0 = scmp.ne.s32.totalorder %s14_s29, %s1708_s30  ;;  %p1714_p2 = scmp.lt.s32.totalorder %s1708_s30, %s1708_s30 }
   0x5   :  { %p1715_p3 = por %p1714_p2, %p1713_p1 }
   0x7   :  { %p1716_p4 = pnand %p1715_p3, %p1709_p0 }
   0x9   :  { %1719 = shalt.err (!%p1716_p4)  }
   0xa   :  { %s1730_s9 = smov [#allocation3]  }
   0xb   :  { %16 = dma.vmem_to_smem %s14_s29, 16, %s1730_s9, [#allocation2] }
   0xc   :  { %1724 = dma.done.wait [#allocation2], 16 }
   0xd   :  { %1725 = vsyncadd [#allocation2], 4294967280 }
   0xe   :  { %18 = sfence }
   0xf   :  { %s1791_s10 = smov 0  }
  0x10 LB: > { %s1797_s0 = sadd.s32 4294967295, %s1728_s10   ;;  %p1548_p5 = scmp.ge.s32.totalorder %s1728_s10, 1  ;;  %s1728_s10 = sphi %s1791_s10, %s24_s10  }
  0x11   : > { %p243_p6 = scmp.lt.s32.totalorder %s1728_s10, 3 }
  0x13   : > { %p244_p7 = pnand %p1548_p5, %p243_p6 }
  0x14   : > { %p273_p8 = scmp.lt.s32.totalorder (!%p244_p7), %s1797_s0, 1  ;;  %vm285_vm0 = vcmask (!%p244_p7), 261120   ;;  %v1686_v7 = vld [vmem:[%s2040_s4] sm:$0xff] (!%p244_p7)   ;;  %v1731_v8 = vmov (!%p244_p7), 0.0   ;;  %vm1732_vm1 = vmmov (!%p244_p7), 0   ;;  %v1687_v9 = vld [vmem:[%s2040_s4 + $0x8] sm:$0xff] (!%p244_p7)   ;;  %v382_v29 = vlaneseq (!%p244_p7) }
  0x15   : > { %247 = sbr.rel (%p244_p7) target bundleno = 1985 (0x7c1), region = 48  ;;  %1601 = vmatprep.subr.bf16.mxu0 (!%p244_p7), %v1731_v8  ;;  %1605 = vmatprep.mubr.msk.bf16.mxu0 (!%p244_p7), %vm1732_vm1, %v1731_v8  ;;  %v1551_v14 = vld [vmem:[%s2038_s2] ss:$0 sm:$0xff] (!%p244_p7)  ;;  %s1733_s26 = smov (!%p244_p7), 104   ;;  %v1737_v30 = vmov (!%p244_p7), 1983009808  }
  0x16   : > { %1602 = vmatpush3.bf16.msra.mxu0 (!%p244_p7), %v1686_v7  ;;  %1609 = vmatprep.subr.bf16.mxu1 (!%p244_p7), %v1731_v8  ;;  %v1552_v16 = vld [vmem:[%s2039_s3] ss:$0 sm:$0xff] (!%p244_p7)  ;;  %s1734_s27 = smov (!%p244_p7), 120   ;;  %s1735_s28 = smov (!%p244_p7), 112   ;;  %v399_v31 = vunpack.c.l.s4 (!%p244_p7), %v1737_v30  ;;  %v402_v33 = vshrl.u32 (!%p244_p7), %v382_v29, 7  ;;  %vm840_vm2 = vcmask (!%p244_p7), 64512  }
  0x17   : > { %1603 = vmatprep.subr.bf16.mxu0 (!%p244_p7), %v1731_v8  ;;  %1611 = vmatprep.mubr.msk.bf16.mxu1 (!%p244_p7), %vm1732_vm1, %v1731_v8  ;;  %v1553_v20 = vld [vmem:[%s2041_s5] ss:$0 sm:$0xff] (!%p244_p7)  ;;  %s1736_s29 = smov (!%p244_p7), 96   ;;  %v1738_v35 = vmov (!%p244_p7), 1934713408   ;;  %s381_s30 = sld [smem:[#allocation3 + %s1797_s0]] (!%p244_p7) }
  0x18   : > { %v400_v32 = vunpack.c.0.s8 (!%p244_p7), %v399_v31  ;;  %v431_v36 = vunpack.c.l.s4 (!%p244_p7), %v1738_v35  ;;  %s1739_s9 = smov (!%p244_p7), 64   ;;  %vm1086_vm4 = vcmask (!%p244_p7), 1043456   ;;  %s1740_s16 = smov (!%p244_p7), 16   ;;  %vm1417_vm5 = vcmask (!%p244_p7), 130048  }
  0x19   : > { %s1741_s17 = smov (!%p244_p7), 8   ;;  %s1742_s18 = smov (!%p244_p7), 24   ;;  %vm1419_vm6 = vcmask (!%p244_p7), 195584  }
  0x1a   : > { %1604 = vmatpush3.bf16.msra.mxu0 (!%p244_p7), %v1687_v9  ;;  %v1863_v39 = vsub.s32 (!%p244_p7), %v400_v32, %v402_v33  ;;  %v432_v43 = vunpack.c.0.s8 (!%p244_p7), %v431_v36 }
  0x1b   : > { %1615 = vmatprep.subr.bf16.mxu0 (!%p244_p7), %v1731_v8 }
  0x1c   : > { %s1803_s11 = scalar_select %p273_p8, %s1797_s0, 1  ;;  %v1873_v49 = vsub.s32 %v432_v43, %v402_v33 }
  0x1e   : > { %s1549_s12 = sshll.u32 %s1803_s11, 3 }
  0x1f   : > { %s276_s15 = scalar_lea.vmem %s2037_s1, %s1549_s12  ;;  %s280_s23 = scalar_lea.vmem %s2044_s8, %s1549_s12 }
  0x20   : > { %v1811_v0 = vld [vmem:[%s276_s15] sm:$0xff] }
  0x21   : > { %v286_v1 = vsel %vm285_vm0, %v1811_v0, 0.0 }
  0x22   : > { %287 = vadd.xlane.f32.xlu0 %v286_v1 }
  0xaf   : > { %v288_v2 = vpop.xlane.xlu0 %287 }
  0xb0   : > { %v290_v3 = vmul.f32 0.03125, %v288_v2 }
  0xb2   : > { %v291_v4 = vsub.f32 %v1811_v0, %v290_v3 }
  0xb4   : > { %v292_v5 = vmul.f32 %v291_v4, %v291_v4 }
  0xb6   : > { %v293_v6 = vsel %vm285_vm0, %v292_v5, 0.0 }
  0xb7   : > { %294 = vadd.xlane.f32.xlu0 %v293_v6 }
 0x144   : > { %v295_v10 = vpop.xlane.xlu0 %294 }
 0x145   : > { %v296_v11 = vmul.f32 0.03125, %v295_v10 }
 0x147   : > { %v297_v12 = vadd.f32 1e-05, %v296_v11 }
 0x149   : > { %1690 = vrsqrt.f32 %v297_v12 }
 0x153   : > { %v1691_v13 = vpop.eup %1690 }
 0x154   : > { %v299_v15 = vmul.f32 %v1691_v13, %v291_v4 }
 0x156   : > { %v306_v17 = vmul.f32 %v1551_v14, %v299_v15 }
 0x158   : > { %v313_v18 = vadd.f32 %v1552_v16, %v306_v17 }
 0x15a   : > { %v314_v19 = vpack.c.bf16 %v313_v18, %v313_v18 }
 0x15c   : > { %1606 = vmatmul.mubr.msk.bf16.vlgmr.msra.gmra.mrb[0].mxu0 %vm285_vm0, %v314_v19 }
 0x15d   : > { %1617 = vmatprep.mubr.msk.bf16.mxu0 %vm1732_vm1, %v1731_v8 }
 0x22f   : > { %v375_v21 = vpop.f32.mrb[0].mxu0 }
 0x230   : > { %v1843_v22 = vadd.f32 %v1553_v20, %v375_v21  ;;  %v1607_v23 = vpop.f32.mrb[1].mxu0 }
 0x231   : > { %v378_v24 = vpop.f32.mrb[2].mxu0 }
 0x232   : > { %393 = vrot.lane.b32.xlu0 %v1843_v22, %s1733_s26  ;;  %387 = vrot.lane.b32.xlu1 %v1843_v22, %s1734_s27  ;;  %v1608_v25 = vpop.f32.mrb[3].mxu0 }
 0x236   : > { %390 = vrot.lane.b32.xlu1 %v1843_v22, %s1735_s28 }
 0x23a   : > { %536 = vrot.lane.b32.xlu1 %v1843_v22, %s1736_s29 }
 0x2a4   : > { %v1849_v26 = vpop.permute.xlu1 %387  ;;  %v1855_v28 = vpop.permute.xlu0 %393 }
 0x2a5   : > { %538 = vrot.lane.b32.xlu1 %v1849_v26, %s1736_s29  ;;  %v412_v40 = vcombine.low %v1849_v26, %v1855_v28  ;;  %v413_v41 = vcombine.high %v1849_v26, %v1855_v28 }
 0x2a7   : > { %v420_v46 = vrot.slane %v412_v40, %v1863_v39  ;;  %v427_v47 = vrot.slane %v413_v41, %v1863_v39 }
 0x2a8   : > { %v1852_v27 = vpop.permute.xlu1 %390 }
 0x2a9   : > { %540 = vrot.lane.b32.xlu1 %v1852_v27, %s1736_s29  ;;  %v396_v37 = vcombine.low %v1843_v22, %v1852_v27  ;;  %v397_v38 = vcombine.high %v1843_v22, %v1852_v27 }
 0x2ab   : > { %v404_v44 = vrot.slane %v396_v37, %v1863_v39  ;;  %v411_v45 = vrot.slane %v397_v38, %v1863_v39 }
 0x2ac   : > { %v537_v34 = vpop.permute.xlu1 %536 }
 0x2ad   : > { %542 = vrot.lane.b32.xlu1 %v1855_v28, %s1736_s29  ;;  %v428_v50 = vcombine.low %v404_v44, %v420_v46  ;;  %v429_v51 = vcombine.high %v404_v44, %v420_v46  ;;  %v444_v52 = vcombine.low %v411_v45, %v427_v47  ;;  %v445_v53 = vcombine.high %v411_v45, %v427_v47 }
 0x2af   : > { %v436_v59 = vrot.slane %v428_v50, %v1873_v49  ;;  %v443_v60 = vrot.slane %v429_v51, %v1873_v49  ;;  %v452_v61 = vrot.slane %v444_v52, %v1873_v49  ;;  %v459_v62 = vrot.slane %v445_v53, %v1873_v49 }
 0x2b1   : > { %v464_v9 = vcombine.low %v436_v59, %v443_v60  ;;  %v1557_v10 = vcombine.high %v436_v59, %v443_v60  ;;  %v480_v11 = vcombine.low %v452_v61, %v459_v62  ;;  %v1558_v12 = vcombine.high %v452_v61, %v459_v62 }
 0x2b3   : > { %v471_v21 = vrot.slane %v464_v9, %v1863_v39  ;;  %v479_v23 = vrot.slane %v1557_v10, %v1863_v39  ;;  %v487_v24 = vrot.slane %v480_v11, %v1863_v39  ;;  %v495_v25 = vrot.slane %v1558_v12, %v1863_v39 }
 0x2b4   : > { %v383_v10 = vand.u32 127, %v382_v29  ;;  %v384_v11 = vstv %s381_s30 }
 0x2b5   : > { %v496_v41 = vcombine.low %v471_v21, %v479_v23 }
 0x2b6   : > { %vm1925_vm3 = vcmp.ge.s32.totalorder %v383_v10, %v384_v11 }
 0x2b7   : > { %v504_v50 = vrot.slane %v496_v41, %v1873_v49 }
 0x317   : > { %v539_v42 = vpop.permute.xlu1 %538 }
 0x31b   : > { %v541_v48 = vpop.permute.xlu1 %540 }
 0x31c   : > { %v548_v54 = vcombine.low %v537_v34, %v541_v48  ;;  %v549_v55 = vcombine.high %v537_v34, %v541_v48 }
 0x31e   : > { %v556_v63 = vrot.slane %v548_v54, %v1863_v39  ;;  %v563_v1 = vrot.slane %v549_v55, %v1863_v39 }
 0x31f   : > { %v543_v56 = vpop.permute.xlu1 %542 }
 0x320   : > { %v564_v57 = vcombine.low %v539_v42, %v543_v56  ;;  %v565_v58 = vcombine.high %v539_v42, %v543_v56  ;;  %v512_v42 = vcombine.low %v487_v24, %v495_v25  ;;  %v497_v56 = vcombine.high %v471_v21, %v479_v23 }
 0x322   : > { %v572_v2 = vrot.slane %v564_v57, %v1863_v39  ;;  %v579_v3 = vrot.slane %v565_v58, %v1863_v39  ;;  %v520_v51 = vrot.slane %v512_v42, %v1873_v49  ;;  %v513_v57 = vcombine.high %v487_v24, %v495_v25 }
 0x324   : > { %v580_v4 = vcombine.low %v556_v63, %v572_v2  ;;  %v581_v5 = vcombine.high %v556_v63, %v572_v2  ;;  %v596_v6 = vcombine.low %v563_v1, %v579_v3  ;;  %v597_v7 = vcombine.high %v563_v1, %v579_v3 }
 0x325   : > { %v528_v58 = vcombine.low %v504_v50, %v520_v51  ;;  %v529_v59 = vcombine.high %v504_v50, %v520_v51  ;;  %v511_v1 = vrot.slane %v497_v56, %v1873_v49  ;;  %v527_v2 = vrot.slane %v513_v57, %v1873_v49 }
 0x326   : > { %v588_v13 = vrot.slane %v580_v4, %v1873_v49  ;;  %v595_v14 = vrot.slane %v581_v5, %v1873_v49  ;;  %v604_v15 = vrot.slane %v596_v6, %v1873_v49  ;;  %v611_v16 = vrot.slane %v597_v7, %v1873_v49 }
 0x327   : > { %v532_v62 = vpack.c.bf16 %v528_v58, %v528_v58  ;;  %v533_v63 = vpack.c.bf16 %v529_v59, %v529_v59  ;;  %v530_v5 = vcombine.low %v511_v1, %v527_v2  ;;  %v531_v6 = vcombine.high %v511_v1, %v527_v2 }
 0x328   : > { %v616_v17 = vcombine.low %v588_v13, %v595_v14  ;;  %v1559_v18 = vcombine.high %v588_v13, %v595_v14  ;;  %v632_v19 = vcombine.low %v604_v15, %v611_v16  ;;  %v1560_v20 = vcombine.high %v604_v15, %v611_v16 }
 0x329   : > { %v534_v7 = vpack.c.bf16 %v530_v5, %v530_v5  ;;  %v535_v9 = vpack.c.bf16 %v531_v6, %v531_v6 }
 0x32a   : > { %v623_v30 = vrot.slane %v616_v17, %v1863_v39  ;;  %v631_v31 = vrot.slane %v1559_v18, %v1863_v39  ;;  %v639_v32 = vrot.slane %v632_v19, %v1863_v39  ;;  %v647_v33 = vrot.slane %v1560_v20, %v1863_v39 }
 0x32c   : > { %v648_v34 = vcombine.low %v623_v30, %v631_v31  ;;  %v664_v35 = vcombine.low %v639_v32, %v647_v33  ;;  %v649_v36 = vcombine.high %v623_v30, %v631_v31  ;;  %v665_v37 = vcombine.high %v639_v32, %v647_v33 }
 0x32e   : > { %v656_v38 = vrot.slane %v648_v34, %v1873_v49  ;;  %v672_v40 = vrot.slane %v664_v35, %v1873_v49  ;;  %v663_v45 = vrot.slane %v649_v36, %v1873_v49  ;;  %v679_v46 = vrot.slane %v665_v37, %v1873_v49 }
 0x330   : > { %v680_v43 = vcombine.low %v656_v38, %v672_v40  ;;  %v681_v44 = vcombine.high %v656_v38, %v672_v40  ;;  %v682_v54 = vcombine.low %v663_v45, %v679_v46  ;;  %v683_v55 = vcombine.high %v663_v45, %v679_v46 }
 0x332   : > { %v684_v47 = vpack.c.bf16 %v680_v43, %v680_v43  ;;  %v685_v48 = vpack.c.bf16 %v681_v44, %v681_v44  ;;  %v686_v60 = vpack.c.bf16 %v682_v54, %v682_v54  ;;  %v687_v61 = vpack.c.bf16 %v683_v55, %v683_v55 }
 0x334   : > { %v845_v52 = vsel %vm840_vm2, %v684_v47, 0  ;;  %v891_v53 = vsel %vm840_vm2, %v685_v48, 0  ;;  %v937_v3 = vsel %vm840_vm2, %v686_v60, 0  ;;  %v983_v4 = vsel %vm840_vm2, %v687_v61, 0 }
 0x335   : > { %1610 = vmatpush3.bf16.xpose.msra.mxu1 %v845_v52  ;;  %1616 = vmatpush3.bf16.xpose.msra.mxu0 %v891_v53 }
 0x336   : > { %1621 = vmatprep.subr.bf16.mxu1 %v1731_v8  ;;  %1627 = vmatprep.subr.bf16.mxu0 %v1731_v8 }
 0x33c   : > { %1612 = vmatmul.mubr.msk.bf16.vlgmr.msra.gmra.mrb[0].mxu1 %vm840_vm2, %v532_v62  ;;  %1618 = vmatmul.mubr.msk.bf16.vlgmr.msra.gmra.mrb[4].mxu0 %vm840_vm2, %v533_v63 }
 0x33d   : > { %1622 = vmatpush3.bf16.xpose.msra.mxu1 %v937_v3  ;;  %1628 = vmatpush3.bf16.xpose.msra.mxu0 %v983_v4 }
 0x33e   : > { %1623 = vmatprep.mubr.msk.bf16.mxu1 %vm1732_vm1, %v1731_v8  ;;  %1629 = vmatprep.mubr.msk.bf16.mxu0 %vm1732_vm1, %v1731_v8 }
 0x33f   : > { %1633 = vmatprep.subr.bf16.mxu1 %v1731_v8  ;;  %1639 = vmatprep.subr.bf16.mxu0 %v1731_v8 }
 0x344   : > { %1624 = vmatmul.mubr.msk.bf16.vlgmr.msra.gmra.mrb[4].mxu1 %vm840_vm2, %v534_v7  ;;  %1630 = vmatmul.mubr.msk.bf16.vlgmr.msra.gmra.mrb[8].mxu0 %vm840_vm2, %v535_v9 }
 0x345   : > { %1635 = vmatprep.mubr.msk.bf16.mxu1 %vm1732_vm1, %v1731_v8  ;;  %1641 = vmatprep.mubr.msk.bf16.mxu0 %vm1732_vm1, %v1731_v8 }
 0x40f   : > { %v881_v12 = vpop.f32.mrb[0].mxu1  ;;  %v927_v13 = vpop.f32.mrb[4].mxu0 }
 0x410   : > { %v1025_v15 = vmul.f32 0.35355338, %v881_v12  ;;  %v1026_v16 = vmul.f32 0.35355338, %v927_v13  ;;  %v1613_v17 = vpop.f32.mrb[1].mxu1  ;;  %v1619_v18 = vpop.f32.mrb[5].mxu0 }
 0x411   : > { %v884_v19 = vpop.f32.mrb[2].mxu1  ;;  %v930_v20 = vpop.f32.mrb[6].mxu0 }
 0x412   : > { %v1614_v21 = vpop.f32.mrb[3].mxu1  ;;  %v1620_v23 = vpop.f32.mrb[7].mxu0  ;;  %v1031_v24 = vsel %vm1925_vm3, -1e+09, %v1025_v15  ;;  %v1032_v29 = vsel %vm1925_vm3, -1e+09, %v1026_v16 }
 0x413   : > { %v1035_v25 = vsel %vm840_vm2, %v1031_v24, -inf  ;;  %v1038_v30 = vsel %vm840_vm2, %v1032_v29, -inf }
 0x414   : > { %1036 = vmax.xlane.f32.xlu1 %v1035_v25  ;;  %1039 = vmax.xlane.f32.xlu0 %v1038_v30 }
 0x417   : > { %v973_v31 = vpop.f32.mrb[4].mxu1  ;;  %v1019_v32 = vpop.f32.mrb[8].mxu0 }
 0x418   : > { %v1027_v33 = vmul.f32 0.35355338, %v973_v31  ;;  %v1028_v34 = vmul.f32 0.35355338, %v1019_v32  ;;  %v1625_v35 = vpop.f32.mrb[5].mxu1  ;;  %v1631_v36 = vpop.f32.mrb[9].mxu0 }
 0x419   : > { %v976_v37 = vpop.f32.mrb[6].mxu1  ;;  %v1022_v38 = vpop.f32.mrb[10].mxu0 }
 0x41a   : > { %v1626_v40 = vpop.f32.mrb[7].mxu1  ;;  %v1632_v41 = vpop.f32.mrb[11].mxu0  ;;  %v1033_v42 = vsel %vm1925_vm3, -1e+09, %v1027_v33  ;;  %v1034_v43 = vsel %vm1925_vm3, -1e+09, %v1028_v34 }
 0x41b   : > { %v1041_v44 = vsel %vm840_vm2, %v1033_v42, -inf  ;;  %v1044_v45 = vsel %vm840_vm2, %v1034_v43, -inf }
 0x41c   : > { %1042 = vmax.xlane.f32.xlu1 %v1041_v44  ;;  %1045 = vmax.xlane.f32.xlu0 %v1044_v45 }
 0x42d   : > { %688 = vrot.lane.b32.xlu1 %v1843_v22, %s1739_s9 }
 0x4a1   : > { %v1037_v46 = vpop.xlane.xlu1 %1036  ;;  %v1040_v47 = vpop.xlane.xlu0 %1039 }
 0x4a2   : > { %v1047_v48 = vsub.f32 %v1031_v24, %v1037_v46  ;;  %v1048_v50 = vsub.f32 %v1032_v29, %v1040_v47 }
 0x4a4   : > { %v1051_v51 = vmul.f32 1.442695, %v1047_v48  ;;  %v1053_v52 = vmul.f32 1.442695, %v1048_v50 }
 0x4a6   : > { %1692 = vpow2.f32 %v1051_v51 }
 0x4a7   : > { %1694 = vpow2.f32 %v1053_v52 }
 0x4a9   : > { %v1043_v22 = vpop.xlane.xlu1 %1042  ;;  %v1046_v58 = vpop.xlane.xlu0 %1045 }
 0x4aa   : > { %v1049_v57 = vsub.f32 %v1033_v42, %v1043_v22  ;;  %v1050_v59 = vsub.f32 %v1034_v43, %v1046_v58 }
 0x4ac   : > { %v1055_v60 = vmul.f32 1.442695, %v1049_v57  ;;  %v1057_v61 = vmul.f32 1.442695, %v1050_v59 }
 0x4ae   : > { %1696 = vpow2.f32 %v1055_v60 }
 0x4af   : > { %1698 = vpow2.f32 %v1057_v61 }
 0x4b0   : > { %v1942_v53 = vpop.eup %1692 }
 0x4b1   : > { %v1944_v54 = vpop.eup %1694  ;;  %v1059_v55 = vsel %vm840_vm2, %v1942_v53, 0.0 }
 0x4b2   : > { %1060 = vadd.xlane.f32.xlu1 %v1059_v55  ;;  %v1062_v56 = vsel %vm840_vm2, %v1944_v54, 0.0 }
 0x4b3   : > { %1063 = vadd.xlane.f32.xlu0 %v1062_v56 }
 0x4b8   : > { %v1953_v62 = vpop.eup %1696 }
 0x4b9   : > { %v1955_v63 = vpop.eup %1698  ;;  %v1065_v1 = vsel %vm840_vm2, %v1953_v62, 0.0 }
 0x4c3   : > { %692 = vrot.lane.b32.xlu1 %v1852_v27, %s1739_s9  ;;  %v1068_v27 = vsel %vm840_vm2, %v1955_v63, 0.0 }
 0x4c7   : > { %694 = vrot.lane.b32.xlu1 %v1855_v28, %s1739_s9 }
 0x4c9   : > { %690 = vrot.lane.b32.xlu0 %v1849_v26, %s1739_s9  ;;  %v689_v26 = vpop.permute.xlu1 %688 }
 0x4e8   : > { %1066 = vadd.xlane.f32.xlu0 %v1065_v1 }
 0x4eb   : > { %1069 = vadd.xlane.f32.xlu1 %v1068_v27 }
 0x53f   : > { %v1061_v28 = vpop.xlane.xlu1 %1060 }
 0x540   : > { %v1064_v2 = vpop.xlane.xlu0 %1063  ;;  %1700 = vrcp.f32 %v1061_v28 }
 0x541   : > { %1702 = vrcp.f32 %v1064_v2 }
 0x543   : > { %v693_v3 = vpop.permute.xlu1 %692 }
 0x544   : > { %v700_v4 = vcombine.low %v689_v26, %v693_v3  ;;  %v701_v5 = vcombine.high %v689_v26, %v693_v3  ;;  %v691_v6 = vpop.permute.xlu0 %690 }
 0x546   : > { %v708_v11 = vrot.slane %v700_v4, %v1863_v39  ;;  %v715_v12 = vrot.slane %v701_v5, %v1863_v39 }
 0x547   : > { %v695_v7 = vpop.permute.xlu1 %694 }
 0x548   : > { %v716_v9 = vcombine.low %v691_v6, %v695_v7  ;;  %v717_v10 = vcombine.high %v691_v6, %v695_v7  ;;  %v1688_v6 = vld [vmem:[%s2042_s6] sm:$0xff]  }
 0x54a   : > { %v724_v13 = vrot.slane %v716_v9, %v1863_v39  ;;  %v731_v14 = vrot.slane %v717_v10, %v1863_v39  ;;  %v1701_v42 = vpop.eup %1700 }
 0x54b   : > { %v1703_v45 = vpop.eup %1702  ;;  %v1072_v51 = vmul.f32 %v1701_v42, %v1942_v53 }
 0x54c   : > { %v732_v15 = vcombine.low %v708_v11, %v724_v13  ;;  %v733_v16 = vcombine.high %v708_v11, %v724_v13  ;;  %v748_v17 = vcombine.low %v715_v12, %v731_v14  ;;  %v749_v18 = vcombine.high %v715_v12, %v731_v14 }
 0x54d   : > { %v1074_v52 = vmul.f32 %v1703_v45, %v1944_v54  ;;  %v1079_v60 = vpack.c.bf16 %v1072_v51, %v1072_v51 }
 0x54e   : > { %v740_v19 = vrot.slane %v732_v15, %v1873_v49  ;;  %v747_v20 = vrot.slane %v733_v16, %v1873_v49  ;;  %v756_v21 = vrot.slane %v748_v17, %v1873_v49  ;;  %v763_v23 = vrot.slane %v749_v18, %v1873_v49 }
 0x54f   : > { %v1080_v61 = vpack.c.bf16 %v1074_v52, %v1074_v52 }
 0x550   : > { %v768_v24 = vcombine.low %v740_v19, %v747_v20  ;;  %v1561_v29 = vcombine.high %v740_v19, %v747_v20  ;;  %v784_v25 = vcombine.low %v756_v21, %v763_v23  ;;  %v1562_v30 = vcombine.high %v756_v21, %v763_v23 }
 0x552   : > { %v775_v31 = vrot.slane %v768_v24, %v1863_v39  ;;  %v783_v32 = vrot.slane %v1561_v29, %v1863_v39  ;;  %v791_v33 = vrot.slane %v784_v25, %v1863_v39  ;;  %v799_v34 = vrot.slane %v1562_v30, %v1863_v39 }
 0x554   : > { %v800_v35 = vcombine.low %v775_v31, %v783_v32  ;;  %v801_v36 = vcombine.high %v775_v31, %v783_v32  ;;  %v816_v37 = vcombine.low %v791_v33, %v799_v34  ;;  %v817_v38 = vcombine.high %v791_v33, %v799_v34 }
 0x556   : > { %v808_v40 = vrot.slane %v800_v35, %v1873_v49  ;;  %v815_v41 = vrot.slane %v801_v36, %v1873_v49  ;;  %v824_v43 = vrot.slane %v816_v37, %v1873_v49  ;;  %v831_v44 = vrot.slane %v817_v38, %v1873_v49  ;;  %v1689_v37 = vld [vmem:[%s2042_s6 + $0x8] sm:$0xff]  }
 0x558   : > { %v832_v46 = vcombine.low %v808_v40, %v824_v43  ;;  %v833_v47 = vcombine.high %v808_v40, %v824_v43  ;;  %v834_v48 = vcombine.low %v815_v41, %v831_v44  ;;  %v835_v50 = vcombine.high %v815_v41, %v831_v44 }
 0x55a   : > { %v836_v55 = vpack.c.bf16 %v832_v46, %v832_v46  ;;  %v837_v56 = vpack.c.bf16 %v833_v47, %v833_v47  ;;  %v838_v58 = vpack.c.bf16 %v834_v48, %v834_v48  ;;  %v839_v59 = vpack.c.bf16 %v835_v50, %v835_v50 }
 0x55c   : > { %v1088_v22 = vsel %vm1086_vm4, %v836_v55, 0  ;;  %v1134_v57 = vsel %vm1086_vm4, %v837_v56, 0  ;;  %v1180_v53 = vsel %vm1086_vm4, %v838_v58, 0  ;;  %v1226_v54 = vsel %vm1086_vm4, %v839_v59, 0 }
 0x55d   : > { %1634 = vmatpush3.bf16.msra.mxu1 %v1088_v22  ;;  %1640 = vmatpush3.bf16.msra.mxu0 %v1134_v57 }
 0x55e   : > { %1645 = vmatprep.subr.bf16.mxu1 %v1731_v8  ;;  %1651 = vmatprep.subr.bf16.mxu0 %v1731_v8 }
 0x560   : > { %1636 = vmatmul.mubr.msk.bf16.vlgmr.msra.gmra.mrb[8].mxu1 %vm840_vm2, %v1079_v60  ;;  %1642 = vmatmul.mubr.msk.bf16.vlgmr.msra.gmra.mrb[12].mxu0 %vm840_vm2, %v1080_v61 }
 0x561   : > { %1646 = vmatpush3.bf16.msra.mxu1 %v1180_v53  ;;  %1652 = vmatpush3.bf16.msra.mxu0 %v1226_v54 }
 0x562   : > { %1647 = vmatprep.mubr.msk.bf16.mxu1 %vm1732_vm1, %v1731_v8  ;;  %1653 = vmatprep.mubr.msk.bf16.mxu0 %vm1732_vm1, %v1731_v8 }
 0x563   : > { %1657 = vmatprep.subr.bf16.mxu1 %v1731_v8 }
 0x575   : > { %v1067_v1 = vpop.xlane.xlu0 %1066 }
 0x576   : > { %1704 = vrcp.f32 %v1067_v1 }
 0x578   : > { %v1070_v27 = vpop.xlane.xlu1 %1069 }
 0x579   : > { %1706 = vrcp.f32 %v1070_v27 }
 0x580   : > { %v1705_v26 = vpop.eup %1704 }
 0x581   : > { %v1076_v28 = vmul.f32 %v1705_v26, %v1953_v62 }
 0x583   : > { %v1707_v2 = vpop.eup %1706  ;;  %v1081_v3 = vpack.c.bf16 %v1076_v28, %v1076_v28 }
 0x584   : > { %v1078_v4 = vmul.f32 %v1707_v2, %v1955_v63 }
 0x585   : > { %1648 = vmatmul.mubr.msk.bf16.vlgmr.msra.gmra.mrb[12].mxu1 %vm840_vm2, %v1081_v3 }
 0x586   : > { %v1082_v5 = vpack.c.bf16 %v1078_v4, %v1078_v4  ;;  %1661 = vmatprep.mubr.msk.bf16.mxu1 %vm1732_vm1, %v1731_v8  ;;  %1658 = vmatpush3.bf16.msra.mxu1 %v1688_v6 }
 0x587   : > { %1659 = vmatprep.subr.bf16.mxu1 %v1731_v8 }
 0x588   : > { %1654 = vmatmul.mubr.msk.bf16.vlgmr.msra.gmra.mrb[16].mxu0 %vm840_vm2, %v1082_v5  ;;  %v1576_v5 = vld [vmem:[%s2043_s7] ss:$0 sm:$0xff] }
 0x58a   : > { %1660 = vmatpush3.bf16.msra.mxu1 %v1689_v37 }
 0x633   : > { %v1124_v62 = vpop.f32.mrb[8].mxu1  ;;  %v1170_v7 = vpop.f32.mrb[12].mxu0 }
 0x634   : > { %v1637_v9 = vpop.f32.mrb[9].mxu1  ;;  %v1643_v10 = vpop.f32.mrb[13].mxu0 }
 0x635   : > { %v1127_v63 = vpop.f32.mrb[10].mxu1  ;;  %v1173_v11 = vpop.f32.mrb[14].mxu0 }
 0x636   : > { %v1638_v12 = vpop.f32.mrb[11].mxu1  ;;  %v1644_v13 = vpop.f32.mrb[15].mxu0 }
 0x658   : > { %v1216_v14 = vpop.f32.mrb[12].mxu1 }
 0x659   : > { %v1268_v15 = vcombine.low %v1124_v62, %v1216_v14  ;;  %v1269_v16 = vcombine.high %v1124_v62, %v1216_v14  ;;  %v1649_v17 = vpop.f32.mrb[13].mxu1 }
 0x65a   : > { %v1219_v18 = vpop.f32.mrb[14].mxu1 }
 0x65b   : > { %v1650_v19 = vpop.f32.mrb[15].mxu1  ;;  %v1262_v20 = vpop.f32.mrb[16].mxu0  ;;  %v1276_v8 = vrot.slane %v1268_v15, %v1863_v39  ;;  %v1283_v25 = vrot.slane %v1269_v16, %v1863_v39 }
 0x65c   : > { %v1284_v21 = vcombine.low %v1170_v7, %v1262_v20  ;;  %v1285_v23 = vcombine.high %v1170_v7, %v1262_v20  ;;  %v1655_v24 = vpop.f32.mrb[17].mxu0 }
 0x65d   : > { %v1265_v29 = vpop.f32.mrb[18].mxu0 }
 0x65e   : > { %v1292_v30 = vrot.slane %v1284_v21, %v1863_v39  ;;  %v1299_v31 = vrot.slane %v1285_v23, %v1863_v39  ;;  %v1656_v32 = vpop.f32.mrb[19].mxu0 }
 0x660   : > { %v1300_v33 = vcombine.low %v1276_v8, %v1292_v30  ;;  %v1301_v34 = vcombine.high %v1276_v8, %v1292_v30  ;;  %v1316_v35 = vcombine.low %v1283_v25, %v1299_v31  ;;  %v1317_v36 = vcombine.high %v1283_v25, %v1299_v31 }
 0x662   : > { %v1308_v38 = vrot.slane %v1300_v33, %v1873_v49  ;;  %v1315_v40 = vrot.slane %v1301_v34, %v1873_v49  ;;  %v1324_v41 = vrot.slane %v1316_v35, %v1873_v49  ;;  %v1331_v42 = vrot.slane %v1317_v36, %v1873_v49 }
 0x664   : > { %v1336_v43 = vcombine.low %v1308_v38, %v1315_v40  ;;  %v1571_v44 = vcombine.high %v1308_v38, %v1315_v40  ;;  %v1352_v45 = vcombine.low %v1324_v41, %v1331_v42  ;;  %v1572_v46 = vcombine.high %v1324_v41, %v1331_v42 }
 0x666   : > { %v1343_v47 = vrot.slane %v1336_v43, %v1863_v39  ;;  %v1351_v48 = vrot.slane %v1571_v44, %v1863_v39  ;;  %v1359_v50 = vrot.slane %v1352_v45, %v1863_v39  ;;  %v1367_v51 = vrot.slane %v1572_v46, %v1863_v39 }
 0x668   : > { %v1369_v52 = vcombine.high %v1343_v47, %v1351_v48  ;;  %v1385_v55 = vcombine.high %v1359_v50, %v1367_v51  ;;  %v1368_v56 = vcombine.low %v1343_v47, %v1351_v48  ;;  %v1384_v22 = vcombine.low %v1359_v50, %v1367_v51 }
 0x66a   : > { %v1383_v57 = vrot.slane %v1369_v52, %v1873_v49  ;;  %v1399_v58 = vrot.slane %v1385_v55, %v1873_v49  ;;  %v1376_v59 = vrot.slane %v1368_v56, %v1873_v49  ;;  %v1392_v60 = vrot.slane %v1384_v22, %v1873_v49 }
 0x66c   : > { %v1402_v61 = vcombine.low %v1383_v57, %v1399_v58  ;;  %v1401_v53 = vcombine.high %v1376_v59, %v1392_v60  ;;  %v1403_v54 = vcombine.high %v1383_v57, %v1399_v58  ;;  %v1400_v1 = vcombine.low %v1376_v59, %v1392_v60 }
 0x66e   : > { %1409 = vrot.lane.b32.xlu1 %v1402_v61, %s1740_s16  ;;  %1405 = vrot.lane.b32.xlu0 %v1401_v53, %s1741_s17 }
 0x672   : > { %1413 = vrot.lane.b32.xlu0 %v1403_v54, %s1742_s18 }
 0x6e0   : > { %v1406_v39 = vpop.permute.xlu0 %1405  ;;  %v1410_v27 = vpop.permute.xlu1 %1409 }
 0x6e1   : > { %v1416_v26 = vsel %vm840_vm2, %v1400_v1, %v1406_v39 }
 0x6e2   : > { %v1418_v2 = vsel %vm1417_vm5, %v1416_v26, %v1410_v27 }
 0x6e4   : > { %v1414_v28 = vpop.permute.xlu0 %1413 }
 0x6e5   : > { %v1420_v49 = vsel %vm1419_vm6, %v1418_v2, %v1414_v28 }
 0x6e6   : > { %v1421_v3 = vpack.c.bf16 %v1420_v49, %v1420_v49 }
 0x6e8   : > { %1662 = vmatmul.mubr.msk.bf16.vlgmr.msra.gmra.mrb[16].mxu1 %vm285_vm0, %v1421_v3 }
 0x7bb   : > { %v1475_v4 = vpop.f32.mrb[16].mxu1 }
 0x7bc   : > { %v1481_v6 = vadd.f32 %v1475_v4, %v1811_v0  ;;  %v1663_v62 = vpop.f32.mrb[17].mxu1 }
 0x7bd   : > { %v1478_v7 = vpop.f32.mrb[18].mxu1 }
 0x7be   : > { %v1489_v9 = vadd.f32 %v1576_v5, %v1481_v6  ;;  %v1664_v10 = vpop.f32.mrb[19].mxu1 }
 0x7c0   : > { %1490 = vst.msk [vmem:[%s280_s23] sm:$0xff] %vm285_vm0, %v1489_v9 }
 0x7c1 PF: > { %s24_s10 = sadd.s32 1, %s1728_s10  }
 0x7c2   : > { %p21_p9 = scmp.ge.s32.totalorder %s24_s10, 4  }
 0x7c4   :  { %23 = sbr.rel (!%p21_p9) target bundleno = 16 (0x10), region = 78 }

// kernel: transformer_forward.21
= control target key start
LH: loop header
LB: loop body
LE: loop exit
PB: predicated region body
PF: predicated region fallthrough
CT: control target
= control target key end

     0   :  { %10 = vsyncpa [#allocation3], 0  ;;  %s811_s0 = inlined_call_operand.vmem [shape: f32[2,8,32], index: 0, kind: input, shape index: {}]   ;;  %s812_s1 = inlined_call_operand.vmem [shape: f32[1,32], index: 1, kind: input, shape index: {}]   ;;  %s813_s2 = inlined_call_operand.vmem [shape: f32[1,32], index: 2, kind: input, shape index: {}]   ;;  %s814_s3 = inlined_call_operand.vmem [shape: bf16[32,48], index: 3, kind: input, shape index: {}]   ;;  %s815_s4 = inlined_call_operand.vmem [shape: f32[1,48], index: 4, kind: input, shape index: {}]   ;;  %s816_s5 = inlined_call_operand.hbm [shape: f32[2,8,48], index: 5, kind: output, shape index: {}]  }
   0x1   :  { %12 = vsyncpa [#allocation3 + $0x1], 0  ;;  %s681_s18 = smov 0   ;;  %s683_s19 = smov 0  }
   0x2   :  { %s685_s20 = smov 0   ;;  %s687_s21 = smov 0  }
   0x3   :  { %s689_s22 = smov 0   ;;  %s691_s23 = smov 0  }
   0x4 LB: > { %s477_s24 = sadd.s32 4294967295, %s646_s23   ;;  %s478_s25 = sadd.s32 4294967294, %s646_s23   ;;  %s646_s23 = sphi %s691_s23, %s18_s23   ;;  %s642_s22 = sphi %s689_s22, %s823_s22   ;;  %s638_s21 = sphi %s687_s21, %s822_s21   ;;  %s634_s20 = sphi %s685_s20, %s821_s20   ;;  %s630_s19 = sphi %s683_s19, %s820_s19   ;;  %s626_s18 = sphi %s681_s18, %s819_s18  }
   0x5   : > { %s30_s26 = sadd.s32 1, %s642_s22  ;;  %s159_s27 = sadd.s32 1, %s634_s20 }
   0x6   : > { %p32_p0 = scmp.ge.s32.totalorder %s30_s26, 2  ;;  %p169_p1 = scmp.ne.s32.totalorder %s634_s20, %s630_s19 }
   0x7   : > { %p170_p2 = scmp.eq.s32.totalorder %s477_s24, 1  ;;  %p175_p3 = scmp.ne.s32.totalorder %s630_s19, %s626_s18 }
   0x8   : > { %s825_s26 = smov (%p32_p0, %s30_s26), 0  ;;  %p176_p5 = scmp.eq.s32.totalorder %s478_s25, 1 }
   0x9   : > { %p721_p4 = por %p170_p2, %p169_p1  ;;  %s154_s29 = ssub.s32 %s642_s22, %s825_s26 }
   0xa   : > { %p483_p6 = scmp.ge.s32.totalorder %s646_s23, 1  ;;  %p157_p7 = scmp.eq.s32.totalorder %s154_s29, 0 }
   0xb   : > { %p728_p8 = por %p176_p5, %p175_p3  ;;  %p220_p9 = scmp.lt.s32.totalorder %s646_s23, 3 }
   0xc   : > { %s734_s6 = scalar_select %p157_p7, %s634_s20, %s159_s27  }
   0xd   : > { %p221_p10 = pnand %p483_p6, %p220_p9 }
   0xe   : > { %p254_p11 = scmp.lt.s32.totalorder (!%p221_p10), %s638_s21, 1  ;;  %vm269_vm0 = vcmask (!%p221_p10), 261120   ;;  %v564_v7 = vld [vmem:[%s814_s3] sm:$0xff] (!%p221_p10)   ;;  %v648_v8 = vmov (!%p221_p10), 0.0   ;;  %v565_v9 = vld [vmem:[%s814_s3 + $0x8] sm:$0xff] (!%p221_p10)   ;;  %vm649_vm1 = vmmov (!%p221_p10), 0  }
   0xf   : > { %224 = sbr.rel (%p221_p10) target bundleno = 570 (0x23a), region = 40  ;;  %499 = vmatprep.subr.bf16.mxu0 (!%p221_p10), %v648_v8  ;;  %503 = vmatprep.mubr.msk.bf16.mxu0 (!%p221_p10), %vm649_vm1, %v648_v8  ;;  %v486_v14 = vld [vmem:[%s812_s1] ss:$0 sm:$0xff] (!%p221_p10)  ;;  %s251_s27 = sand.u32 (!%p221_p10), 1, %s630_s19   ;;  %vm365_vm2 = vcmask (!%p221_p10), 392192  }
  0x10   : > { %500 = vmatpush3.bf16.msra.mxu0 (!%p221_p10), %v564_v7  ;;  %v487_v16 = vld [vmem:[%s813_s2] ss:$0 sm:$0xff] (!%p221_p10)  ;;  %s484_s29 = sshll.u32 (!%p221_p10), %s251_s27, 3  ;;  %s493_s9 = sshll.u32 (!%p221_p10), %s638_s21, 7 }
  0x11   : > { %501 = vmatprep.subr.bf16.mxu0 (!%p221_p10), %v648_v8  ;;  %v488_v20 = vld [vmem:[%s815_s4] ss:$0 sm:$0xff] (!%p221_p10)  ;;  %s253_s10 = scalar_lea.vmem (!%p221_p10), [#allocation2], %s484_s29  ;;  %s764_s14 = scalar_lea.hbm (!%p221_p10), %s816_s5, %s493_s9 }
  0x12   : > { %s650_s16 = smov (!%p221_p10), [#allocation2]  }
  0x13   : > { %s572_s17 = sshll.u32 (!%p221_p10), %s650_s16, 4  ;;  %s573_s17 = int_to_ptr.vmem [resolvable:$false] %s572_s17 }
  0x14   : > { %502 = vmatpush3.bf16.msra.mxu0 (!%p221_p10), %v565_v9  ;;  %s574_s24 = scalar_lea.vmem (!%p221_p10), %s573_s17, 256 }
  0x16   : > { %s255_s7 = scalar_select %p254_p11, %s638_s21, 1 }
  0x17   : > { %s368_s21 = scalar_lea.sflag [#allocation3], %s251_s27 }
  0x18   : > { %s485_s8 = sshll.u32 %s255_s7, 3 }
  0x19   : > { %s257_s11 = scalar_lea.vmem %s811_s0, %s485_s8 }
  0x1a   : > { %v266_v0 = vld [vmem:[%s257_s11] sm:$0xff]  ;;  %s382_s11 = sshll.u32 %s253_s10, 4  ;;  %s766_s11 = int_to_ptr.vmem [resolvable:$true] %s382_s11 }
  0x1b   : > { %v270_v1 = vsel %vm269_vm0, %v266_v0, 0.0  ;;  %s568_s15 = scalar_lea.vmem %s766_s11, 128  ;;  %p575_p1 = scmp.lt.s32.totalorder %s766_s11, %s573_s17 }
  0x1c   : > { %271 = vadd.xlane.f32.xlu0 %v270_v1  ;;  %p569_p12 = scmp.ne.s32.totalorder %s766_s11, %s568_s15  ;;  %p576_p2 = scmp.lt.s32.totalorder %s574_s24, %s568_s15 }
  0x1e   : > { %p570_p13 = pnand %p569_p12, %p721_p4  ;;  %p577_p3 = por %p576_p2, %p575_p1 }
  0x20   : > { %p571_p0 = pneg %p570_p13 }
  0x22   : > { %p578_p5 = pnand %p577_p3, %p571_p0 }
  0xa9   : > { %v272_v2 = vpop.xlane.xlu0 %271 }
  0xaa   : > { %v274_v3 = vmul.f32 0.03125, %v272_v2 }
  0xac   : > { %v275_v4 = vsub.f32 %v266_v0, %v274_v3 }
  0xae   : > { %v276_v5 = vmul.f32 %v275_v4, %v275_v4 }
  0xb0   : > { %v277_v6 = vsel %vm269_vm0, %v276_v5, 0.0 }
  0xb1   : > { %278 = vadd.xlane.f32.xlu0 %v277_v6 }
 0x13e   : > { %v279_v10 = vpop.xlane.xlu0 %278 }
 0x13f   : > { %v280_v11 = vmul.f32 0.03125, %v279_v10 }
 0x141   : > { %v281_v12 = vadd.f32 1e-05, %v280_v11 }
 0x143   : > { %566 = vrsqrt.f32 %v281_v12 }
 0x14d   : > { %v567_v13 = vpop.eup %566 }
 0x14e   : > { %v283_v15 = vmul.f32 %v567_v13, %v275_v4 }
 0x150   : > { %v290_v17 = vmul.f32 %v486_v14, %v283_v15 }
 0x152   : > { %v297_v18 = vadd.f32 %v487_v16, %v290_v17 }
 0x154   : > { %v298_v19 = vpack.c.bf16 %v297_v18, %v297_v18 }
 0x156   : > { %504 = vmatmul.mubr.msk.bf16.vlgmr.msra.gmra.mrb[0].mxu0 %vm269_vm0, %v298_v19 }
 0x229   : > { %v359_v21 = vpop.f32.mrb[0].mxu0 }
 0x22a   : > { %v360_v22 = vadd.f32 %v488_v20, %v359_v21  ;;  %v505_v23 = vpop.f32.mrb[1].mxu0 }
 0x22b   : > { %v362_v24 = vpop.f32.mrb[2].mxu0 }
 0x22c   : > { %v506_v25 = vpop.f32.mrb[3].mxu0  ;;  %366 = vst.msk [vmem:[%s253_s10] sm:$0xff] %vm365_vm2, %v360_v22 }
 0x22d   : > { %581 = shalt.err (!%p578_p5)
}
 0x22e   : > { %s582_s25 = scalar_lea.hbm %s764_s14, 128  ;;  %s586_s7 = scalar_lea.hbm %s816_s5, 256 }
 0x22f   : > { %p583_p6 = scmp.ne.s32.totalorder %s764_s14, %s582_s25  ;;  %p587_p10 = scmp.lt.u32.totalorder %s764_s14, %s816_s5 }
 0x230   : > { %p588_p11 = scmp.lt.u32.totalorder %s586_s7, %s582_s25  ;;  %p590_p13 = scmp.lt.u32.totalorder %s582_s25, %s764_s14 }
 0x231   : > { %p584_p7 = pnand %p583_p6, %p721_p4 }
 0x232   : > { %p589_p12 = por %p588_p11, %p587_p10 }
 0x233   : > { %p585_p9 = pneg %p584_p7 }
 0x234   : > { %p591_p0 = por %p590_p13, %p589_p12 }
 0x236   : > { %p592_p1 = pnand %p591_p0, %p585_p9 }
 0x238   : > { %595 = shalt.err (!%p592_p1)
}
 0x239   : > { %507 = dma.vmem_to_hbm [thread:$0]  (%p721_p4), %s766_s11, 128, %s764_s14, %s368_s21  }
 0x23a PF: > { %p513_p2 = scmp.ge.s32.totalorder %s646_s23, 2  ;;  %s394_s10 = sand.u32 1, %s626_s18  }
 0x23b   : > { %s395_s12 = scalar_lea.sflag [#allocation3], %s394_s10 }
 0x23c   : > { %p510_p3 = pnand %p513_p2, %p728_p8 }
 0x23e   : > { %621 = dma.done.wait (!%p510_p3), %s395_s12, 128  }
 0x23f   : > { %623 = vsyncadd (!%p510_p3), %s395_s12, 4294967168  ;;  %s18_s23 = sadd.s32 1, %s646_s23   ;;  %s819_s18 = smov %s630_s19 }
 0x240   : > { %p15_p5 = scmp.ge.s32.totalorder %s18_s23, 4   ;;  %s820_s19 = smov %s634_s20 }
 0x241   : > { %s821_s20 = smov %s734_s6  ;;  %s822_s21 = smov %s642_s22 }
 0x242   : > { %s823_s22 = smov %s825_s26  ;;  %17 = sbr.rel (!%p15_p5) target bundleno = 4 (0x4), region = 81 }
 0x249   :  { %400 = vsyncpa [#allocation3], 1 }
 0x24a   :  { %402 = vsyncpa [#allocation3 + $0x1], 1 }

// kernel: transformer_forward.16
= control target key start
LH: loop header
LB: loop body
LE: loop exit
PB: predicated region body
PF: predicated region fallthrough
CT: control target
= control target key end

     0   :  { %s2268_s0 = inlined_call_operand.vmem [shape: s32[2], index: 0, kind: input, shape index: {}]   ;;  %s2269_s1 = inlined_call_operand.vmem [shape: f32[2,8,32], index: 1, kind: input, shape index: {}]   ;;  %s2270_s2 = inlined_call_operand.vmem [shape: f32[2,8,32], index: 2, kind: input, shape index: {}]   ;;  %s2271_s3 = inlined_call_operand.vmem [shape: f32[1,32], index: 3, kind: input, shape index: {}]   ;;  %s2272_s4 = inlined_call_operand.vmem [shape: f32[1,32], index: 4, kind: input, shape index: {}]   ;;  %s2273_s5 = inlined_call_operand.vmem [shape: bf16[32,32], index: 5, kind: input, shape index: {}]   ;;  %s2274_s6 = inlined_call_operand.vmem [shape: f32[1,32], index: 6, kind: input, shape index: {}]   ;;  %s2275_s7 = inlined_call_operand.vmem [shape: bf16[32,64], index: 7, kind: input, shape index: {}]   ;;  %s2276_s8 = inlined_call_operand.vmem [shape: f32[1,64], index: 8, kind: input, shape index: {}]   ;;  %s2277_s9 = inlined_call_operand.vmem [shape: bf16[32,32], index: 9, kind: input, shape index: {}]   ;;  %s2278_s10 = inlined_call_operand.vmem [shape: f32[1,32], index: 10, kind: input, shape index: {}]   ;;  %s2279_s11 = inlined_call_operand.vmem [shape: f32[2,8,32], index: 11, kind: output, shape index: {}]  }
   0x1   :  { %s16_s19 = sshll.u32 %s2268_s0, 4  ;;  %s17_s19 = int_to_ptr.vmem [resolvable:$true] %s16_s19 }
   0x2   :  { %s1901_s20 = scalar_lea.vmem %s17_s19, 16  ;;  %p1906_p1 = scmp.lt.s32.totalorder %s17_s19, %s17_s19 }
   0x3   :  { %p1902_p0 = scmp.ne.s32.totalorder %s17_s19, %s1901_s20  ;;  %p1907_p2 = scmp.lt.s32.totalorder %s1901_s20, %s1901_s20 }
   0x5   :  { %p1908_p3 = por %p1907_p2, %p1906_p1 }
   0x7   :  { %p1909_p4 = pnand %p1908_p3, %p1902_p0 }
   0x9   :  { %1912 = shalt.err (!%p1909_p4)  }
   0xa   :  { %s1923_s21 = smov [#allocation3]  }
   0xb   :  { %19 = dma.vmem_to_smem %s17_s19, 16, %s1923_s21, [#allocation2] }
   0xc   :  { %1917 = dma.done.wait [#allocation2], 16 }
   0xd   :  { %1918 = vsyncadd [#allocation2], 4294967280 }
   0xe   :  { %21 = sfence }
   0xf   :  { %s1998_s22 = smov 0  }
  0x10 LB: > { %s2004_s0 = sadd.s32 4294967295, %s1921_s22   ;;  %p1724_p5 = scmp.ge.s32.totalorder %s1921_s22, 1  ;;  %s1921_s22 = sphi %s1998_s22, %s27_s22  }
  0x11   : > { %p327_p6 = scmp.lt.s32.totalorder %s1921_s22, 3 }
  0x13   : > { %p328_p7 = pnand %p1724_p5, %p327_p6 }
  0x14   : > { %p367_p8 = scmp.lt.s32.totalorder (!%p328_p7), %s2004_s0, 1  ;;  %vm384_vm0 = vcmask (!%p328_p7), 261120   ;;  %v1877_v2 = vld [vmem:[%s2275_s7] sm:$0xff] (!%p328_p7)   ;;  %v1924_v3 = vmov (!%p328_p7), 0.0   ;;  %vm1925_vm1 = vmmov (!%p328_p7), 0   ;;  %v1878_v5 = vld [vmem:[%s2275_s7 + $0x8] sm:$0xff] (!%p328_p7)   ;;  %v548_v31 = vlaneseq (!%p328_p7) }
  0x15   : > { %331 = sbr.rel (%p328_p7) target bundleno = 1859 (0x743), region = 60  ;;  %1793 = vmatprep.subr.bf16.mxu1 (!%p328_p7), %v1924_v3  ;;  %1797 = vmatprep.mubr.msk.bf16.mxu1 (!%p328_p7), %vm1925_vm1, %v1924_v3  ;;  %v1879_v12 = vld [vmem:[%s2273_s5] sm:$0xff] (!%p328_p7)   ;;  %v1880_v13 = vld [vmem:[%s2273_s5 + $0x8] sm:$0xff] (!%p328_p7)   ;;  %s1927_s25 = smov (!%p328_p7), 104   ;;  %v1929_v32 = vmov (!%p328_p7), 1983009808  }
  0x16   : > { %1794 = vmatpush3.bf16.msra.mxu1 (!%p328_p7), %v1877_v2  ;;  %1785 = vmatprep.subr.bf16.mxu0 (!%p328_p7), %v1924_v3  ;;  %v1734_v14 = vld [vmem:[%s2276_s8] ss:$0 sm:$0xff] (!%p328_p7)  ;;  %s1928_s26 = smov (!%p328_p7), 112   ;;  %v565_v33 = vunpack.c.l.s4 (!%p328_p7), %v1929_v32  ;;  %v568_v35 = vshrl.u32 (!%p328_p7), %v548_v31, 7  ;;  %v1930_v39 = vmov (!%p328_p7), 1934713408  }
  0x17   : > { %1795 = vmatprep.subr.bf16.mxu1 (!%p328_p7), %v1924_v3  ;;  %1789 = vmatprep.mubr.msk.bf16.mxu0 (!%p328_p7), %vm1925_vm1, %v1924_v3  ;;  %v1728_v24 = vld [vmem:[%s2271_s3] ss:$0 sm:$0xff] (!%p328_p7)  ;;  %v597_v40 = vunpack.c.l.s4 (!%p328_p7), %v1930_v39  ;;  %vm1004_vm2 = vcmask (!%p328_p7), 64512   ;;  %s547_s14 = sld [smem:[#allocation3 + %s2004_s0]] (!%p328_p7)  ;;  %vm1250_vm4 = vcmask (!%p328_p7), 1043456   ;;  %s1932_s19 = smov (!%p328_p7), 16  }
  0x18   : > { %1786 = vmatpush3.bf16.msra.mxu0 (!%p328_p7), %v1879_v12  ;;  %v1729_v26 = vld [vmem:[%s2272_s4] ss:$0 sm:$0xff] (!%p328_p7)  ;;  %v566_v34 = vunpack.c.0.s8 (!%p328_p7), %v565_v33  ;;  %s1933_s20 = smov (!%p328_p7), 8   ;;  %s1934_s21 = smov (!%p328_p7), 24   ;;  %vm1581_vm5 = vcmask (!%p328_p7), 130048   ;;  %vm1583_vm6 = vcmask (!%p328_p7), 195584  }
  0x19   : > { %1787 = vmatprep.subr.bf16.mxu0 (!%p328_p7), %v1924_v3  ;;  %v598_v45 = vunpack.c.0.s8 (!%p328_p7), %v597_v40 }
  0x1a   : > { %1796 = vmatpush3.bf16.msra.mxu1 (!%p328_p7), %v1878_v5  ;;  %v2078_v38 = vsub.s32 (!%p328_p7), %v566_v34, %v568_v35 }
  0x1b   : > { %1807 = vmatprep.subr.bf16.mxu1 (!%p328_p7), %v1924_v3  ;;  %v2092_v50 = vsub.s32 (!%p328_p7), %v598_v45, %v568_v35 }
  0x1c   : > { %s368_s23 = scalar_select %p367_p8, %s2004_s0, 1  ;;  %1788 = vmatpush3.bf16.msra.mxu0 %v1880_v13 }
  0x1d   : > { %1801 = vmatprep.subr.bf16.mxu0 %v1924_v3  ;;  %s1931_s0 = smov 96  }
  0x1e   : > { %s2010_s24 = sshll.u32 %s368_s23, 3  ;;  %s1926_s23 = smov 120  }
  0x1f   : > { %s370_s27 = scalar_lea.vmem %s2269_s1, %s2010_s24  ;;  %s374_s30 = scalar_lea.vmem %s2270_s2, %s2010_s24 }
  0x20   : > { %v2016_v0 = vld [vmem:[%s370_s27] sm:$0xff]  ;;  %s378_s28 = scalar_lea.vmem %s2279_s11, %s2010_s24 }
  0x21   : > { %v385_v1 = vsel %vm384_vm0, %v2016_v0, 0.0  ;;  %v381_v4 = vld [vmem:[%s374_s30] sm:$0xff] }
  0x22   : > { %386 = vadd.xlane.f32.xlu0 %v385_v1  ;;  %v480_v6 = vpack.c.bf16 %v381_v4, %v381_v4 }
  0x24   : > { %1798 = vmatmul.mubr.msk.bf16.vlgmr.msra.gmra.mrb[0].mxu1 %vm384_vm0, %v480_v6 }
  0x25   : > { %1809 = vmatprep.mubr.msk.bf16.mxu1 %vm1925_vm1, %v1924_v3 }
  0xaf   : > { %v387_v7 = vpop.xlane.xlu0 %386 }
  0xb0   : > { %v389_v8 = vmul.f32 0.03125, %v387_v7 }
  0xb2   : > { %v390_v9 = vsub.f32 %v2016_v0, %v389_v8 }
  0xb4   : > { %v391_v10 = vmul.f32 %v390_v9, %v390_v9 }
  0xb6   : > { %v392_v11 = vsel %vm384_vm0, %v391_v10, 0.0 }
  0xb7   : > { %393 = vadd.xlane.f32.xlu0 %v392_v11 }
  0xf7   : > { %v541_v15 = vpop.f32.mrb[0].mxu1 }
  0xf8   : > { %v2054_v16 = vadd.f32 %v1734_v14, %v541_v15  ;;  %v1799_v17 = vpop.f32.mrb[1].mxu1 }
  0xf9   : > { %v544_v18 = vpop.f32.mrb[2].mxu1 }
  0xfa   : > { %703 = vrot.lane.b32.xlu1 %v2054_v16, %s1926_s23  ;;  %709 = vrot.lane.b32.xlu0 %v2054_v16, %s1927_s25  ;;  %v1800_v19 = vpop.f32.mrb[3].mxu1 }
  0xfe   : > { %706 = vrot.lane.b32.xlu1 %v2054_v16, %s1928_s26 }
 0x144   : > { %v394_v20 = vpop.xlane.xlu0 %393 }
 0x145   : > { %v395_v21 = vmul.f32 0.03125, %v394_v20 }
 0x147   : > { %v396_v22 = vadd.f32 1e-05, %v395_v21 }
 0x149   : > { %1883 = vrsqrt.f32 %v396_v22  ;;  %v1730_v22 = vld [vmem:[%s2274_s6] ss:$0 sm:$0xff] }
 0x153   : > { %v1884_v23 = vpop.eup %1883 }
 0x154   : > { %v398_v25 = vmul.f32 %v1884_v23, %v390_v9 }
 0x156   : > { %v405_v27 = vmul.f32 %v1728_v24, %v398_v25 }
 0x158   : > { %v412_v28 = vadd.f32 %v1729_v26, %v405_v27 }
 0x15a   : > { %v413_v29 = vpack.c.bf16 %v412_v28, %v412_v28 }
 0x15c   : > { %1790 = vmatmul.mubr.msk.bf16.vlgmr.msra.gmra.mrb[0].mxu0 %vm384_vm0, %v413_v29 }
 0x15d   : > { %1803 = vmatprep.mubr.msk.bf16.mxu0 %vm1925_vm1, %v1924_v3 }
 0x16c   : > { %v2071_v30 = vpop.permute.xlu1 %703  ;;  %v2076_v37 = vpop.permute.xlu0 %709 }
 0x16d   : > { %v728_v43 = vcombine.low %v2071_v30, %v2076_v37  ;;  %v729_v44 = vcombine.high %v2071_v30, %v2076_v37 }
 0x16f   : > { %v736_v48 = vrot.slane %v728_v43, %v2078_v38  ;;  %v743_v49 = vrot.slane %v729_v44, %v2078_v38 }
 0x170   : > { %v2074_v36 = vpop.permute.xlu1 %706 }
 0x171   : > { %v712_v41 = vcombine.low %v2054_v16, %v2074_v36  ;;  %v713_v42 = vcombine.high %v2054_v16, %v2074_v36 }
 0x173   : > { %v720_v46 = vrot.slane %v712_v41, %v2078_v38  ;;  %v727_v47 = vrot.slane %v713_v42, %v2078_v38 }
 0x175   : > { %v744_v51 = vcombine.low %v720_v46, %v736_v48  ;;  %v745_v52 = vcombine.high %v720_v46, %v736_v48  ;;  %v760_v53 = vcombine.low %v727_v47, %v743_v49  ;;  %v761_v54 = vcombine.high %v727_v47, %v743_v49 }
 0x177   : > { %v752_v55 = vrot.slane %v744_v51, %v2092_v50  ;;  %v759_v56 = vrot.slane %v745_v52, %v2092_v50  ;;  %v768_v57 = vrot.slane %v760_v53, %v2092_v50  ;;  %v775_v58 = vrot.slane %v761_v54, %v2092_v50 }
 0x179   : > { %v780_v59 = vcombine.low %v752_v55, %v759_v56  ;;  %v1740_v60 = vcombine.high %v752_v55, %v759_v56  ;;  %v796_v61 = vcombine.low %v768_v57, %v775_v58  ;;  %v1741_v62 = vcombine.high %v768_v57, %v775_v58 }
 0x17b   : > { %v787_v63 = vrot.slane %v780_v59, %v2078_v38  ;;  %v795_v1 = vrot.slane %v1740_v60, %v2078_v38  ;;  %v803_v2 = vrot.slane %v796_v61, %v2078_v38  ;;  %v811_v4 = vrot.slane %v1741_v62, %v2078_v38 }
 0x17d   : > { %v812_v5 = vcombine.low %v787_v63, %v795_v1  ;;  %v828_v6 = vcombine.low %v803_v2, %v811_v4  ;;  %v813_v7 = vcombine.high %v787_v63, %v795_v1  ;;  %v829_v8 = vcombine.high %v803_v2, %v811_v4 }
 0x17f   : > { %v820_v9 = vrot.slane %v812_v5, %v2092_v50  ;;  %v836_v10 = vrot.slane %v828_v6, %v2092_v50  ;;  %v827_v11 = vrot.slane %v813_v7, %v2092_v50  ;;  %v843_v12 = vrot.slane %v829_v8, %v2092_v50 }
 0x181   : > { %v844_v13 = vcombine.low %v820_v9, %v836_v10  ;;  %v845_v14 = vcombine.high %v820_v9, %v836_v10  ;;  %v2106_v15 = vcombine.low %v827_v11, %v843_v12  ;;  %v2108_v17 = vcombine.high %v827_v11, %v843_v12 }
 0x183   : > { %v848_v18 = vpack.c.bf16 %v844_v13, %v844_v13  ;;  %v849_v19 = vpack.c.bf16 %v845_v14, %v845_v14  ;;  %v850_v7 = vpack.c.bf16 %v2106_v15, %v2106_v15  ;;  %v851_v8 = vpack.c.bf16 %v2108_v17, %v2108_v17 }
 0x185   : > { %v1009_v20 = vsel %vm1004_vm2, %v848_v18, 0  ;;  %v1055_v21 = vsel %vm1004_vm2, %v849_v19, 0  ;;  %v1101_v13 = vsel %vm1004_vm2, %v850_v7, 0  ;;  %v1147_v14 = vsel %vm1004_vm2, %v851_v8, 0 }
 0x186   : > { %1802 = vmatpush3.bf16.xpose.msra.mxu0 %v1009_v20  ;;  %1808 = vmatpush3.bf16.xpose.msra.mxu1 %v1055_v21  ;;  %v549_v20 = vand.u32 127, %v548_v31  ;;  %v550_v21 = vstv %s547_s14 }
 0x187   : > { %1813 = vmatprep.subr.bf16.mxu0 %v1924_v3  ;;  %1819 = vmatprep.subr.bf16.mxu1 %v1924_v3 }
 0x188   : > { %vm2158_vm3 = vcmp.ge.s32.totalorder %v549_v20, %v550_v21 }
 0x22f   : > { %v474_v23 = vpop.f32.mrb[0].mxu0 }
 0x230   : > { %v475_v24 = vadd.f32 %v1730_v22, %v474_v23  ;;  %v1791_v25 = vpop.f32.mrb[1].mxu0 }
 0x231   : > { %v477_v26 = vpop.f32.mrb[2].mxu0 }
 0x232   : > { %553 = vrot.lane.b32.xlu1 %v475_v24, %s1926_s23  ;;  %v1792_v27 = vpop.f32.mrb[3].mxu0 }
 0x236   : > { %556 = vrot.lane.b32.xlu1 %v475_v24, %s1928_s26 }
 0x23a   : > { %559 = vrot.lane.b32.xlu1 %v475_v24, %s1927_s25 }
 0x2a4   : > { %v554_v28 = vpop.permute.xlu1 %553 }
 0x2a8   : > { %v557_v29 = vpop.permute.xlu1 %556 }
 0x2a9   : > { %v562_v32 = vcombine.low %v475_v24, %v557_v29  ;;  %v563_v33 = vcombine.high %v475_v24, %v557_v29 }
 0x2ab   : > { %v570_v40 = vrot.slane %v562_v32, %v2078_v38  ;;  %v577_v41 = vrot.slane %v563_v33, %v2078_v38 }
 0x2ac   : > { %v560_v34 = vpop.permute.xlu1 %559 }
 0x2ad   : > { %v578_v35 = vcombine.low %v554_v28, %v560_v34  ;;  %v579_v39 = vcombine.high %v554_v28, %v560_v34 }
 0x2af   : > { %v586_v42 = vrot.slane %v578_v35, %v2078_v38  ;;  %v593_v43 = vrot.slane %v579_v39, %v2078_v38 }
 0x2b1   : > { %v594_v44 = vcombine.low %v570_v40, %v586_v42  ;;  %v595_v45 = vcombine.high %v570_v40, %v586_v42  ;;  %v610_v46 = vcombine.low %v577_v41, %v593_v43  ;;  %v611_v47 = vcombine.high %v577_v41, %v593_v43 }
 0x2b3   : > { %v602_v48 = vrot.slane %v594_v44, %v2092_v50  ;;  %v609_v49 = vrot.slane %v595_v45, %v2092_v50  ;;  %v618_v51 = vrot.slane %v610_v46, %v2092_v50  ;;  %v625_v52 = vrot.slane %v611_v47, %v2092_v50 }
 0x2b5   : > { %v630_v53 = vcombine.low %v602_v48, %v609_v49  ;;  %v1738_v54 = vcombine.high %v602_v48, %v609_v49  ;;  %v646_v55 = vcombine.low %v618_v51, %v625_v52  ;;  %v1739_v56 = vcombine.high %v618_v51, %v625_v52 }
 0x2b7   : > { %v637_v57 = vrot.slane %v630_v53, %v2078_v38  ;;  %v645_v58 = vrot.slane %v1738_v54, %v2078_v38  ;;  %v653_v59 = vrot.slane %v646_v55, %v2078_v38  ;;  %v661_v60 = vrot.slane %v1739_v56, %v2078_v38 }
 0x2b9   : > { %v662_v61 = vcombine.low %v637_v57, %v645_v58  ;;  %v678_v62 = vcombine.low %v653_v59, %v661_v60  ;;  %v663_v63 = vcombine.high %v637_v57, %v645_v58  ;;  %v679_v1 = vcombine.high %v653_v59, %v661_v60 }
 0x2bb   : > { %v670_v2 = vrot.slane %v662_v61, %v2092_v50  ;;  %v686_v4 = vrot.slane %v678_v62, %v2092_v50  ;;  %v677_v11 = vrot.slane %v663_v63, %v2092_v50  ;;  %v693_v12 = vrot.slane %v679_v1, %v2092_v50 }
 0x2bd   : > { %v694_v5 = vcombine.low %v670_v2, %v686_v4  ;;  %v695_v6 = vcombine.high %v670_v2, %v686_v4  ;;  %v696_v15 = vcombine.low %v677_v11, %v693_v12  ;;  %v697_v17 = vcombine.high %v677_v11, %v693_v12 }
 0x2bf   : > { %v698_v9 = vpack.c.bf16 %v694_v5, %v694_v5  ;;  %v699_v10 = vpack.c.bf16 %v695_v6, %v695_v6  ;;  %v700_v18 = vpack.c.bf16 %v696_v15, %v696_v15  ;;  %v701_v19 = vpack.c.bf16 %v697_v17, %v697_v17 }
 0x2c1   : > { %1804 = vmatmul.mubr.msk.bf16.vlgmr.msra.gmra.mrb[4].mxu0 %vm1004_vm2, %v698_v9  ;;  %1810 = vmatmul.mubr.msk.bf16.vlgmr.msra.gmra.mrb[4].mxu1 %vm1004_vm2, %v699_v10 }
 0x2c2   : > { %1814 = vmatpush3.bf16.xpose.msra.mxu0 %v1101_v13  ;;  %1820 = vmatpush3.bf16.xpose.msra.mxu1 %v1147_v14 }
 0x2c3   : > { %1815 = vmatprep.mubr.msk.bf16.mxu0 %vm1925_vm1, %v1924_v3  ;;  %1821 = vmatprep.mubr.msk.bf16.mxu1 %vm1925_vm1, %v1924_v3 }
 0x2c4   : > { %1825 = vmatprep.subr.bf16.mxu0 %v1924_v3  ;;  %1831 = vmatprep.subr.bf16.mxu1 %v1924_v3 }
 0x2c9   : > { %1816 = vmatmul.mubr.msk.bf16.vlgmr.msra.gmra.mrb[8].mxu0 %vm1004_vm2, %v700_v18  ;;  %1822 = vmatmul.mubr.msk.bf16.vlgmr.msra.gmra.mrb[8].mxu1 %vm1004_vm2, %v701_v19 }
 0x2ca   : > { %1827 = vmatprep.mubr.msk.bf16.mxu0 %vm1925_vm1, %v1924_v3  ;;  %1833 = vmatprep.mubr.msk.bf16.mxu1 %vm1925_vm1, %v1924_v3 }
 0x394   : > { %v1045_v22 = vpop.f32.mrb[4].mxu0  ;;  %v1091_v23 = vpop.f32.mrb[4].mxu1 }
 0x395   : > { %v1189_v25 = vmul.f32 0.35355338, %v1045_v22  ;;  %v1190_v26 = vmul.f32 0.35355338, %v1091_v23  ;;  %v1805_v27 = vpop.f32.mrb[5].mxu0  ;;  %v1811_v28 = vpop.f32.mrb[5].mxu1 }
 0x396   : > { %v1048_v29 = vpop.f32.mrb[6].mxu0  ;;  %v1094_v32 = vpop.f32.mrb[6].mxu1 }
 0x397   : > { %v1806_v33 = vpop.f32.mrb[7].mxu0  ;;  %v1812_v34 = vpop.f32.mrb[7].mxu1  ;;  %v1196_v35 = vsel %vm2158_vm3, -1e+09, %v1190_v26  ;;  %v1195_v31 = vsel %vm2158_vm3, -1e+09, %v1189_v25 }
 0x398   : > { %v1202_v39 = vsel %vm1004_vm2, %v1196_v35, -inf  ;;  %v1199_v40 = vsel %vm1004_vm2, %v1195_v31, -inf }
 0x399   : > { %1203 = vmax.xlane.f32.xlu0 %v1202_v39  ;;  %1200 = vmax.xlane.f32.xlu1 %v1199_v40 }
 0x39c   : > { %v1137_v41 = vpop.f32.mrb[8].mxu0  ;;  %v1183_v42 = vpop.f32.mrb[8].mxu1 }
 0x39d   : > { %v1191_v43 = vmul.f32 0.35355338, %v1137_v41  ;;  %v1192_v44 = vmul.f32 0.35355338, %v1183_v42  ;;  %v1817_v45 = vpop.f32.mrb[9].mxu0  ;;  %v1823_v46 = vpop.f32.mrb[9].mxu1 }
 0x39e   : > { %v1140_v47 = vpop.f32.mrb[10].mxu0  ;;  %v1186_v48 = vpop.f32.mrb[10].mxu1 }
 0x39f   : > { %v1818_v49 = vpop.f32.mrb[11].mxu0  ;;  %v1824_v51 = vpop.f32.mrb[11].mxu1  ;;  %v1197_v52 = vsel %vm2158_vm3, -1e+09, %v1191_v43  ;;  %v1198_v54 = vsel %vm2158_vm3, -1e+09, %v1192_v44 }
 0x3a0   : > { %v1205_v53 = vsel %vm1004_vm2, %v1197_v52, -inf  ;;  %v1208_v55 = vsel %vm1004_vm2, %v1198_v54, -inf }
 0x3a1   : > { %1206 = vmax.xlane.f32.xlu1 %v1205_v53 }
 0x3a5   : > { %1209 = vmax.xlane.f32.xlu1 %v1208_v55 }
 0x3af   : > { %852 = vrot.lane.b32.xlu0 %v2054_v16, %s1931_s0 }
 0x3b6   : > { %854 = vrot.lane.b32.xlu1 %v2071_v30, %s1931_s0 }
 0x426   : > { %v1204_v56 = vpop.xlane.xlu0 %1203  ;;  %v1201_v57 = vpop.xlane.xlu1 %1200 }
 0x427   : > { %v1212_v58 = vsub.f32 %v1196_v35, %v1204_v56  ;;  %v1211_v59 = vsub.f32 %v1195_v31, %v1201_v57 }
 0x429   : > { %v1217_v60 = vmul.f32 1.442695, %v1212_v58  ;;  %v1215_v61 = vmul.f32 1.442695, %v1211_v59 }
 0x42a   : > { %v853_v11 = vpop.permute.xlu0 %852 }
 0x42b   : > { %1885 = vpow2.f32 %v1217_v60 }
 0x42c   : > { %1887 = vpow2.f32 %v1215_v61 }
 0x42e   : > { %v1207_v30 = vpop.xlane.xlu1 %1206 }
 0x42f   : > { %v1213_v4 = vsub.f32 %v1197_v52, %v1207_v30 }
 0x431   : > { %v1219_v6 = vmul.f32 1.442695, %v1213_v4 }
 0x432   : > { %v1210_v2 = vpop.xlane.xlu1 %1209 }
 0x433   : > { %v1214_v5 = vsub.f32 %v1198_v54, %v1210_v2  ;;  %1889 = vpow2.f32 %v1219_v6 }
 0x435   : > { %v2176_v62 = vpop.eup %1885  ;;  %v1221_v7 = vmul.f32 1.442695, %v1214_v5 }
 0x436   : > { %v2178_v63 = vpop.eup %1887  ;;  %v1226_v1 = vsel %vm1004_vm2, %v2176_v62, 0.0 }
 0x437   : > { %v1223_v16 = vsel %vm1004_vm2, %v2178_v63, 0.0  ;;  %1227 = vadd.xlane.f32.xlu1 %v1226_v1  ;;  %1891 = vpow2.f32 %v1221_v7 }
 0x438   : > { %1224 = vadd.xlane.f32.xlu0 %v1223_v16 }
 0x43d   : > { %v2186_v8 = vpop.eup %1889 }
 0x43e   : > { %v1229_v10 = vsel %vm1004_vm2, %v2186_v8, 0.0 }
 0x441   : > { %v2188_v9 = vpop.eup %1891 }
 0x448   : > { %856 = vrot.lane.b32.xlu1 %v2074_v36, %s1931_s0  ;;  %v1232_v36 = vsel %vm1004_vm2, %v2188_v9, 0.0 }
 0x44e   : > { %858 = vrot.lane.b32.xlu0 %v2076_v37, %s1931_s0  ;;  %v855_v37 = vpop.permute.xlu1 %854 }
 0x46c   : > { %1230 = vadd.xlane.f32.xlu1 %v1229_v10 }
 0x46d   : > { %1233 = vadd.xlane.f32.xlu0 %v1232_v36 }
 0x4c4   : > { %v1228_v12 = vpop.xlane.xlu1 %1227 }
 0x4c5   : > { %v1225_v13 = vpop.xlane.xlu0 %1224  ;;  %1893 = vrcp.f32 %v1228_v12 }
 0x4c6   : > { %1895 = vrcp.f32 %v1225_v13 }
 0x4c8   : > { %v857_v14 = vpop.permute.xlu1 %856 }
 0x4c9   : > { %v859_v15 = vpop.permute.xlu0 %858  ;;  %v864_v17 = vcombine.low %v853_v11, %v857_v14  ;;  %v865_v18 = vcombine.high %v853_v11, %v857_v14 }
 0x4ca   : > { %v880_v19 = vcombine.low %v855_v37, %v859_v15  ;;  %v881_v20 = vcombine.high %v855_v37, %v859_v15 }
 0x4cb   : > { %v872_v21 = vrot.slane %v864_v17, %v2078_v38  ;;  %v879_v22 = vrot.slane %v865_v18, %v2078_v38  ;;  %v1881_v17 = vld [vmem:[%s2277_s9] sm:$0xff]  }
 0x4cc   : > { %v888_v23 = vrot.slane %v880_v19, %v2078_v38  ;;  %v895_v24 = vrot.slane %v881_v20, %v2078_v38 }
 0x4ce   : > { %v896_v25 = vcombine.low %v872_v21, %v888_v23  ;;  %v897_v26 = vcombine.high %v872_v21, %v888_v23  ;;  %v912_v27 = vcombine.low %v879_v22, %v895_v24  ;;  %v913_v28 = vcombine.high %v879_v22, %v895_v24 }
 0x4cf   : > { %v1894_v52 = vpop.eup %1893 }
 0x4d0   : > { %v904_v29 = vrot.slane %v896_v25, %v2092_v50  ;;  %v911_v32 = vrot.slane %v897_v26, %v2092_v50  ;;  %v920_v33 = vrot.slane %v912_v27, %v2092_v50  ;;  %v927_v34 = vrot.slane %v913_v28, %v2092_v50  ;;  %v1896_v55 = vpop.eup %1895 }
 0x4d1   : > { %v1236_v60 = vmul.f32 %v1896_v55, %v2178_v63  ;;  %v1238_v61 = vmul.f32 %v1894_v52, %v2176_v62 }
 0x4d2   : > { %v932_v35 = vcombine.low %v904_v29, %v911_v32  ;;  %v1742_v31 = vcombine.high %v904_v29, %v911_v32  ;;  %v948_v39 = vcombine.low %v920_v33, %v927_v34  ;;  %v1743_v40 = vcombine.high %v920_v33, %v927_v34 }
 0x4d3   : > { %v1243_v6 = vpack.c.bf16 %v1236_v60, %v1236_v60  ;;  %v1244_v7 = vpack.c.bf16 %v1238_v61, %v1238_v61 }
 0x4d4   : > { %v939_v41 = vrot.slane %v932_v35, %v2078_v38  ;;  %v947_v42 = vrot.slane %v1742_v31, %v2078_v38  ;;  %v955_v43 = vrot.slane %v948_v39, %v2078_v38  ;;  %v963_v44 = vrot.slane %v1743_v40, %v2078_v38 }
 0x4d6   : > { %v964_v45 = vcombine.low %v939_v41, %v947_v42  ;;  %v965_v46 = vcombine.high %v939_v41, %v947_v42  ;;  %v980_v47 = vcombine.low %v955_v43, %v963_v44  ;;  %v981_v48 = vcombine.high %v955_v43, %v963_v44 }
 0x4d8   : > { %v972_v49 = vrot.slane %v964_v45, %v2092_v50  ;;  %v979_v51 = vrot.slane %v965_v46, %v2092_v50  ;;  %v988_v53 = vrot.slane %v980_v47, %v2092_v50  ;;  %v995_v54 = vrot.slane %v981_v48, %v2092_v50  ;;  %v1882_v47 = vld [vmem:[%s2277_s9 + $0x8] sm:$0xff]  }
 0x4da   : > { %v996_v56 = vcombine.low %v972_v49, %v988_v53  ;;  %v997_v57 = vcombine.high %v972_v49, %v988_v53  ;;  %v998_v58 = vcombine.low %v979_v51, %v995_v54  ;;  %v999_v59 = vcombine.high %v979_v51, %v995_v54 }
 0x4dc   : > { %v1000_v1 = vpack.c.bf16 %v996_v56, %v996_v56  ;;  %v1001_v16 = vpack.c.bf16 %v997_v57, %v997_v57  ;;  %v1002_v4 = vpack.c.bf16 %v998_v58, %v998_v58  ;;  %v1003_v5 = vpack.c.bf16 %v999_v59, %v999_v59 }
 0x4de   : > { %v1252_v30 = vsel %vm1250_vm4, %v1000_v1, 0  ;;  %v1298_v2 = vsel %vm1250_vm4, %v1001_v16, 0  ;;  %v1344_v62 = vsel %vm1250_vm4, %v1002_v4, 0  ;;  %v1390_v63 = vsel %vm1250_vm4, %v1003_v5, 0 }
 0x4df   : > { %1826 = vmatpush3.bf16.msra.mxu0 %v1252_v30  ;;  %1832 = vmatpush3.bf16.msra.mxu1 %v1298_v2 }
 0x4e0   : > { %1837 = vmatprep.subr.bf16.mxu0 %v1924_v3  ;;  %1843 = vmatprep.subr.bf16.mxu1 %v1924_v3 }
 0x4e2   : > { %1828 = vmatmul.mubr.msk.bf16.vlgmr.msra.gmra.mrb[12].mxu0 %vm1004_vm2, %v1243_v6  ;;  %1834 = vmatmul.mubr.msk.bf16.vlgmr.msra.gmra.mrb[12].mxu1 %vm1004_vm2, %v1244_v7 }
 0x4e3   : > { %1838 = vmatpush3.bf16.msra.mxu0 %v1344_v62  ;;  %1844 = vmatpush3.bf16.msra.mxu1 %v1390_v63 }
 0x4e4   : > { %1839 = vmatprep.mubr.msk.bf16.mxu0 %vm1925_vm1, %v1924_v3  ;;  %1845 = vmatprep.mubr.msk.bf16.mxu1 %vm1925_vm1, %v1924_v3 }
 0x4e5   : > { %1849 = vmatprep.subr.bf16.mxu0 %v1924_v3 }
 0x4f9   : > { %v1231_v10 = vpop.xlane.xlu1 %1230 }
 0x4fa   : > { %v1234_v36 = vpop.xlane.xlu0 %1233  ;;  %1897 = vrcp.f32 %v1231_v10 }
 0x4fb   : > { %1899 = vrcp.f32 %v1234_v36 }
 0x504   : > { %v1898_v37 = vpop.eup %1897 }
 0x505   : > { %v1900_v11 = vpop.eup %1899  ;;  %v1240_v12 = vmul.f32 %v1898_v37, %v2186_v8 }
 0x506   : > { %v1242_v13 = vmul.f32 %v1900_v11, %v2188_v9 }
 0x507   : > { %v1245_v14 = vpack.c.bf16 %v1240_v12, %v1240_v12 }
 0x508   : > { %v1246_v15 = vpack.c.bf16 %v1242_v13, %v1242_v13 }
 0x509   : > { %1840 = vmatmul.mubr.msk.bf16.vlgmr.msra.gmra.mrb[16].mxu0 %vm1004_vm2, %v1245_v14 }
 0x50a   : > { %1846 = vmatmul.mubr.msk.bf16.vlgmr.msra.gmra.mrb[16].mxu1 %vm1004_vm2, %v1246_v15  ;;  %1853 = vmatprep.mubr.msk.bf16.mxu0 %vm1925_vm1, %v1924_v3  ;;  %v1757_v15 = vld [vmem:[%s2278_s10] ss:$0 sm:$0xff] }
 0x50b   : > { %1850 = vmatpush3.bf16.msra.mxu0 %v1881_v17 }
 0x50c   : > { %1851 = vmatprep.subr.bf16.mxu0 %v1924_v3 }
 0x50f   : > { %1852 = vmatpush3.bf16.msra.mxu0 %v1882_v47 }
 0x5b5   : > { %v1288_v18 = vpop.f32.mrb[12].mxu0  ;;  %v1334_v8 = vpop.f32.mrb[12].mxu1 }
 0x5b6   : > { %v1829_v19 = vpop.f32.mrb[13].mxu0  ;;  %v1835_v9 = vpop.f32.mrb[13].mxu1 }
 0x5b7   : > { %v1291_v20 = vpop.f32.mrb[14].mxu0  ;;  %v1337_v21 = vpop.f32.mrb[14].mxu1 }
 0x5b8   : > { %v1830_v22 = vpop.f32.mrb[15].mxu0  ;;  %v1836_v23 = vpop.f32.mrb[15].mxu1 }
 0x5dc   : > { %v1380_v24 = vpop.f32.mrb[16].mxu0 }
 0x5dd   : > { %v1432_v25 = vcombine.low %v1288_v18, %v1380_v24  ;;  %v1433_v26 = vcombine.high %v1288_v18, %v1380_v24  ;;  %v1426_v27 = vpop.f32.mrb[16].mxu1  ;;  %v1841_v28 = vpop.f32.mrb[17].mxu0 }
 0x5de   : > { %v1448_v29 = vcombine.low %v1334_v8, %v1426_v27  ;;  %v1449_v32 = vcombine.high %v1334_v8, %v1426_v27  ;;  %v1847_v33 = vpop.f32.mrb[17].mxu1  ;;  %v1383_v34 = vpop.f32.mrb[18].mxu0 }
 0x5df   : > { %v1440_v35 = vrot.slane %v1432_v25, %v2078_v38  ;;  %v1447_v3 = vrot.slane %v1433_v26, %v2078_v38  ;;  %v1429_v31 = vpop.f32.mrb[18].mxu1  ;;  %v1842_v39 = vpop.f32.mrb[19].mxu0 }
 0x5e0   : > { %v1456_v40 = vrot.slane %v1448_v29, %v2078_v38  ;;  %v1463_v41 = vrot.slane %v1449_v32, %v2078_v38  ;;  %v1848_v42 = vpop.f32.mrb[19].mxu1 }
 0x5e2   : > { %v1464_v43 = vcombine.low %v1440_v35, %v1456_v40  ;;  %v1465_v44 = vcombine.high %v1440_v35, %v1456_v40  ;;  %v1480_v45 = vcombine.low %v1447_v3, %v1463_v41  ;;  %v1481_v46 = vcombine.high %v1447_v3, %v1463_v41 }
 0x5e4   : > { %v1472_v48 = vrot.slane %v1464_v43, %v2092_v50  ;;  %v1479_v49 = vrot.slane %v1465_v44, %v2092_v50  ;;  %v1488_v51 = vrot.slane %v1480_v45, %v2092_v50  ;;  %v1495_v52 = vrot.slane %v1481_v46, %v2092_v50 }
 0x5e6   : > { %v1500_v53 = vcombine.low %v1472_v48, %v1479_v49  ;;  %v1752_v54 = vcombine.high %v1472_v48, %v1479_v49  ;;  %v1516_v55 = vcombine.low %v1488_v51, %v1495_v52  ;;  %v1753_v56 = vcombine.high %v1488_v51, %v1495_v52 }
 0x5e8   : > { %v1507_v57 = vrot.slane %v1500_v53, %v2078_v38  ;;  %v1515_v58 = vrot.slane %v1752_v54, %v2078_v38  ;;  %v1523_v59 = vrot.slane %v1516_v55, %v2078_v38  ;;  %v1531_v60 = vrot.slane %v1753_v56, %v2078_v38 }
 0x5ea   : > { %v1533_v61 = vcombine.high %v1507_v57, %v1515_v58  ;;  %v1549_v1 = vcombine.high %v1523_v59, %v1531_v60  ;;  %v1532_v16 = vcombine.low %v1507_v57, %v1515_v58  ;;  %v1548_v30 = vcombine.low %v1523_v59, %v1531_v60 }
 0x5ec   : > { %v1547_v2 = vrot.slane %v1533_v61, %v2092_v50  ;;  %v1563_v4 = vrot.slane %v1549_v1, %v2092_v50  ;;  %v1540_v5 = vrot.slane %v1532_v16, %v2092_v50  ;;  %v1556_v6 = vrot.slane %v1548_v30, %v2092_v50 }
 0x5ee   : > { %v1566_v7 = vcombine.low %v1547_v2, %v1563_v4  ;;  %v1565_v62 = vcombine.high %v1540_v5, %v1556_v6  ;;  %v1567_v63 = vcombine.high %v1547_v2, %v1563_v4  ;;  %v1564_v10 = vcombine.low %v1540_v5, %v1556_v6 }
 0x5f0   : > { %1573 = vrot.lane.b32.xlu1 %v1566_v7, %s1932_s19  ;;  %1569 = vrot.lane.b32.xlu0 %v1565_v62, %s1933_s20 }
 0x5f4   : > { %1577 = vrot.lane.b32.xlu1 %v1567_v63, %s1934_s21 }
 0x662   : > { %v1574_v38 = vpop.permute.xlu1 %1573  ;;  %v1570_v36 = vpop.permute.xlu0 %1569 }
 0x663   : > { %v1580_v37 = vsel %vm1004_vm2, %v1564_v10, %v1570_v36 }
 0x664   : > { %v1582_v12 = vsel %vm1581_vm5, %v1580_v37, %v1574_v38 }
 0x666   : > { %v1578_v11 = vpop.permute.xlu1 %1577 }
 0x667   : > { %v1584_v50 = vsel %vm1583_vm6, %v1582_v12, %v1578_v11 }
 0x668   : > { %v1585_v13 = vpack.c.bf16 %v1584_v50, %v1584_v50 }
 0x66a   : > { %1854 = vmatmul.mubr.msk.bf16.vlgmr.msra.gmra.mrb[20].mxu0 %vm384_vm0, %v1585_v13 }
 0x73d   : > { %v1639_v14 = vpop.f32.mrb[20].mxu0 }
 0x73e   : > { %v1645_v17 = vadd.f32 %v1639_v14, %v2016_v0  ;;  %v1855_v18 = vpop.f32.mrb[21].mxu0 }
 0x73f   : > { %v1642_v8 = vpop.f32.mrb[22].mxu0 }
 0x740   : > { %v1653_v19 = vadd.f32 %v1757_v15, %v1645_v17  ;;  %v1856_v9 = vpop.f32.mrb[23].mxu0 }
 0x742   : > { %1654 = vst.msk [vmem:[%s378_s28] sm:$0xff] %vm384_vm0, %v1653_v19 }
 0x743 PF: > { %s27_s22 = sadd.s32 1, %s1921_s22  }
 0x744   : > { %p24_p9 = scmp.ge.s32.totalorder %s27_s22, 4  }
 0x746   :  { %26 = sbr.rel (!%p24_p9) target bundleno = 16 (0x10), region = 93 }

</bundles_post_ra>
